<compile_context>
chip_gen: v7x
topology: tpu7x:2x2x1
jax: 0.10.0
libtpu: 0.0.40
codegen_flags: <defaults>
</compile_context>

<pallas_src>
import functools
import math

import jax
import jax.numpy as jnp
from jax.experimental import pallas as pl
from jax.experimental.pallas import tpu as pltpu


# ------------------------------ fused kernel --------------------------------

def fpn_fused_kernel(x_ref, w_s1_ref, b_s1_ref, g_ref, bt_ref, w1b_ref, b1b_ref,
                     o2_ref, o1_ref):
    """One row-tile of pixels -> both FPN branches.

    x_ref    : (tm, C)    f32 input pixels (NHWC rows)
    w_s1_ref : (C, 8C)    bf16  [W2 | W1a], cols ordered (branch, kh, kw, c)
    b_s1_ref : (1, 8C)    f32   [b2 | b1a]
    g/bt     : (1, C)     LayerNorm gamma / beta
    w1b_ref  : (C, 4C)    bf16 second fpn1 ConvT weight, cols (kh, kw, c)
    b1b_ref  : (1, 4C)    f32
    o2_ref   : (tm, 4C)   fpn2 output, cols (kh, kw, c)
    o1_ref   : (tm, 16C)  fpn1 output, cols (kh1, kw1, kh2, kw2, c)
    """
    C = g_ref.shape[-1]
    tm = x_ref.shape[0]
    x = x_ref[...].astype(jnp.bfloat16)          # bf16 MXU feed, f32 accumulation

    # ---- fused stage 1: [fpn2 | fpn1a] ConvTranspose2d(k=2,s=2) in one pass ----
    y = jnp.dot(x, w_s1_ref[...], preferred_element_type=jnp.float32) + b_s1_ref[...]
    o2_ref[...] = y[:, :4 * C].astype(o2_ref.dtype)
    y1 = y[:, 4 * C:]                            # (tm, 4C) f32, fpn1 intermediate

    # Hoisted broadcasts (JAX does not CSE broadcast_in_dim inside the loop).
    gamma = jnp.broadcast_to(g_ref[...], (tm, C))
    beta = jnp.broadcast_to(bt_ref[...], (tm, C))
    inv_sqrt2 = jnp.float32(1.0 / math.sqrt(2.0))
    inv_c = jnp.float32(1.0 / C)

    # ---- fpn1 stage 2: per-(kh,kw) Norm2d -> GELU, then ONE matmul vs W1b ----
    gelu_chunks = []
    for j in range(4):
        chunk = y1[:, j * C:(j + 1) * C]                         # (tm, C) f32
        mean = jnp.sum(chunk, axis=-1, keepdims=True) * inv_c
        mean_sq = jnp.sum(chunk * chunk, axis=-1, keepdims=True) * inv_c
        var = mean_sq - mean * mean                              # one-pass stats
        xn = (chunk - mean) * jax.lax.rsqrt(var + 1e-6)
        xn = xn * gamma + beta
        # exact erf-GELU, matching torch.nn.GELU() default
        g = 0.5 * xn * (1.0 + jax.lax.erf(xn * inv_sqrt2))
        gelu_chunks.append(g.astype(jnp.bfloat16))

    gstack = jnp.concatenate(gelu_chunks, axis=0)                # (4*tm, C) bf16
    z = jnp.dot(gstack, w1b_ref[...],
                preferred_element_type=jnp.float32) + b1b_ref[...]   # (4*tm, 4C)
    for j in range(4):
        o1_ref[:, j * 4 * C:(j + 1) * 4 * C] = (
            z[j * tm:(j + 1) * tm, :].astype(o1_ref.dtype))


# ------------------------------ pallas wrapper -------------------------------

def _vmem_limits():
    """Generation-aware (vmem_limit_bytes, tile budget)."""
    try:
        cap = pltpu.get_tpu_info().vmem_capacity_bytes
    except Exception:
        cap = None
    if cap is not None and cap >= 100 * 1024 * 1024:
        # v5e / v6e: 128 MiB physical VMEM -> use most of it for bigger tiles.
        return 100 * 1024 * 1024, 80 * 1024 * 1024
    # v7x (64 MiB physical) or unknown: stay conservative.
    return 48 * 1024 * 1024, 38 * 1024 * 1024


def _pick_tile_m(M, C, out_bytes, vmem_budget, target=512):
    """Largest 8-aligned row tile (<= target) whose real footprint fits the
    VMEM budget; small M is split into an even number of grid steps so both
    v7x TensorCores get equal work."""
    # Per-row VMEM bytes:
    #   double-buffered I/O tiles: x f32, o2 (4C), o1 (16C)
    io = 2 * (4 * C * 4 + (4 * C + 16 * C) * out_bytes)
    #   single-buffered intermediates: x bf16 (2C), stage-1 f32 (32C),
    #   gelu bf16 stack (8C), stacked stage-2 f32 (64C), slack (16C)
    inter = (2 + 32 + 8 + 64 + 16) * C
    bytes_per_row = io + inter
    # Resident weights: [W2|W1a] (C,8C) bf16 + W1b (C,4C) bf16 + f32 vectors.
    weight_bytes = (8 * C * C + 4 * C * C) * 2 + (8 * C + 4 * C + 2 * C) * 4
    avail = vmem_budget - weight_bytes
    if avail < 8 * bytes_per_row:
        # TODO(synk): for very large embed_dim add an 'arbitrary' grid axis that
        # tiles the weight columns instead of keeping all weights resident.
        raise ValueError(
            f"embed_dim={C}: resident weights ({weight_bytes} B) leave no room "
            f"in the VMEM budget ({vmem_budget} B); needs weight-column tiling.")
    fit = avail // bytes_per_row
    tile = max(8, min(target, (fit // 8) * 8))
    if M <= tile:
        # Small M: exactly 2 (even) grid steps keeps both v7x cores busy.
        half = -(-M // 2)
        tile = max(8, -(-half // 8) * 8)
    return tile


def fpn_fused_call(x_flat, mm, *, out_dtype=jnp.bfloat16, tile_m=None,
                   single_buffer_params=True):
    """x_flat: (M, C) f32 pixel rows.  Returns (y1 (M,16C), y2 (M,4C))."""
    M, C = x_flat.shape
    vmem_limit, vmem_budget = _vmem_limits()
    out_bytes = jnp.dtype(out_dtype).itemsize
    if tile_m is None:
        tile_m = _pick_tile_m(M, C, out_bytes, vmem_budget)
    grid = (pl.cdiv(M, tile_m),)

    # Constant-index weight/bias blocks: single-buffer so VMEM goes to row tiles.
    const_kw = {"pipeline_mode": pl.Buffered(1)} if single_buffer_params else {}

    def const_spec(rows, width):
        return pl.BlockSpec((rows, width), lambda i: (0, 0), **const_kw)

    y2, y1 = pl.pallas_call(
        fpn_fused_kernel,
        out_shape=(
            jax.ShapeDtypeStruct((M, 4 * C), out_dtype),
            jax.ShapeDtypeStruct((M, 16 * C), out_dtype),
        ),
        grid_spec=pltpu.PrefetchScalarGridSpec(
            num_scalar_prefetch=0,
            grid=grid,
            in_specs=[
                pl.BlockSpec((tile_m, C), lambda i: (i, 0)),   # x rows
                const_spec(C, 8 * C),        # [W2 | W1a]
                const_spec(1, 8 * C),        # [b2 | b1a]
                const_spec(1, C),            # ln gamma
                const_spec(1, C),            # ln beta
                const_spec(C, 4 * C),        # W1b
                const_spec(1, 4 * C),        # b1b
            ],
            out_specs=[
                pl.BlockSpec((tile_m, 4 * C), lambda i: (i, 0)),
                pl.BlockSpec((tile_m, 16 * C), lambda i: (i, 0)),
            ],
        ),
        compiler_params=pltpu.CompilerParams(
            dimension_semantics=("parallel",),
            vmem_limit_bytes=vmem_limit,
        ),
    )(x_flat, mm["w_s1"], mm["b_s1"], mm["gamma"], mm["beta"],
      mm["w1b"], mm["b1b"])
    return y1, y2


# ---------------------------------- glue -------------------------------------

def _convt_to_matmul(w_pt, b_pt):
    """PyTorch ConvTranspose2d weight (Cin, Cout, 2, 2) -> (Cin, 4*Cout) bf16
    with column order (kh, kw, c_out); bias (Cout,) -> (1, 4*Cout) f32."""
    C_in, C_out = w_pt.shape[0], w_pt.shape[1]
    w = jnp.transpose(w_pt, (0, 2, 3, 1)).reshape(C_in, 4 * C_out)
    w = w.astype(jnp.bfloat16)
    b = jnp.tile(b_pt, 4).reshape(1, 4 * C_out).astype(jnp.float32)
    return w, b


def fpn_head_forward(x_nchw, params, *, single_buffer_params=True,
                     out_dtype=jnp.bfloat16):
    """FPNHead(share_weights=False) forward.

    Input  x: (B, C, H, W)  NCHW (PyTorch layout)
    Output (f1, f2): f1 (B, C, 4H, 4W), f2 (B, C, 2H, 2W)  NCHW, input dtype.
    """
    B, C, H, W = x_nchw.shape
    x_flat = jnp.transpose(x_nchw, (0, 2, 3, 1)).reshape(B * H * W, C)

    w2, b2 = _convt_to_matmul(params["w2_pt"], params["b2_pt"])
    w1a, b1a = _convt_to_matmul(params["w1a_pt"], params["b1a_pt"])
    w1b, b1b = _convt_to_matmul(params["w1b_pt"], params["b1b_pt"])
    mm = dict(
        w_s1=jnp.concatenate([w2, w1a], axis=1),        # (C, 8C) bf16
        b_s1=jnp.concatenate([b2, b1a], axis=1),        # (1, 8C) f32
        w1b=w1b, b1b=b1b,
        gamma=params["ln_gamma"].reshape(1, C).astype(jnp.float32),
        beta=params["ln_beta"].reshape(1, C).astype(jnp.float32),
    )

    y1, y2 = fpn_fused_call(x_flat, mm, out_dtype=out_dtype,
                            single_buffer_params=single_buffer_params)

    out_dt = x_nchw.dtype
    # One transpose per output fuses the 2x2 pixel scatter with NHWC->NCHW and
    # the bf16->f32 upcast (kernel writes bf16 to halve HBM writeback traffic).
    # f2 cols: (kh, kw, c)   -> (b, c, h, kh, w, kw)
    f2 = jnp.transpose(y2.reshape(B, H, W, 2, 2, C),
                       (0, 5, 1, 3, 2, 4)).reshape(B, C, 2 * H, 2 * W).astype(out_dt)
    # f1 cols: (kh1, kw1, kh2, kw2, c) -> (b, c, h, kh1, kh2, w, kw1, kw2)
    f1 = jnp.transpose(y1.reshape(B, H, W, 2, 2, 2, 2, C),
                       (0, 7, 1, 3, 5, 2, 4, 6)).reshape(B, C, 4 * H, 4 * W).astype(out_dt)
    return f1, f2


# ------------------------- reference (pure JAX, f32) --------------------------

def fpn_head_reference(x_nchw, params):
    B, C, H, W = x_nchw.shape
    x = jnp.transpose(x_nchw, (0, 2, 3, 1)).astype(jnp.float32)   # NHWC

    def convt(z, w_pt, b_pt):
        b_, h_, w_, _ = z.shape
        y = jnp.einsum("bhwi,iokl->bhkwlo", z, w_pt.astype(jnp.float32))
        return y.reshape(b_, 2 * h_, 2 * w_, -1) + b_pt

    def ln_gelu(z):
        mean = jnp.mean(z, -1, keepdims=True)
        var = jnp.mean(jnp.square(z - mean), -1, keepdims=True)
        zn = (z - mean) * jax.lax.rsqrt(var + 1e-6)
        zn = zn * params["ln_gamma"].reshape(1, 1, 1, C) + params["ln_beta"].reshape(1, 1, 1, C)
        return 0.5 * zn * (1.0 + jax.lax.erf(zn / jnp.float32(math.sqrt(2.0))))

    f2 = convt(x, params["w2_pt"], params["b2_pt"])
    f1 = convt(ln_gelu(convt(x, params["w1a_pt"], params["b1a_pt"])),
               params["w1b_pt"], params["b1b_pt"])
    to_nchw = lambda t: jnp.transpose(t, (0, 3, 1, 2))
    return to_nchw(f1), to_nchw(f2)


def init_fpn_head_params(key, embed_dim):
    """Deterministic synthetic params matching FPNHead(embed_dim, share_weights=False)."""
    C = embed_dim
    keys = jax.random.split(key, 8)
    bound = 1.0 / math.sqrt(C * 2 * 2)

    def u(k, shape):
        return jax.random.uniform(k, shape, jnp.float32, -bound, bound)

    return {
        "w1a_pt": u(keys[0], (C, C, 2, 2)),
        "b1a_pt": u(keys[1], (C,)),
        "ln_gamma": jnp.ones((1, C), jnp.float32),
        "ln_beta": jnp.zeros((1, C), jnp.float32),
        "w1b_pt": u(keys[2], (C, C, 2, 2)),
        "b1b_pt": u(keys[3], (C,)),
        "w2_pt": u(keys[4], (C, C, 2, 2)),
        "b2_pt": u(keys[5], (C,)),
    }


if __name__ == "__main__":
    B, C, H, W = 2, 16, 8, 8   # embed_dim = 16
    key = jax.random.PRNGKey(0)
    k_x, k_p = jax.random.split(key)
    x = jax.random.normal(k_x, (B, C, H, W), jnp.float32)
    params = init_fpn_head_params(k_p, C)

    def run(single_buffer):
        fn = jax.jit(functools.partial(fpn_head_forward,
                                       single_buffer_params=single_buffer))
        out = fn(x, params)
        jax.block_until_ready(out)
        return out

    try:
        f1, f2 = run(True)
    except Exception:
        # Fallback if this jax build rejects pl.Buffered(1) single-buffering.
        f1, f2 = run(False)

    assert f1.shape == (B, C, 4 * H, 4 * W), f1.shape
    assert f2.shape == (B, C, 2 * H, 2 * W), f2.shape

    r1, r2 = jax.jit(fpn_head_reference)(x, params)
    jax.block_until_ready((r1, r2))
    err1 = float(jnp.max(jnp.abs(f1 - r1)))
    err2 = float(jnp.max(jnp.abs(f2 - r2)))
    # bf16 MXU feed / bf16 kernel outputs with f32 accumulation and f32 LN/GELU
    # -> small deviation from the all-f32 reference.
    assert err1 < 3e-2 and err2 < 3e-2, (err1, err2)

    print("KERNEL_OK")
</pallas_src>

<mosaic_0001>
module attributes {stable_mosaic.version = 11 : i64} {
  func.func @fpn_fused_kernel(%arg0: i32, %arg1: memref<64x16xf32, #tpu.memory_space<vmem>>, %arg2: memref<16x128xbf16, #tpu.memory_space<vmem>>, %arg3: memref<1x128xf32, #tpu.memory_space<vmem>>, %arg4: memref<1x16xf32, #tpu.memory_space<vmem>>, %arg5: memref<1x16xf32, #tpu.memory_space<vmem>>, %arg6: memref<16x64xbf16, #tpu.memory_space<vmem>>, %arg7: memref<1x64xf32, #tpu.memory_space<vmem>>, %arg8: memref<64x64xbf16, #tpu.memory_space<vmem>>, %arg9: memref<64x256xbf16, #tpu.memory_space<vmem>>) attributes {dimension_semantics = [#tpu.dimension_semantics<parallel>], iteration_bounds = array<i64: 2>, scalar_prefetch = 0 : i64, scratch_operands = 0 : i64, tpu.core_type = #tpu.core_type<tc>, window_params = [{transform_indices = @transform_0, window_bounds = array<i64: 64, 16>}, {pipeline_mode = #tpu.pipeline_mode<synchronous>, transform_indices = @transform_1, window_bounds = array<i64: 16, 128>}, {pipeline_mode = #tpu.pipeline_mode<synchronous>, transform_indices = @transform_2, window_bounds = array<i64: 1, 128>}, {pipeline_mode = #tpu.pipeline_mode<synchronous>, transform_indices = @transform_3, window_bounds = array<i64: 1, 16>}, {pipeline_mode = #tpu.pipeline_mode<synchronous>, transform_indices = @transform_4, window_bounds = array<i64: 1, 16>}, {pipeline_mode = #tpu.pipeline_mode<synchronous>, transform_indices = @transform_5, window_bounds = array<i64: 16, 64>}, {pipeline_mode = #tpu.pipeline_mode<synchronous>, transform_indices = @transform_6, window_bounds = array<i64: 1, 64>}, {transform_indices = @transform_7, window_bounds = array<i64: 64, 64>}, {transform_indices = @transform_8, window_bounds = array<i64: 64, 256>}]} {
    %c0 = arith.constant 0 : index
    %c0_0 = arith.constant 0 : index
    %0 = vector.load %arg1[%c0, %c0_0] : memref<64x16xf32, #tpu.memory_space<vmem>>, vector<64x16xf32>
    %1 = arith.truncf %0 : vector<64x16xf32> to vector<64x16xbf16>
    %c0_1 = arith.constant 0 : index
    %c0_2 = arith.constant 0 : index
    %2 = vector.load %arg2[%c0_1, %c0_2] : memref<16x128xbf16, #tpu.memory_space<vmem>>, vector<16x128xbf16>
    %cst = arith.constant dense<0.000000e+00> : vector<64x128xf32>
    %3 = tpu.matmul %1, %2, %cst {dimension_numbers = #tpu.dot_dimension_numbers<[1], [0], [0], [1], [0, 0, 1, 1], [], []>} : vector<64x16xbf16>, vector<16x128xbf16>, vector<64x128xf32> -> vector<64x128xf32>
    %c0_3 = arith.constant 0 : index
    %c0_4 = arith.constant 0 : index
    %4 = vector.load %arg3[%c0_3, %c0_4] : memref<1x128xf32, #tpu.memory_space<vmem>>, vector<1x128xf32>
    %5 = vector.broadcast %4 : vector<1x128xf32> to vector<64x128xf32>
    %6 = arith.addf %3, %5 : vector<64x128xf32>
    %7 = vector.extract_strided_slice %6 {offsets = [0, 0], sizes = [64, 64], strides = [1, 1]} : vector<64x128xf32> to vector<64x64xf32>
    %8 = arith.truncf %7 : vector<64x64xf32> to vector<64x64xbf16>
    %c0_5 = arith.constant 0 : index
    %c0_6 = arith.constant 0 : index
    %9 = vector.load %arg8[%c0_5, %c0_6] : memref<64x64xbf16, #tpu.memory_space<vmem>>, vector<64x64xbf16>
    tpu.vector_store %arg8[%c0_5, %c0_6], %8 {strides = array<i32>} : memref<64x64xbf16, #tpu.memory_space<vmem>>, vector<64x64xbf16>,
    %10 = vector.extract_strided_slice %6 {offsets = [0, 64], sizes = [64, 64], strides = [1, 1]} : vector<64x128xf32> to vector<64x64xf32>
    %c0_7 = arith.constant 0 : index
    %c0_8 = arith.constant 0 : index
    %11 = vector.load %arg4[%c0_7, %c0_8] : memref<1x16xf32, #tpu.memory_space<vmem>>, vector<1x16xf32>
    %12 = vector.shape_cast %11 : vector<1x16xf32> to vector<1x16xf32>
    %13 = vector.broadcast %12 : vector<1x16xf32> to vector<64x16xf32>
    %c0_9 = arith.constant 0 : index
    %c0_10 = arith.constant 0 : index
    %14 = vector.load %arg5[%c0_9, %c0_10] : memref<1x16xf32, #tpu.memory_space<vmem>>, vector<1x16xf32>
    %15 = vector.shape_cast %14 : vector<1x16xf32> to vector<1x16xf32>
    %16 = vector.broadcast %15 : vector<1x16xf32> to vector<64x16xf32>
    %17 = vector.extract_strided_slice %10 {offsets = [0, 0], sizes = [64, 16], strides = [1, 1]} : vector<64x64xf32> to vector<64x16xf32>
    %cst_11 = arith.constant dense<0.000000e+00> : vector<64xf32>
    %18 = vector.multi_reduction <add>, %17, %cst_11 [1] : vector<64x16xf32> to vector<64xf32>
    %19 = vector.shape_cast %18 : vector<64xf32> to vector<64x1xf32>
    %cst_12 = arith.constant 6.250000e-02 : f32
    %20 = vector.broadcast %cst_12 : f32 to vector<64x1xf32>
    %21 = arith.mulf %19, %20 : vector<64x1xf32>
    %22 = arith.mulf %17, %17 : vector<64x16xf32>
    %cst_13 = arith.constant dense<0.000000e+00> : vector<64xf32>
    %23 = vector.multi_reduction <add>, %22, %cst_13 [1] : vector<64x16xf32> to vector<64xf32>
    %24 = vector.shape_cast %23 : vector<64xf32> to vector<64x1xf32>
    %cst_14 = arith.constant 6.250000e-02 : f32
    %25 = vector.broadcast %cst_14 : f32 to vector<64x1xf32>
    %26 = arith.mulf %24, %25 : vector<64x1xf32>
    %27 = arith.mulf %21, %21 : vector<64x1xf32>
    %28 = arith.subf %26, %27 : vector<64x1xf32>
    %29 = vector.broadcast %21 : vector<64x1xf32> to vector<64x16xf32>
    %30 = arith.subf %17, %29 : vector<64x16xf32>
    %cst_15 = arith.constant 9.99999997E-7 : f32
    %31 = vector.broadcast %cst_15 : f32 to vector<64x1xf32>
    %32 = arith.addf %28, %31 : vector<64x1xf32>
    %33 = math.rsqrt %32 : vector<64x1xf32>
    %34 = vector.broadcast %33 : vector<64x1xf32> to vector<64x16xf32>
    %35 = arith.mulf %30, %34 : vector<64x16xf32>
    %36 = arith.mulf %35, %13 : vector<64x16xf32>
    %37 = arith.addf %36, %16 : vector<64x16xf32>
    %cst_16 = arith.constant 5.000000e-01 : f32
    %38 = vector.broadcast %cst_16 : f32 to vector<64x16xf32>
    %39 = arith.mulf %38, %37 : vector<64x16xf32>
    %cst_17 = arith.constant 0.707106769 : f32
    %40 = vector.broadcast %cst_17 : f32 to vector<64x16xf32>
    %41 = arith.mulf %37, %40 : vector<64x16xf32>
    %42 = math.erf %41 : vector<64x16xf32>
    %cst_18 = arith.constant 1.000000e+00 : f32
    %43 = vector.broadcast %cst_18 : f32 to vector<64x16xf32>
    %44 = arith.addf %43, %42 : vector<64x16xf32>
    %45 = arith.mulf %39, %44 : vector<64x16xf32>
    %46 = arith.truncf %45 : vector<64x16xf32> to vector<64x16xbf16>
    %47 = vector.extract_strided_slice %10 {offsets = [0, 16], sizes = [64, 16], strides = [1, 1]} : vector<64x64xf32> to vector<64x16xf32>
    %cst_19 = arith.constant dense<0.000000e+00> : vector<64xf32>
    %48 = vector.multi_reduction <add>, %47, %cst_19 [1] : vector<64x16xf32> to vector<64xf32>
    %49 = vector.shape_cast %48 : vector<64xf32> to vector<64x1xf32>
    %cst_20 = arith.constant 6.250000e-02 : f32
    %50 = vector.broadcast %cst_20 : f32 to vector<64x1xf32>
    %51 = arith.mulf %49, %50 : vector<64x1xf32>
    %52 = arith.mulf %47, %47 : vector<64x16xf32>
    %cst_21 = arith.constant dense<0.000000e+00> : vector<64xf32>
    %53 = vector.multi_reduction <add>, %52, %cst_21 [1] : vector<64x16xf32> to vector<64xf32>
    %54 = vector.shape_cast %53 : vector<64xf32> to vector<64x1xf32>
    %cst_22 = arith.constant 6.250000e-02 : f32
    %55 = vector.broadcast %cst_22 : f32 to vector<64x1xf32>
    %56 = arith.mulf %54, %55 : vector<64x1xf32>
    %57 = arith.mulf %51, %51 : vector<64x1xf32>
    %58 = arith.subf %56, %57 : vector<64x1xf32>
    %59 = vector.broadcast %51 : vector<64x1xf32> to vector<64x16xf32>
    %60 = arith.subf %47, %59 : vector<64x16xf32>
    %cst_23 = arith.constant 9.99999997E-7 : f32
    %61 = vector.broadcast %cst_23 : f32 to vector<64x1xf32>
    %62 = arith.addf %58, %61 : vector<64x1xf32>
    %63 = math.rsqrt %62 : vector<64x1xf32>
    %64 = vector.broadcast %63 : vector<64x1xf32> to vector<64x16xf32>
    %65 = arith.mulf %60, %64 : vector<64x16xf32>
    %66 = arith.mulf %65, %13 : vector<64x16xf32>
    %67 = arith.addf %66, %16 : vector<64x16xf32>
    %cst_24 = arith.constant 5.000000e-01 : f32
    %68 = vector.broadcast %cst_24 : f32 to vector<64x16xf32>
    %69 = arith.mulf %68, %67 : vector<64x16xf32>
    %cst_25 = arith.constant 0.707106769 : f32
    %70 = vector.broadcast %cst_25 : f32 to vector<64x16xf32>
    %71 = arith.mulf %67, %70 : vector<64x16xf32>
    %72 = math.erf %71 : vector<64x16xf32>
    %cst_26 = arith.constant 1.000000e+00 : f32
    %73 = vector.broadcast %cst_26 : f32 to vector<64x16xf32>
    %74 = arith.addf %73, %72 : vector<64x16xf32>
    %75 = arith.mulf %69, %74 : vector<64x16xf32>
    %76 = arith.truncf %75 : vector<64x16xf32> to vector<64x16xbf16>
    %77 = vector.extract_strided_slice %10 {offsets = [0, 32], sizes = [64, 16], strides = [1, 1]} : vector<64x64xf32> to vector<64x16xf32>
    %cst_27 = arith.constant dense<0.000000e+00> : vector<64xf32>
    %78 = vector.multi_reduction <add>, %77, %cst_27 [1] : vector<64x16xf32> to vector<64xf32>
    %79 = vector.shape_cast %78 : vector<64xf32> to vector<64x1xf32>
    %cst_28 = arith.constant 6.250000e-02 : f32
    %80 = vector.broadcast %cst_28 : f32 to vector<64x1xf32>
    %81 = arith.mulf %79, %80 : vector<64x1xf32>
    %82 = arith.mulf %77, %77 : vector<64x16xf32>
    %cst_29 = arith.constant dense<0.000000e+00> : vector<64xf32>
    %83 = vector.multi_reduction <add>, %82, %cst_29 [1] : vector<64x16xf32> to vector<64xf32>
    %84 = vector.shape_cast %83 : vector<64xf32> to vector<64x1xf32>
    %cst_30 = arith.constant 6.250000e-02 : f32
    %85 = vector.broadcast %cst_30 : f32 to vector<64x1xf32>
    %86 = arith.mulf %84, %85 : vector<64x1xf32>
    %87 = arith.mulf %81, %81 : vector<64x1xf32>
    %88 = arith.subf %86, %87 : vector<64x1xf32>
    %89 = vector.broadcast %81 : vector<64x1xf32> to vector<64x16xf32>
    %90 = arith.subf %77, %89 : vector<64x16xf32>
    %cst_31 = arith.constant 9.99999997E-7 : f32
    %91 = vector.broadcast %cst_31 : f32 to vector<64x1xf32>
    %92 = arith.addf %88, %91 : vector<64x1xf32>
    %93 = math.rsqrt %92 : vector<64x1xf32>
    %94 = vector.broadcast %93 : vector<64x1xf32> to vector<64x16xf32>
    %95 = arith.mulf %90, %94 : vector<64x16xf32>
    %96 = arith.mulf %95, %13 : vector<64x16xf32>
    %97 = arith.addf %96, %16 : vector<64x16xf32>
    %cst_32 = arith.constant 5.000000e-01 : f32
    %98 = vector.broadcast %cst_32 : f32 to vector<64x16xf32>
    %99 = arith.mulf %98, %97 : vector<64x16xf32>
    %cst_33 = arith.constant 0.707106769 : f32
    %100 = vector.broadcast %cst_33 : f32 to vector<64x16xf32>
    %101 = arith.mulf %97, %100 : vector<64x16xf32>
    %102 = math.erf %101 : vector<64x16xf32>
    %cst_34 = arith.constant 1.000000e+00 : f32
    %103 = vector.broadcast %cst_34 : f32 to vector<64x16xf32>
    %104 = arith.addf %103, %102 : vector<64x16xf32>
    %105 = arith.mulf %99, %104 : vector<64x16xf32>
    %106 = arith.truncf %105 : vector<64x16xf32> to vector<64x16xbf16>
    %107 = vector.extract_strided_slice %10 {offsets = [0, 48], sizes = [64, 16], strides = [1, 1]} : vector<64x64xf32> to vector<64x16xf32>
    %cst_35 = arith.constant dense<0.000000e+00> : vector<64xf32>
    %108 = vector.multi_reduction <add>, %107, %cst_35 [1] : vector<64x16xf32> to vector<64xf32>
    %109 = vector.shape_cast %108 : vector<64xf32> to vector<64x1xf32>
    %cst_36 = arith.constant 6.250000e-02 : f32
    %110 = vector.broadcast %cst_36 : f32 to vector<64x1xf32>
    %111 = arith.mulf %109, %110 : vector<64x1xf32>
    %112 = arith.mulf %107, %107 : vector<64x16xf32>
    %cst_37 = arith.constant dense<0.000000e+00> : vector<64xf32>
    %113 = vector.multi_reduction <add>, %112, %cst_37 [1] : vector<64x16xf32> to vector<64xf32>
    %114 = vector.shape_cast %113 : vector<64xf32> to vector<64x1xf32>
    %cst_38 = arith.constant 6.250000e-02 : f32
    %115 = vector.broadcast %cst_38 : f32 to vector<64x1xf32>
    %116 = arith.mulf %114, %115 : vector<64x1xf32>
    %117 = arith.mulf %111, %111 : vector<64x1xf32>
    %118 = arith.subf %116, %117 : vector<64x1xf32>
    %119 = vector.broadcast %111 : vector<64x1xf32> to vector<64x16xf32>
    %120 = arith.subf %107, %119 : vector<64x16xf32>
    %cst_39 = arith.constant 9.99999997E-7 : f32
    %121 = vector.broadcast %cst_39 : f32 to vector<64x1xf32>
    %122 = arith.addf %118, %121 : vector<64x1xf32>
    %123 = math.rsqrt %122 : vector<64x1xf32>
    %124 = vector.broadcast %123 : vector<64x1xf32> to vector<64x16xf32>
    %125 = arith.mulf %120, %124 : vector<64x16xf32>
    %126 = arith.mulf %125, %13 : vector<64x16xf32>
    %127 = arith.addf %126, %16 : vector<64x16xf32>
    %cst_40 = arith.constant 5.000000e-01 : f32
    %128 = vector.broadcast %cst_40 : f32 to vector<64x16xf32>
    %129 = arith.mulf %128, %127 : vector<64x16xf32>
    %cst_41 = arith.constant 0.707106769 : f32
    %130 = vector.broadcast %cst_41 : f32 to vector<64x16xf32>
    %131 = arith.mulf %127, %130 : vector<64x16xf32>
    %132 = math.erf %131 : vector<64x16xf32>
    %cst_42 = arith.constant 1.000000e+00 : f32
    %133 = vector.broadcast %cst_42 : f32 to vector<64x16xf32>
    %134 = arith.addf %133, %132 : vector<64x16xf32>
    %135 = arith.mulf %129, %134 : vector<64x16xf32>
    %136 = arith.truncf %135 : vector<64x16xf32> to vector<64x16xbf16>
    %137 = tpu.concatenate %46, %76, %106, %136 in 0 : vector<64x16xbf16>, vector<64x16xbf16>, vector<64x16xbf16>, vector<64x16xbf16> -> vector<256x16xbf16>
    %c0_43 = arith.constant 0 : index
    %c0_44 = arith.constant 0 : index
    %138 = vector.load %arg6[%c0_43, %c0_44] : memref<16x64xbf16, #tpu.memory_space<vmem>>, vector<16x64xbf16>
    %cst_45 = arith.constant dense<0.000000e+00> : vector<256x64xf32>
    %139 = tpu.matmul %137, %138, %cst_45 {dimension_numbers = #tpu.dot_dimension_numbers<[1], [0], [0], [1], [0, 0, 1, 1], [], []>} : vector<256x16xbf16>, vector<16x64xbf16>, vector<256x64xf32> -> vector<256x64xf32>
    %c0_46 = arith.constant 0 : index
    %c0_47 = arith.constant 0 : index
    %140 = vector.load %arg7[%c0_46, %c0_47] : memref<1x64xf32, #tpu.memory_space<vmem>>, vector<1x64xf32>
    %141 = vector.broadcast %140 : vector<1x64xf32> to vector<256x64xf32>
    %142 = arith.addf %139, %141 : vector<256x64xf32>
    %143 = vector.extract_strided_slice %142 {offsets = [0, 0], sizes = [64, 64], strides = [1, 1]} : vector<256x64xf32> to vector<64x64xf32>
    %144 = arith.truncf %143 : vector<64x64xf32> to vector<64x64xbf16>
    %c0_48 = arith.constant 0 : index
    %c0_49 = arith.constant 0 : index
    %145 = vector.load %arg9[%c0_48, %c0_49] : memref<64x256xbf16, #tpu.memory_space<vmem>>, vector<64x64xbf16>
    tpu.vector_store %arg9[%c0_48, %c0_49], %144 {strides = array<i32>} : memref<64x256xbf16, #tpu.memory_space<vmem>>, vector<64x64xbf16>,
    %146 = vector.extract_strided_slice %142 {offsets = [64, 0], sizes = [64, 64], strides = [1, 1]} : vector<256x64xf32> to vector<64x64xf32>
    %147 = arith.truncf %146 : vector<64x64xf32> to vector<64x64xbf16>
    %c0_50 = arith.constant 0 : index
    %c64 = arith.constant 64 : index
    %148 = vector.load %arg9[%c0_50, %c64] : memref<64x256xbf16, #tpu.memory_space<vmem>>, vector<64x64xbf16>
    tpu.vector_store %arg9[%c0_50, %c64], %147 {strides = array<i32>} : memref<64x256xbf16, #tpu.memory_space<vmem>>, vector<64x64xbf16>,
    %149 = vector.extract_strided_slice %142 {offsets = [128, 0], sizes = [64, 64], strides = [1, 1]} : vector<256x64xf32> to vector<64x64xf32>
    %150 = arith.truncf %149 : vector<64x64xf32> to vector<64x64xbf16>
    %c0_51 = arith.constant 0 : index
    %c128 = arith.constant 128 : index
    %151 = vector.load %arg9[%c0_51, %c128] : memref<64x256xbf16, #tpu.memory_space<vmem>>, vector<64x64xbf16>
    tpu.vector_store %arg9[%c0_51, %c128], %150 {strides = array<i32>} : memref<64x256xbf16, #tpu.memory_space<vmem>>, vector<64x64xbf16>,
    %152 = vector.extract_strided_slice %142 {offsets = [192, 0], sizes = [64, 64], strides = [1, 1]} : vector<256x64xf32> to vector<64x64xf32>
    %153 = arith.truncf %152 : vector<64x64xf32> to vector<64x64xbf16>
    %c0_52 = arith.constant 0 : index
    %c192 = arith.constant 192 : index
    %154 = vector.load %arg9[%c0_52, %c192] : memref<64x256xbf16, #tpu.memory_space<vmem>>, vector<64x64xbf16>
    tpu.vector_store %arg9[%c0_52, %c192], %153 {strides = array<i32>} : memref<64x256xbf16, #tpu.memory_space<vmem>>, vector<64x64xbf16>,
    return
  }
  func.func @transform_0(%arg0: i32) -> (i32, i32) {
    %c0_i32 = arith.constant 0 : i32
    %c0_i32_0 = arith.constant 0 : i32
    return %arg0, %c0_i32 : i32, i32
  }
  func.func @transform_1(%arg0: i32) -> (i32, i32) {
    %c0_i32 = arith.constant 0 : i32
    %c0_i32_0 = arith.constant 0 : i32
    %c0_i32_1 = arith.constant 0 : i32
    return %c0_i32, %c0_i32_0 : i32, i32
  }
  func.func @transform_2(%arg0: i32) -> (i32, i32) {
    %c0_i32 = arith.constant 0 : i32
    %c0_i32_0 = arith.constant 0 : i32
    %c0_i32_1 = arith.constant 0 : i32
    return %c0_i32, %c0_i32_0 : i32, i32
  }
  func.func @transform_3(%arg0: i32) -> (i32, i32) {
    %c0_i32 = arith.constant 0 : i32
    %c0_i32_0 = arith.constant 0 : i32
    %c0_i32_1 = arith.constant 0 : i32
    return %c0_i32, %c0_i32_0 : i32, i32
  }
  func.func @transform_4(%arg0: i32) -> (i32, i32) {
    %c0_i32 = arith.constant 0 : i32
    %c0_i32_0 = arith.constant 0 : i32
    %c0_i32_1 = arith.constant 0 : i32
    return %c0_i32, %c0_i32_0 : i32, i32
  }
  func.func @transform_5(%arg0: i32) -> (i32, i32) {
    %c0_i32 = arith.constant 0 : i32
    %c0_i32_0 = arith.constant 0 : i32
    %c0_i32_1 = arith.constant 0 : i32
    return %c0_i32, %c0_i32_0 : i32, i32
  }
  func.func @transform_6(%arg0: i32) -> (i32, i32) {
    %c0_i32 = arith.constant 0 : i32
    %c0_i32_0 = arith.constant 0 : i32
    %c0_i32_1 = arith.constant 0 : i32
    return %c0_i32, %c0_i32_0 : i32, i32
  }
  func.func @transform_7(%arg0: i32) -> (i32, i32) {
    %c0_i32 = arith.constant 0 : i32
    %c0_i32_0 = arith.constant 0 : i32
    return %arg0, %c0_i32 : i32, i32
  }
  func.func @transform_8(%arg0: i32) -> (i32, i32) {
    %c0_i32 = arith.constant 0 : i32
    %c0_i32_0 = arith.constant 0 : i32
    return %arg0, %c0_i32 : i32, i32
  }
}

module attributes {stable_mosaic.version = 11 : i64} {
  func.func @fpn_fused_kernel(%arg0: i32, %arg1: memref<64x16xf32, #tpu.memory_space<vmem>>, %arg2: memref<16x128xbf16, #tpu.memory_space<vmem>>, %arg3: memref<1x128xf32, #tpu.memory_space<vmem>>, %arg4: memref<1x16xf32, #tpu.memory_space<vmem>>, %arg5: memref<1x16xf32, #tpu.memory_space<vmem>>, %arg6: memref<16x64xbf16, #tpu.memory_space<vmem>>, %arg7: memref<1x64xf32, #tpu.memory_space<vmem>>, %arg8: memref<64x64xbf16, #tpu.memory_space<vmem>>, %arg9: memref<64x256xbf16, #tpu.memory_space<vmem>>) attributes {dimension_semantics = [#tpu.dimension_semantics<parallel>], iteration_bounds = array<i64: 2>, scalar_prefetch = 0 : i64, scratch_operands = 0 : i64, tpu.core_type = #tpu.core_type<tc>, window_params = [{transform_indices = @transform_0, window_bounds = array<i64: 64, 16>}, {pipeline_mode = #tpu.pipeline_mode<synchronous>, transform_indices = @transform_1, window_bounds = array<i64: 16, 128>}, {pipeline_mode = #tpu.pipeline_mode<synchronous>, transform_indices = @transform_2, window_bounds = array<i64: 1, 128>}, {pipeline_mode = #tpu.pipeline_mode<synchronous>, transform_indices = @transform_3, window_bounds = array<i64: 1, 16>}, {pipeline_mode = #tpu.pipeline_mode<synchronous>, transform_indices = @transform_4, window_bounds = array<i64: 1, 16>}, {pipeline_mode = #tpu.pipeline_mode<synchronous>, transform_indices = @transform_5, window_bounds = array<i64: 16, 64>}, {pipeline_mode = #tpu.pipeline_mode<synchronous>, transform_indices = @transform_6, window_bounds = array<i64: 1, 64>}, {transform_indices = @transform_7, window_bounds = array<i64: 64, 64>}, {transform_indices = @transform_8, window_bounds = array<i64: 64, 256>}]} {
    %c0 = arith.constant 0 : index
    %c0_0 = arith.constant 0 : index
    %0 = vector.load %arg1[%c0, %c0_0] : memref<64x16xf32, #tpu.memory_space<vmem>>, vector<64x16xf32>
    %1 = arith.truncf %0 : vector<64x16xf32> to vector<64x16xbf16>
    %c0_1 = arith.constant 0 : index
    %c0_2 = arith.constant 0 : index
    %2 = vector.load %arg2[%c0_1, %c0_2] : memref<16x128xbf16, #tpu.memory_space<vmem>>, vector<16x128xbf16>
    %cst = arith.constant dense<0.000000e+00> : vector<64x128xf32>
    %3 = tpu.matmul %1, %2, %cst {dimension_numbers = #tpu.dot_dimension_numbers<[1], [0], [0], [1], [0, 0, 1, 1], [], []>} : vector<64x16xbf16>, vector<16x128xbf16>, vector<64x128xf32> -> vector<64x128xf32>
    %c0_3 = arith.constant 0 : index
    %c0_4 = arith.constant 0 : index
    %4 = vector.load %arg3[%c0_3, %c0_4] : memref<1x128xf32, #tpu.memory_space<vmem>>, vector<1x128xf32>
    %5 = vector.broadcast %4 : vector<1x128xf32> to vector<64x128xf32>
    %6 = arith.addf %3, %5 : vector<64x128xf32>
    %7 = vector.extract_strided_slice %6 {offsets = [0, 0], sizes = [64, 64], strides = [1, 1]} : vector<64x128xf32> to vector<64x64xf32>
    %8 = arith.truncf %7 : vector<64x64xf32> to vector<64x64xbf16>
    %c0_5 = arith.constant 0 : index
    %c0_6 = arith.constant 0 : index
    %9 = vector.load %arg8[%c0_5, %c0_6] : memref<64x64xbf16, #tpu.memory_space<vmem>>, vector<64x64xbf16>
    tpu.vector_store %arg8[%c0_5, %c0_6], %8 {strides = array<i32>} : memref<64x64xbf16, #tpu.memory_space<vmem>>, vector<64x64xbf16>,
    %10 = vector.extract_strided_slice %6 {offsets = [0, 64], sizes = [64, 64], strides = [1, 1]} : vector<64x128xf32> to vector<64x64xf32>
    %c0_7 = arith.constant 0 : index
    %c0_8 = arith.constant 0 : index
    %11 = vector.load %arg4[%c0_7, %c0_8] : memref<1x16xf32, #tpu.memory_space<vmem>>, vector<1x16xf32>
    %12 = vector.shape_cast %11 : vector<1x16xf32> to vector<1x16xf32>
    %13 = vector.broadcast %12 : vector<1x16xf32> to vector<64x16xf32>
    %c0_9 = arith.constant 0 : index
    %c0_10 = arith.constant 0 : index
    %14 = vector.load %arg5[%c0_9, %c0_10] : memref<1x16xf32, #tpu.memory_space<vmem>>, vector<1x16xf32>
    %15 = vector.shape_cast %14 : vector<1x16xf32> to vector<1x16xf32>
    %16 = vector.broadcast %15 : vector<1x16xf32> to vector<64x16xf32>
    %17 = vector.extract_strided_slice %10 {offsets = [0, 0], sizes = [64, 16], strides = [1, 1]} : vector<64x64xf32> to vector<64x16xf32>
    %cst_11 = arith.constant dense<0.000000e+00> : vector<64xf32>
    %18 = vector.multi_reduction <add>, %17, %cst_11 [1] : vector<64x16xf32> to vector<64xf32>
    %19 = vector.shape_cast %18 : vector<64xf32> to vector<64x1xf32>
    %cst_12 = arith.constant 6.250000e-02 : f32
    %20 = vector.broadcast %cst_12 : f32 to vector<64x1xf32>
    %21 = arith.mulf %19, %20 : vector<64x1xf32>
    %22 = arith.mulf %17, %17 : vector<64x16xf32>
    %cst_13 = arith.constant dense<0.000000e+00> : vector<64xf32>
    %23 = vector.multi_reduction <add>, %22, %cst_13 [1] : vector<64x16xf32> to vector<64xf32>
    %24 = vector.shape_cast %23 : vector<64xf32> to vector<64x1xf32>
    %cst_14 = arith.constant 6.250000e-02 : f32
    %25 = vector.broadcast %cst_14 : f32 to vector<64x1xf32>
    %26 = arith.mulf %24, %25 : vector<64x1xf32>
    %27 = arith.mulf %21, %21 : vector<64x1xf32>
    %28 = arith.subf %26, %27 : vector<64x1xf32>
    %29 = vector.broadcast %21 : vector<64x1xf32> to vector<64x16xf32>
    %30 = arith.subf %17, %29 : vector<64x16xf32>
    %cst_15 = arith.constant 9.99999997E-7 : f32
    %31 = vector.broadcast %cst_15 : f32 to vector<64x1xf32>
    %32 = arith.addf %28, %31 : vector<64x1xf32>
    %33 = math.rsqrt %32 : vector<64x1xf32>
    %34 = vector.broadcast %33 : vector<64x1xf32> to vector<64x16xf32>
    %35 = arith.mulf %30, %34 : vector<64x16xf32>
    %36 = arith.mulf %35, %13 : vector<64x16xf32>
    %37 = arith.addf %36, %16 : vector<64x16xf32>
    %cst_16 = arith.constant 5.000000e-01 : f32
    %38 = vector.broadcast %cst_16 : f32 to vector<64x16xf32>
    %39 = arith.mulf %38, %37 : vector<64x16xf32>
    %cst_17 = arith.constant 0.707106769 : f32
    %40 = vector.broadcast %cst_17 : f32 to vector<64x16xf32>
    %41 = arith.mulf %37, %40 : vector<64x16xf32>
    %42 = math.erf %41 : vector<64x16xf32>
    %cst_18 = arith.constant 1.000000e+00 : f32
    %43 = vector.broadcast %cst_18 : f32 to vector<64x16xf32>
    %44 = arith.addf %43, %42 : vector<64x16xf32>
    %45 = arith.mulf %39, %44 : vector<64x16xf32>
    %46 = arith.truncf %45 : vector<64x16xf32> to vector<64x16xbf16>
    %47 = vector.extract_strided_slice %10 {offsets = [0, 16], sizes = [64, 16], strides = [1, 1]} : vector<64x64xf32> to vector<64x16xf32>
    %cst_19 = arith.constant dense<0.000000e+00> : vector<64xf32>
    %48 = vector.multi_reduction <add>, %47, %cst_19 [1] : vector<64x16xf32> to vector<64xf32>
    %49 = vector.shape_cast %48 : vector<64xf32> to vector<64x1xf32>
    %cst_20 = arith.constant 6.250000e-02 : f32
    %50 = vector.broadcast %cst_20 : f32 to vector<64x1xf32>
    %51 = arith.mulf %49, %50 : vector<64x1xf32>
    %52 = arith.mulf %47, %47 : vector<64x16xf32>
    %cst_21 = arith.constant dense<0.000000e+00> : vector<64xf32>
    %53 = vector.multi_reduction <add>, %52, %cst_21 [1] : vector<64x16xf32> to vector<64xf32>
    %54 = vector.shape_cast %53 : vector<64xf32> to vector<64x1xf32>
    %cst_22 = arith.constant 6.250000e-02 : f32
    %55 = vector.broadcast %cst_22 : f32 to vector<64x1xf32>
    %56 = arith.mulf %54, %55 : vector<64x1xf32>
    %57 = arith.mulf %51, %51 : vector<64x1xf32>
    %58 = arith.subf %56, %57 : vector<64x1xf32>
    %59 = vector.broadcast %51 : vector<64x1xf32> to vector<64x16xf32>
    %60 = arith.subf %47, %59 : vector<64x16xf32>
    %cst_23 = arith.constant 9.99999997E-7 : f32
    %61 = vector.broadcast %cst_23 : f32 to vector<64x1xf32>
    %62 = arith.addf %58, %61 : vector<64x1xf32>
    %63 = math.rsqrt %62 : vector<64x1xf32>
    %64 = vector.broadcast %63 : vector<64x1xf32> to vector<64x16xf32>
    %65 = arith.mulf %60, %64 : vector<64x16xf32>
    %66 = arith.mulf %65, %13 : vector<64x16xf32>
    %67 = arith.addf %66, %16 : vector<64x16xf32>
    %cst_24 = arith.constant 5.000000e-01 : f32
    %68 = vector.broadcast %cst_24 : f32 to vector<64x16xf32>
    %69 = arith.mulf %68, %67 : vector<64x16xf32>
    %cst_25 = arith.constant 0.707106769 : f32
    %70 = vector.broadcast %cst_25 : f32 to vector<64x16xf32>
    %71 = arith.mulf %67, %70 : vector<64x16xf32>
    %72 = math.erf %71 : vector<64x16xf32>
    %cst_26 = arith.constant 1.000000e+00 : f32
    %73 = vector.broadcast %cst_26 : f32 to vector<64x16xf32>
    %74 = arith.addf %73, %72 : vector<64x16xf32>
    %75 = arith.mulf %69, %74 : vector<64x16xf32>
    %76 = arith.truncf %75 : vector<64x16xf32> to vector<64x16xbf16>
    %77 = vector.extract_strided_slice %10 {offsets = [0, 32], sizes = [64, 16], strides = [1, 1]} : vector<64x64xf32> to vector<64x16xf32>
    %cst_27 = arith.constant dense<0.000000e+00> : vector<64xf32>
    %78 = vector.multi_reduction <add>, %77, %cst_27 [1] : vector<64x16xf32> to vector<64xf32>
    %79 = vector.shape_cast %78 : vector<64xf32> to vector<64x1xf32>
    %cst_28 = arith.constant 6.250000e-02 : f32
    %80 = vector.broadcast %cst_28 : f32 to vector<64x1xf32>
    %81 = arith.mulf %79, %80 : vector<64x1xf32>
    %82 = arith.mulf %77, %77 : vector<64x16xf32>
    %cst_29 = arith.constant dense<0.000000e+00> : vector<64xf32>
    %83 = vector.multi_reduction <add>, %82, %cst_29 [1] : vector<64x16xf32> to vector<64xf32>
    %84 = vector.shape_cast %83 : vector<64xf32> to vector<64x1xf32>
    %cst_30 = arith.constant 6.250000e-02 : f32
    %85 = vector.broadcast %cst_30 : f32 to vector<64x1xf32>
    %86 = arith.mulf %84, %85 : vector<64x1xf32>
    %87 = arith.mulf %81, %81 : vector<64x1xf32>
    %88 = arith.subf %86, %87 : vector<64x1xf32>
    %89 = vector.broadcast %81 : vector<64x1xf32> to vector<64x16xf32>
    %90 = arith.subf %77, %89 : vector<64x16xf32>
    %cst_31 = arith.constant 9.99999997E-7 : f32
    %91 = vector.broadcast %cst_31 : f32 to vector<64x1xf32>
    %92 = arith.addf %88, %91 : vector<64x1xf32>
    %93 = math.rsqrt %92 : vector<64x1xf32>
    %94 = vector.broadcast %93 : vector<64x1xf32> to vector<64x16xf32>
    %95 = arith.mulf %90, %94 : vector<64x16xf32>
    %96 = arith.mulf %95, %13 : vector<64x16xf32>
    %97 = arith.addf %96, %16 : vector<64x16xf32>
    %cst_32 = arith.constant 5.000000e-01 : f32
    %98 = vector.broadcast %cst_32 : f32 to vector<64x16xf32>
    %99 = arith.mulf %98, %97 : vector<64x16xf32>
    %cst_33 = arith.constant 0.707106769 : f32
    %100 = vector.broadcast %cst_33 : f32 to vector<64x16xf32>
    %101 = arith.mulf %97, %100 : vector<64x16xf32>
    %102 = math.erf %101 : vector<64x16xf32>
    %cst_34 = arith.constant 1.000000e+00 : f32
    %103 = vector.broadcast %cst_34 : f32 to vector<64x16xf32>
    %104 = arith.addf %103, %102 : vector<64x16xf32>
    %105 = arith.mulf %99, %104 : vector<64x16xf32>
    %106 = arith.truncf %105 : vector<64x16xf32> to vector<64x16xbf16>
    %107 = vector.extract_strided_slice %10 {offsets = [0, 48], sizes = [64, 16], strides = [1, 1]} : vector<64x64xf32> to vector<64x16xf32>
    %cst_35 = arith.constant dense<0.000000e+00> : vector<64xf32>
    %108 = vector.multi_reduction <add>, %107, %cst_35 [1] : vector<64x16xf32> to vector<64xf32>
    %109 = vector.shape_cast %108 : vector<64xf32> to vector<64x1xf32>
    %cst_36 = arith.constant 6.250000e-02 : f32
    %110 = vector.broadcast %cst_36 : f32 to vector<64x1xf32>
    %111 = arith.mulf %109, %110 : vector<64x1xf32>
    %112 = arith.mulf %107, %107 : vector<64x16xf32>
    %cst_37 = arith.constant dense<0.000000e+00> : vector<64xf32>
    %113 = vector.multi_reduction <add>, %112, %cst_37 [1] : vector<64x16xf32> to vector<64xf32>
    %114 = vector.shape_cast %113 : vector<64xf32> to vector<64x1xf32>
    %cst_38 = arith.constant 6.250000e-02 : f32
    %115 = vector.broadcast %cst_38 : f32 to vector<64x1xf32>
    %116 = arith.mulf %114, %115 : vector<64x1xf32>
    %117 = arith.mulf %111, %111 : vector<64x1xf32>
    %118 = arith.subf %116, %117 : vector<64x1xf32>
    %119 = vector.broadcast %111 : vector<64x1xf32> to vector<64x16xf32>
    %120 = arith.subf %107, %119 : vector<64x16xf32>
    %cst_39 = arith.constant 9.99999997E-7 : f32
    %121 = vector.broadcast %cst_39 : f32 to vector<64x1xf32>
    %122 = arith.addf %118, %121 : vector<64x1xf32>
    %123 = math.rsqrt %122 : vector<64x1xf32>
    %124 = vector.broadcast %123 : vector<64x1xf32> to vector<64x16xf32>
    %125 = arith.mulf %120, %124 : vector<64x16xf32>
    %126 = arith.mulf %125, %13 : vector<64x16xf32>
    %127 = arith.addf %126, %16 : vector<64x16xf32>
    %cst_40 = arith.constant 5.000000e-01 : f32
    %128 = vector.broadcast %cst_40 : f32 to vector<64x16xf32>
    %129 = arith.mulf %128, %127 : vector<64x16xf32>
    %cst_41 = arith.constant 0.707106769 : f32
    %130 = vector.broadcast %cst_41 : f32 to vector<64x16xf32>
    %131 = arith.mulf %127, %130 : vector<64x16xf32>
    %132 = math.erf %131 : vector<64x16xf32>
    %cst_42 = arith.constant 1.000000e+00 : f32
    %133 = vector.broadcast %cst_42 : f32 to vector<64x16xf32>
    %134 = arith.addf %133, %132 : vector<64x16xf32>
    %135 = arith.mulf %129, %134 : vector<64x16xf32>
    %136 = arith.truncf %135 : vector<64x16xf32> to vector<64x16xbf16>
    %137 = tpu.concatenate %46, %76, %106, %136 in 0 : vector<64x16xbf16>, vector<64x16xbf16>, vector<64x16xbf16>, vector<64x16xbf16> -> vector<256x16xbf16>
    %c0_43 = arith.constant 0 : index
    %c0_44 = arith.constant 0 : index
    %138 = vector.load %arg6[%c0_43, %c0_44] : memref<16x64xbf16, #tpu.memory_space<vmem>>, vector<16x64xbf16>
    %cst_45 = arith.constant dense<0.000000e+00> : vector<256x64xf32>
    %139 = tpu.matmul %137, %138, %cst_45 {dimension_numbers = #tpu.dot_dimension_numbers<[1], [0], [0], [1], [0, 0, 1, 1], [], []>} : vector<256x16xbf16>, vector<16x64xbf16>, vector<256x64xf32> -> vector<256x64xf32>
    %c0_46 = arith.constant 0 : index
    %c0_47 = arith.constant 0 : index
    %140 = vector.load %arg7[%c0_46, %c0_47] : memref<1x64xf32, #tpu.memory_space<vmem>>, vector<1x64xf32>
    %141 = vector.broadcast %140 : vector<1x64xf32> to vector<256x64xf32>
    %142 = arith.addf %139, %141 : vector<256x64xf32>
    %143 = vector.extract_strided_slice %142 {offsets = [0, 0], sizes = [64, 64], strides = [1, 1]} : vector<256x64xf32> to vector<64x64xf32>
    %144 = arith.truncf %143 : vector<64x64xf32> to vector<64x64xbf16>
    %c0_48 = arith.constant 0 : index
    %c0_49 = arith.constant 0 : index
    %145 = vector.load %arg9[%c0_48, %c0_49] : memref<64x256xbf16, #tpu.memory_space<vmem>>, vector<64x64xbf16>
    tpu.vector_store %arg9[%c0_48, %c0_49], %144 {strides = array<i32>} : memref<64x256xbf16, #tpu.memory_space<vmem>>, vector<64x64xbf16>,
    %146 = vector.extract_strided_slice %142 {offsets = [64, 0], sizes = [64, 64], strides = [1, 1]} : vector<256x64xf32> to vector<64x64xf32>
    %147 = arith.truncf %146 : vector<64x64xf32> to vector<64x64xbf16>
    %c0_50 = arith.constant 0 : index
    %c64 = arith.constant 64 : index
    %148 = vector.load %arg9[%c0_50, %c64] : memref<64x256xbf16, #tpu.memory_space<vmem>>, vector<64x64xbf16>
    tpu.vector_store %arg9[%c0_50, %c64], %147 {strides = array<i32>} : memref<64x256xbf16, #tpu.memory_space<vmem>>, vector<64x64xbf16>,
    %149 = vector.extract_strided_slice %142 {offsets = [128, 0], sizes = [64, 64], strides = [1, 1]} : vector<256x64xf32> to vector<64x64xf32>
    %150 = arith.truncf %149 : vector<64x64xf32> to vector<64x64xbf16>
    %c0_51 = arith.constant 0 : index
    %c128 = arith.constant 128 : index
    %151 = vector.load %arg9[%c0_51, %c128] : memref<64x256xbf16, #tpu.memory_space<vmem>>, vector<64x64xbf16>
    tpu.vector_store %arg9[%c0_51, %c128], %150 {strides = array<i32>} : memref<64x256xbf16, #tpu.memory_space<vmem>>, vector<64x64xbf16>,
    %152 = vector.extract_strided_slice %142 {offsets = [192, 0], sizes = [64, 64], strides = [1, 1]} : vector<256x64xf32> to vector<64x64xf32>
    %153 = arith.truncf %152 : vector<64x64xf32> to vector<64x64xbf16>
    %c0_52 = arith.constant 0 : index
    %c192 = arith.constant 192 : index
    %154 = vector.load %arg9[%c0_52, %c192] : memref<64x256xbf16, #tpu.memory_space<vmem>>, vector<64x64xbf16>
    tpu.vector_store %arg9[%c0_52, %c192], %153 {strides = array<i32>} : memref<64x256xbf16, #tpu.memory_space<vmem>>, vector<64x64xbf16>,
    return
  }
  func.func @transform_0(%arg0: i32) -> (i32, i32) {
    %c0_i32 = arith.constant 0 : i32
    %c0_i32_0 = arith.constant 0 : i32
    return %arg0, %c0_i32 : i32, i32
  }
  func.func @transform_1(%arg0: i32) -> (i32, i32) {
    %c0_i32 = arith.constant 0 : i32
    %c0_i32_0 = arith.constant 0 : i32
    %c0_i32_1 = arith.constant 0 : i32
    return %c0_i32, %c0_i32_0 : i32, i32
  }
  func.func @transform_2(%arg0: i32) -> (i32, i32) {
    %c0_i32 = arith.constant 0 : i32
    %c0_i32_0 = arith.constant 0 : i32
    %c0_i32_1 = arith.constant 0 : i32
    return %c0_i32, %c0_i32_0 : i32, i32
  }
  func.func @transform_3(%arg0: i32) -> (i32, i32) {
    %c0_i32 = arith.constant 0 : i32
    %c0_i32_0 = arith.constant 0 : i32
    %c0_i32_1 = arith.constant 0 : i32
    return %c0_i32, %c0_i32_0 : i32, i32
  }
  func.func @transform_4(%arg0: i32) -> (i32, i32) {
    %c0_i32 = arith.constant 0 : i32
    %c0_i32_0 = arith.constant 0 : i32
    %c0_i32_1 = arith.constant 0 : i32
    return %c0_i32, %c0_i32_0 : i32, i32
  }
  func.func @transform_5(%arg0: i32) -> (i32, i32) {
    %c0_i32 = arith.constant 0 : i32
    %c0_i32_0 = arith.constant 0 : i32
    %c0_i32_1 = arith.constant 0 : i32
    return %c0_i32, %c0_i32_0 : i32, i32
  }
  func.func @transform_6(%arg0: i32) -> (i32, i32) {
    %c0_i32 = arith.constant 0 : i32
    %c0_i32_0 = arith.constant 0 : i32
    %c0_i32_1 = arith.constant 0 : i32
    return %c0_i32, %c0_i32_0 : i32, i32
  }
  func.func @transform_7(%arg0: i32) -> (i32, i32) {
    %c0_i32 = arith.constant 0 : i32
    %c0_i32_0 = arith.constant 0 : i32
    return %arg0, %c0_i32 : i32, i32
  }
  func.func @transform_8(%arg0: i32) -> (i32, i32) {
    %c0_i32 = arith.constant 0 : i32
    %c0_i32_0 = arith.constant 0 : i32
    return %arg0, %c0_i32 : i32, i32
  }
}

</mosaic_0001>

<bundles_post_ra>
// kernel: tile.19
= control target key start
LH: loop header
LB: loop body
LE: loop exit
PB: predicated region body
PF: predicated region fallthrough
CT: control target
= control target key end

     0   :  { %vm7_vm0 = vcmask 130048   ;;  %s37_s8 = smov 16   ;;  %s38_s9 = smov 32   ;;  %vm13_vm1 = vcmask 523648   ;;  %vm19_vm2 = vcmask 392448   ;;  %vm25_vm3 = vcmask 261248   ;;  %s55_s0 = inlined_call_operand.vmem [shape: f32[4,16], index: 0, kind: input, shape index: {}]   ;;  %s56_s1 = inlined_call_operand.vmem [shape: f32[1,64], index: 1, kind: output, shape index: {}]  }
   0x1   :  { %v4_v0 = vld [vmem:[%s55_s0] sm:$0xf]  ;;  %s36_s0 = smov 48  }
   0x2   :  { %5 = vst [vmem:[#allocation1] sm:$0xf] %v4_v0 }
   0x9   :  { %v10_v1 = vld [vmem:[#allocation1 + $0x3] sm:$0x1]   ;;  %v22_v2 = vld [vmem:[#allocation1 + $0x1] sm:$0x1]   ;;  %v6_v3 = vld [vmem:[#allocation1] sm:$0x1]  }
   0xa   :  { %11 = vrot.lane.b32.xlu0 %v10_v1, %s36_s0  ;;  %23 = vrot.lane.b32.xlu1 %v22_v2, %s37_s8  ;;  %v16_v4 = vld [vmem:[#allocation1 + $0x2] sm:$0x1]   ;;  %8 = vst.msk [vmem:[#allocation0] sm:$0x1] %vm7_vm0, %v6_v3  }
   0xe   :  { %17 = vrot.lane.b32.xlu0 %v16_v4, %s38_s9 }
  0x7c   :  { %v12_v5 = vpop.permute.xlu0 %11   ;;  %v24_v6 = vpop.permute.xlu1 %23  }
  0x7d   :  { %14 = vst.msk [vmem:[#allocation0] sm:$0x1] %vm13_vm1, %v12_v5  }
  0x80   :  { %v18_v7 = vpop.permute.xlu0 %17  }
  0x81   :  { %20 = vst.msk [vmem:[#allocation0] sm:$0x1] %vm19_vm2, %v18_v7  }
  0x82   :  { %26 = vst.msk [vmem:[#allocation0] sm:$0x1] %vm25_vm3, %v24_v6  }
  0x89   :  { %v30_v8 = vld [vmem:[#allocation0] sm:$0x1] }
  0x8a   :  { %32 = vst [vmem:[%s56_s1] sm:$0x1] %v30_v8 }

// kernel: tile.18
= control target key start
LH: loop header
LB: loop body
LE: loop exit
PB: predicated region body
PF: predicated region fallthrough
CT: control target
= control target key end

     0   :  { %s22_s0 = inlined_call_operand.vmem [shape: f32[16], index: 0, kind: input, shape index: {}]   ;;  %s23_s1 = inlined_call_operand.vmem [shape: f32[4,16], index: 1, kind: output, shape index: {}]  }
   0x1   :  { %v4_v0 = vld [vmem:[%s22_s0] ss:$0 sm:$0xff] }
   0x2   :  { %5 = vst [vmem:[%s23_s1] sm:$0xf] %v4_v0 }

// kernel: fpn_head_forward.1
= control target key start
LH: loop header
LB: loop body
LE: loop exit
PB: predicated region body
PF: predicated region fallthrough
CT: control target
= control target key end

     0   :  { %s2387_s27 = smov 0   ;;  %s3376_s0 = inlined_call_operand.vmem [shape: f32[128,16], index: 0, kind: input, shape index: {}]   ;;  %s3377_s1 = inlined_call_operand.vmem [shape: bf16[16,128], index: 1, kind: input, shape index: {}]   ;;  %s3378_s2 = inlined_call_operand.vmem [shape: f32[1,128], index: 2, kind: input, shape index: {}]   ;;  %s3379_s3 = inlined_call_operand.vmem [shape: f32[1,16], index: 3, kind: input, shape index: {}]   ;;  %s3380_s4 = inlined_call_operand.vmem [shape: f32[1,16], index: 4, kind: input, shape index: {}]   ;;  %s3381_s5 = inlined_call_operand.vmem [shape: bf16[16,64], index: 5, kind: input, shape index: {}]   ;;  %s3382_s6 = inlined_call_operand.vmem [shape: f32[1,64], index: 6, kind: input, shape index: {}]   ;;  %s3383_s7 = inlined_call_operand.vmem [shape: bf16[128,64], index: 7, kind: output, shape index: {0}]   ;;  %s3384_s8 = inlined_call_operand.vmem [shape: bf16[128,256], index: 8, kind: output, shape index: {1}]  }
   0x1 LB: > { %s1993_s28 = sadd.s32 4294967295, %s2333_s27   ;;  %p1997_p0 = scmp.ge.s32.totalorder %s2333_s27, 1  ;;  %s2333_s27 = sphi %s2387_s27, %s19_s27  }
   0x2   : > { %p266_p1 = scmp.lt.s32.totalorder %s2333_s27, 3 }
   0x4   : > { %p267_p2 = pnand %p1997_p0, %p266_p1 }
   0x5   : > { %v2197_v0 = vld [vmem:[%s3377_s1] sm:$0xff] (!%p267_p2)   ;;  %s1998_s9 = sshll.u32 (!%p267_p2), %s1993_s28, 3  ;;  %vm353_vm0 = vcmask (!%p267_p2), 130048   ;;  %vm463_vm1 = vcmask (!%p267_p2), 519168   ;;  %s2335_s20 = smov (!%p267_p2), 64   ;;  %vm1796_vm2 = vcmask (!%p267_p2), 1043968  }
   0x6   : > { %270 = sbr.rel (%p267_p2) target bundleno = 1410 (0x582), region = 48  ;;  %p307_p3 = scmp.lt.s32.totalorder (!%p267_p2), %s1998_s9, 15  ;;  %2136 = vmatprep.subr.bf16.mxu0 (!%p267_p2), %v2197_v0  ;;  %v2005_v13 = vld [vmem:[%s3378_s2] ss:$0 sm:$0xff] (!%p267_p2) }
   0x7   : > { %2137 = vmatpush3.bf16.msra.mxu0 (!%p267_p2), %v2197_v0  ;;  %s2336_s21 = smov (!%p267_p2), 32   ;;  %s2337_s22 = smov (!%p267_p2), 16  }
   0x8   : > { %s2338_s23 = smov (!%p267_p2), 48   ;;  %s2339_s26 = smov (!%p267_p2), 80  }
   0x9   : > { %s2340_s28 = smov (!%p267_p2), 96   ;;  %s2341_s11 = smov (!%p267_p2), 112  }
   0xd   : > { %s3386_s9 = smov (!%p307_p3, %s1998_s9), 15 }
   0xe   : > { %s1999_s10 = sshll.u32 %s3386_s9, 3  ;;  %s2001_s16 = sshll.u32 %s3386_s9, 2 }
   0xf   : > { %s310_s13 = scalar_lea.vmem %s3376_s0, %s1999_s10  ;;  %s2419_s19 = scalar_lea.vmem %s3383_s7, %s2001_s16 }
  0x10   : > { %v326_v1 = vld [vmem:[%s310_s13] sm:$0xff]  ;;  %v327_v2 = vld [vmem:[%s310_s13 + $0x8] sm:$0xff]  ;;  %v328_v3 = vld [vmem:[%s310_s13 + $0x10] sm:$0xff]  ;;  %s3256_s18 = scalar_lea.vmem %s3384_s8, %s1999_s10 }
  0x11   : > { %v334_v4 = vpack.c.bf16 %v327_v2, %v326_v1  ;;  %v329_v5 = vld [vmem:[%s310_s13 + $0x18] sm:$0xff]  ;;  %v330_v6 = vld [vmem:[%s310_s13 + $0x20] sm:$0xff]  ;;  %v331_v7 = vld [vmem:[%s310_s13 + $0x28] sm:$0xff] }
  0x12   : > { %v335_v8 = vpack.c.bf16 %v329_v5, %v328_v3  ;;  %v336_v9 = vpack.c.bf16 %v331_v7, %v330_v6  ;;  %v332_v10 = vld [vmem:[%s310_s13 + $0x30] sm:$0xff]  ;;  %v333_v11 = vld [vmem:[%s310_s13 + $0x38] sm:$0xff] }
  0x13   : > { %2138 = vmatprep.mubr.msk.bf16.mxu0 %vm353_vm0, %v334_v4  ;;  %v337_v12 = vpack.c.bf16 %v333_v11, %v332_v10 }
  0x14   : > { %2139 = vmatmul.mubr.msk.bf16.vlgmr.msra.gmra.mrb[0].mxu0 %vm353_vm0, %v335_v8 }
  0x15   : > { %2142 = vmatprep.mubr.msk.bf16.mxu0 %vm353_vm0, %v336_v9 }
  0x1c   : > { %2143 = vmatmul.mubr.msk.bf16.gmra.mrb[4].mxu0 %vm353_vm0, %v337_v12 }
  0xe7   : > { %v2140_v14 = vpop.f32.mrb[0].mxu0 }
  0xe8   : > { %v2414_v15 = vadd.f32 %v2140_v14, %v2005_v13  ;;  %v400_v16 = vpop.f32.mrb[1].mxu0 }
  0xe9   : > { %v2421_v17 = vadd.f32 %v2005_v13, %v400_v16  ;;  %v2141_v18 = vpop.f32.mrb[2].mxu0 }
  0xea   : > { %v2076_v19 = vpack.c.bf16 %v2414_v15, %v2414_v15  ;;  %v2425_v20 = vadd.f32 %v2141_v18, %v2005_v13  ;;  %496 = vrot.lane.b32.xlu1 %v2414_v15, %s2335_s20  ;;  %964 = vrot.lane.b32.xlu0 %v2414_v15, %s2336_s21  ;;  %v403_v21 = vpop.f32.mrb[3].mxu0  ;;  %v550_v38 = vmul.f32 %v2414_v15, %v2414_v15 }
  0xeb   : > { %v2074_v22 = vpack.c.bf16 %v2421_v17, %v2421_v17  ;;  %v2433_v23 = vadd.f32 %v2005_v13, %v403_v21  ;;  %v548_v40 = vmul.f32 %v2421_v17, %v2421_v17 }
  0xec   : > { %466 = vst.msk [vmem:[%s2419_s19 + $0x8] sm:$0xf] %vm463_vm1, %v2076_v19  ;;  %v2077_v24 = vpack.c.bf16 %v2425_v20, %v2425_v20  ;;  %v551_v39 = vmul.f32 %v2425_v20, %v2425_v20 }
  0xed   : > { %464 = vst.msk [vmem:[%s2419_s19] sm:$0xf] %vm463_vm1, %v2074_v22  ;;  %v2075_v25 = vpack.c.bf16 %v2433_v23, %v2433_v23  ;;  %v549_v41 = vmul.f32 %v2433_v23, %v2433_v23 }
  0xee   : > { %467 = vst.msk [vmem:[%s2419_s19 + $0xc] sm:$0xf] %vm463_vm1, %v2077_v24  ;;  %1190 = vrot.lane.b32.xlu0 %v2414_v15, %s2337_s22  ;;  %492 = vrot.lane.b32.xlu1 %v2421_v17, %s2335_s20 }
  0xef   : > { %465 = vst.msk [vmem:[%s2419_s19 + $0x4] sm:$0xf] %vm463_vm1, %v2075_v25  ;;  %v2144_v26 = vpop.f32.mrb[4].mxu0 }
  0xf0   : > { %v2451_v27 = vadd.f32 %v2144_v26, %v2005_v13  ;;  %v416_v28 = vpop.f32.mrb[5].mxu0 }
  0xf1   : > { %v2453_v29 = vadd.f32 %v2005_v13, %v416_v28  ;;  %v2145_v30 = vpop.f32.mrb[6].mxu0 }
  0xf2   : > { %738 = vrot.lane.b32.xlu0 %v2414_v15, %s2338_s23  ;;  %966 = vrot.lane.b32.xlu1 %v2425_v20, %s2336_s21  ;;  %v2080_v31 = vpack.c.bf16 %v2451_v27, %v2451_v27  ;;  %v2461_v32 = vadd.f32 %v2145_v30, %v2005_v13  ;;  %v419_v33 = vpop.f32.mrb[7].mxu0  ;;  %v2541_v42 = vmul.f32 %v2451_v27, %v2451_v27 }
  0xf3   : > { %v2078_v34 = vpack.c.bf16 %v2453_v29, %v2453_v29  ;;  %v2465_v35 = vadd.f32 %v2005_v13, %v419_v33  ;;  %v2561_v43 = vmul.f32 %v2453_v29, %v2453_v29 }
  0xf4   : > { %470 = vst.msk [vmem:[%s2419_s19 + $0x18] sm:$0xf] %vm463_vm1, %v2080_v31  ;;  %v2081_v36 = vpack.c.bf16 %v2461_v32, %v2461_v32  ;;  %v2573_v44 = vmul.f32 %v2461_v32, %v2461_v32 }
  0xf5   : > { %468 = vst.msk [vmem:[%s2419_s19 + $0x10] sm:$0xf] %vm463_vm1, %v2078_v34  ;;  %v2079_v37 = vpack.c.bf16 %v2465_v35, %v2465_v35  ;;  %v2589_v47 = vmul.f32 %v2465_v35, %v2465_v35 }
  0xf6   : > { %1192 = vrot.lane.b32.xlu1 %v2425_v20, %s2337_s22  ;;  %960 = vrot.lane.b32.xlu0 %v2421_v17, %s2336_s21  ;;  %471 = vst.msk [vmem:[%s2419_s19 + $0x1c] sm:$0xf] %vm463_vm1, %v2081_v36 }
  0xf7   : > { %469 = vst.msk [vmem:[%s2419_s19 + $0x14] sm:$0xf] %vm463_vm1, %v2079_v37 }
  0xfa   : > { %740 = vrot.lane.b32.xlu1 %v2425_v20, %s2338_s23  ;;  %1186 = vrot.lane.b32.xlu0 %v2421_v17, %s2337_s22 }
  0xfe   : > { %498 = vrot.lane.b32.xlu1 %v2425_v20, %s2335_s20  ;;  %734 = vrot.lane.b32.xlu0 %v2421_v17, %s2338_s23 }
 0x102   : > { %962 = vrot.lane.b32.xlu1 %v2433_v23, %s2336_s21  ;;  %1020 = vrot.lane.b32.xlu0 %v550_v38, %s2336_s21 }
 0x106   : > { %1188 = vrot.lane.b32.xlu1 %v2433_v23, %s2337_s22  ;;  %1246 = vrot.lane.b32.xlu0 %v550_v38, %s2337_s22 }
 0x10a   : > { %736 = vrot.lane.b32.xlu1 %v2433_v23, %s2338_s23  ;;  %794 = vrot.lane.b32.xlu0 %v550_v38, %s2338_s23 }
 0x10e   : > { %1022 = vrot.lane.b32.xlu1 %v551_v39, %s2336_s21  ;;  %568 = vrot.lane.b32.xlu0 %v550_v38, %s2335_s20 }
 0x112   : > { %1248 = vrot.lane.b32.xlu1 %v551_v39, %s2337_s22  ;;  %1016 = vrot.lane.b32.xlu0 %v548_v40, %s2336_s21 }
 0x116   : > { %796 = vrot.lane.b32.xlu1 %v551_v39, %s2338_s23  ;;  %1242 = vrot.lane.b32.xlu0 %v548_v40, %s2337_s22 }
 0x11a   : > { %570 = vrot.lane.b32.xlu1 %v551_v39, %s2335_s20  ;;  %790 = vrot.lane.b32.xlu0 %v548_v40, %s2338_s23 }
 0x11e   : > { %1018 = vrot.lane.b32.xlu1 %v549_v41, %s2336_s21  ;;  %494 = vrot.lane.b32.xlu0 %v2433_v23, %s2335_s20 }
 0x122   : > { %1244 = vrot.lane.b32.xlu1 %v549_v41, %s2337_s22  ;;  %564 = vrot.lane.b32.xlu0 %v548_v40, %s2335_s20 }
 0x126   : > { %792 = vrot.lane.b32.xlu1 %v549_v41, %s2338_s23  ;;  %972 = vrot.lane.b32.xlu0 %v2451_v27, %s2336_s21 }
 0x12a   : > { %566 = vrot.lane.b32.xlu1 %v549_v41, %s2335_s20  ;;  %1198 = vrot.lane.b32.xlu0 %v2451_v27, %s2337_s22 }
 0x12e   : > { %746 = vrot.lane.b32.xlu1 %v2451_v27, %s2338_s23  ;;  %742 = vrot.lane.b32.xlu0 %v2453_v29, %s2338_s23 }
 0x132   : > { %504 = vrot.lane.b32.xlu1 %v2451_v27, %s2335_s20  ;;  %968 = vrot.lane.b32.xlu0 %v2453_v29, %s2336_s21 }
 0x136   : > { %500 = vrot.lane.b32.xlu1 %v2453_v29, %s2335_s20  ;;  %1194 = vrot.lane.b32.xlu0 %v2453_v29, %s2337_s22 }
 0x13a   : > { %748 = vrot.lane.b32.xlu1 %v2461_v32, %s2338_s23  ;;  %802 = vrot.lane.b32.xlu0 %v2541_v42, %s2338_s23 }
 0x13e   : > { %974 = vrot.lane.b32.xlu1 %v2461_v32, %s2336_s21  ;;  %1028 = vrot.lane.b32.xlu0 %v2541_v42, %s2336_s21 }
 0x142   : > { %1200 = vrot.lane.b32.xlu1 %v2461_v32, %s2337_s22  ;;  %1254 = vrot.lane.b32.xlu0 %v2541_v42, %s2337_s22 }
 0x146   : > { %506 = vrot.lane.b32.xlu1 %v2461_v32, %s2335_s20  ;;  %744 = vrot.lane.b32.xlu0 %v2465_v35, %s2338_s23 }
 0x14a   : > { %970 = vrot.lane.b32.xlu1 %v2465_v35, %s2336_s21  ;;  %798 = vrot.lane.b32.xlu0 %v2561_v43, %s2338_s23 }
 0x14e   : > { %1196 = vrot.lane.b32.xlu1 %v2465_v35, %s2337_s22  ;;  %1024 = vrot.lane.b32.xlu0 %v2561_v43, %s2336_s21 }
 0x152   : > { %804 = vrot.lane.b32.xlu1 %v2573_v44, %s2338_s23  ;;  %1250 = vrot.lane.b32.xlu0 %v2561_v43, %s2337_s22 }
 0x156   : > { %1030 = vrot.lane.b32.xlu1 %v2573_v44, %s2336_s21  ;;  %502 = vrot.lane.b32.xlu0 %v2465_v35, %s2335_s20 }
 0x15a   : > { %1256 = vrot.lane.b32.xlu1 %v2573_v44, %s2337_s22 }
 0x15c   : > { %v2585_v45 = vpop.permute.xlu1 %496  ;;  %v965_v46 = vpop.permute.xlu0 %964 }
 0x15d   : > { %v990_v9 = vsel %vm353_vm0, %v965_v46, 0.0 }
 0x15e   : > { %800 = vrot.lane.b32.xlu1 %v2589_v47, %s2338_s23 }
 0x160   : > { %v2593_v48 = vpop.permute.xlu0 %1190  ;;  %v2595_v49 = vpop.permute.xlu1 %492 }
 0x162   : > { %1026 = vrot.lane.b32.xlu1 %v2589_v47, %s2336_s21 }
 0x164   : > { %v2599_v50 = vpop.permute.xlu0 %738  ;;  %v967_v51 = vpop.permute.xlu1 %966 }
 0x165   : > { %v993_v60 = vsel %vm353_vm0, %v967_v51, 0.0 }
 0x166   : > { %1252 = vrot.lane.b32.xlu1 %v2589_v47, %s2337_s22 }
 0x168   : > { %v2603_v52 = vpop.permute.xlu1 %1192  ;;  %v961_v53 = vpop.permute.xlu0 %960 }
 0x169   : > { %v984_v12 = vsel %vm353_vm0, %v961_v53, 0.0 }
 0x16c   : > { %v2605_v54 = vpop.permute.xlu1 %740  ;;  %v2607_v55 = vpop.permute.xlu0 %1186 }
 0x170   : > { %v2609_v56 = vpop.permute.xlu1 %498  ;;  %v2611_v57 = vpop.permute.xlu0 %734 }
 0x174   : > { %v963_v58 = vpop.permute.xlu1 %962  ;;  %v1021_v59 = vpop.permute.xlu0 %1020 }
 0x175   : > { %994 = vadd.xlane.f32.xlu0 %v993_v60  ;;  %v987_v63 = vsel %vm353_vm0, %v963_v58, 0.0  ;;  %v1046_v16 = vsel %vm353_vm0, %v1021_v59, 0.0 }
 0x178   : > { %v2614_v61 = vpop.permute.xlu1 %1188  ;;  %v2616_v62 = vpop.permute.xlu0 %1246 }
 0x179   : > { %988 = vadd.xlane.f32.xlu0 %v987_v63 }
 0x17c   : > { %v2619_v0 = vpop.permute.xlu1 %736  ;;  %v2621_v1 = vpop.permute.xlu0 %794 }
 0x180   : > { %v1023_v2 = vpop.permute.xlu1 %1022  ;;  %v2623_v3 = vpop.permute.xlu0 %568 }
 0x181   : > { %v1049_v4 = vsel %vm353_vm0, %v1023_v2, 0.0 }
 0x182   : > { %1050 = vadd.xlane.f32.xlu0 %v1049_v4 }
 0x184   : > { %v2626_v5 = vpop.permute.xlu1 %1248  ;;  %v1017_v6 = vpop.permute.xlu0 %1016 }
 0x185   : > { %v1040_v22 = vsel %vm353_vm0, %v1017_v6, 0.0 }
 0x188   : > { %v2628_v7 = vpop.permute.xlu1 %796  ;;  %v2630_v8 = vpop.permute.xlu0 %1242 }
 0x18a   : > { %991 = vadd.xlane.f32.xlu1 %v990_v9 }
 0x18c   : > { %v2633_v10 = vpop.permute.xlu1 %570  ;;  %v2635_v11 = vpop.permute.xlu0 %790 }
 0x18e   : > { %985 = vadd.xlane.f32.xlu1 %v984_v12 }
 0x190   : > { %v1019_v13 = vpop.permute.xlu1 %1018  ;;  %v2638_v14 = vpop.permute.xlu0 %494 }
 0x191   : > { %v1043_v18 = vsel %vm353_vm0, %v1019_v13, 0.0 }
 0x192   : > { %1047 = vadd.xlane.f32.xlu1 %v1046_v16  ;;  %1044 = vadd.xlane.f32.xlu0 %v1043_v18 }
 0x194   : > { %v2642_v19 = vpop.permute.xlu1 %1244  ;;  %v2644_v21 = vpop.permute.xlu0 %564 }
 0x196   : > { %1041 = vadd.xlane.f32.xlu1 %v1040_v22 }
 0x198   : > { %v2647_v24 = vpop.permute.xlu1 %792  ;;  %v973_v25 = vpop.permute.xlu0 %972 }
 0x199   : > { %v1002_v37 = vsel %vm353_vm0, %v973_v25, 0.0 }
 0x19c   : > { %v2649_v26 = vpop.permute.xlu1 %566  ;;  %v2651_v28 = vpop.permute.xlu0 %1198 }
 0x1a0   : > { %v747_v30 = vpop.permute.xlu1 %746  ;;  %v743_v31 = vpop.permute.xlu0 %742 }
 0x1a1   : > { %v776_v33 = vsel %vm353_vm0, %v747_v30, 0.0  ;;  %v770_v40 = vsel %vm353_vm0, %v743_v31, 0.0 }
 0x1a2   : > { %777 = vadd.xlane.f32.xlu0 %v776_v33 }
 0x1a4   : > { %v2654_v34 = vpop.permute.xlu1 %504  ;;  %v969_v36 = vpop.permute.xlu0 %968 }
 0x1a5   : > { %v996_v51 = vsel %vm353_vm0, %v969_v36, 0.0 }
 0x1a6   : > { %1003 = vadd.xlane.f32.xlu0 %v1002_v37 }
 0x1a8   : > { %v2657_v38 = vpop.permute.xlu1 %500  ;;  %v2659_v39 = vpop.permute.xlu0 %1194 }
 0x1aa   : > { %771 = vadd.xlane.f32.xlu0 %v770_v40 }
 0x1ac   : > { %v749_v41 = vpop.permute.xlu1 %748  ;;  %v803_v46 = vpop.permute.xlu0 %802 }
 0x1ad   : > { %v832_v53 = vsel %vm353_vm0, %v803_v46, 0.0  ;;  %v779_v60 = vsel %vm353_vm0, %v749_v41, 0.0 }
 0x1ae   : > { %997 = vadd.xlane.f32.xlu0 %v996_v51  ;;  %833 = vadd.xlane.f32.xlu1 %v832_v53 }
 0x1b0   : > { %v975_v58 = vpop.permute.xlu1 %974  ;;  %v1029_v59 = vpop.permute.xlu0 %1028 }
 0x1b1   : > { %v1005_v63 = vsel %vm353_vm0, %v975_v58, 0.0  ;;  %v1058_v6 = vsel %vm353_vm0, %v1029_v59, 0.0 }
 0x1b2   : > { %780 = vadd.xlane.f32.xlu0 %v779_v60  ;;  %1006 = vadd.xlane.f32.xlu1 %v1005_v63  ;;  %v1210_v60 = vsel %vm353_vm0, %v2607_v55, 0.0  ;;  %v1213_v63 = vsel %vm353_vm0, %v2614_v61, 0.0  ;;  %v761_v55 = vsel %vm353_vm0, %v2619_v0, 0.0  ;;  %v764_v61 = vsel %vm353_vm0, %v2599_v50, 0.0 }
 0x1b3   : > { %v814_v0 = vsel %vm353_vm0, %v2635_v11, 0.0  ;;  %v820_v11 = vsel %vm353_vm0, %v2621_v1, 0.0  ;;  %v2749_v1 = vld [vmem:[%s3379_s3] ss:$0 sm:$0xff] }
 0x1b4   : > { %v2666_v2 = vpop.permute.xlu1 %1200  ;;  %v2668_v4 = vpop.permute.xlu0 %1254 }
 0x1b6   : > { %1059 = vadd.xlane.f32.xlu0 %v1058_v6  ;;  %v1216_v6 = vsel %vm353_vm0, %v2593_v48, 0.0  ;;  %v1272_v48 = vsel %vm353_vm0, %v2616_v62, 0.0 }
 0x1b8   : > { %v2671_v9 = vpop.permute.xlu1 %506  ;;  %v745_v12 = vpop.permute.xlu0 %744 }
 0x1b9   : > { %v773_v13 = vsel %vm353_vm0, %v745_v12, 0.0  ;;  %v1219_v12 = vsel %vm353_vm0, %v2603_v52, 0.0  ;;  %v758_v52 = vsel %vm353_vm0, %v2611_v57, 0.0  ;;  %v1228_v57 = vsel %vm353_vm0, %v2651_v28, 0.0 }
 0x1ba   : > { %774 = vadd.xlane.f32.xlu1 %v773_v13 }
 0x1bc   : > { %v971_v16 = vpop.permute.xlu1 %970  ;;  %v799_v18 = vpop.permute.xlu0 %798 }
 0x1bd   : > { %v826_v22 = vsel %vm353_vm0, %v799_v18, 0.0  ;;  %v999_v31 = vsel %vm353_vm0, %v971_v16, 0.0 }
 0x1be   : > { %827 = vadd.xlane.f32.xlu1 %v826_v22 }
 0x1c0   : > { %v1197_v25 = vpop.permute.xlu1 %1196  ;;  %v1025_v30 = vpop.permute.xlu0 %1024 }
 0x1c1   : > { %v1052_v33 = vsel %vm353_vm0, %v1025_v30, 0.0  ;;  %v1225_v62 = vsel %vm353_vm0, %v1197_v25, 0.0 }
 0x1c2   : > { %1000 = vadd.xlane.f32.xlu1 %v999_v31  ;;  %1053 = vadd.xlane.f32.xlu0 %v1052_v33 }
 0x1c4   : > { %v805_v36 = vpop.permute.xlu1 %804 }
 0x1c5   : > { %v835_v37 = vsel %vm353_vm0, %v805_v36, 0.0 }
 0x1c6   : > { %836 = vadd.xlane.f32.xlu0 %v835_v37 }
 0x1c8   : > { %v1031_v40 = vpop.permute.xlu1 %1030 }
 0x1c9   : > { %v1061_v41 = vsel %vm353_vm0, %v1031_v40, 0.0 }
 0x1ca   : > { %1062 = vadd.xlane.f32.xlu0 %v1061_v41 }
 0x1cc   : > { %v2679_v46 = vpop.permute.xlu1 %1256 }
 0x1cd   : > { %v1287_v25 = vsel %vm353_vm0, %v2679_v46, 0.0 }
 0x1d0   : > { %v801_v51 = vpop.permute.xlu1 %800 }
 0x1d1   : > { %v829_v53 = vsel %vm353_vm0, %v801_v51, 0.0 }
 0x1d2   : > { %830 = vadd.xlane.f32.xlu0 %v829_v53 }
 0x1d4   : > { %v1027_v58 = vpop.permute.xlu1 %1026 }
 0x1d5   : > { %v1055_v59 = vsel %vm353_vm0, %v1027_v58, 0.0 }
 0x1d6   : > { %1056 = vadd.xlane.f32.xlu1 %v1055_v59  ;;  %1211 = vadd.xlane.f32.xlu0 %v1210_v60 }
 0x1d8   : > { %v1253_v13 = vpop.permute.xlu1 %1252 }
 0x1d9   : > { %v1281_v16 = vsel %vm353_vm0, %v1253_v13, 0.0 }
 0x1da   : > { %1214 = vadd.xlane.f32.xlu1 %v1213_v63 }
 0x1eb   : > { %574 = vrot.lane.b32.xlu1 %v2589_v47, %s2335_s20  ;;  %v1266_v47 = vsel %vm353_vm0, %v2630_v8, 0.0  ;;  %v1251_v8 = vpop.permute.xlu0 %1250 }
 0x1ec   : > { %572 = vrot.lane.b32.xlu0 %v2561_v43, %s2335_s20  ;;  %v1269_v43 = vsel %vm353_vm0, %v2642_v19, 0.0  ;;  %v1231_v19 = vsel %vm353_vm0, %v2666_v2, 0.0  ;;  %v1278_v28 = vsel %vm353_vm0, %v1251_v8, 0.0  ;;  %v823_v2 = vsel %vm353_vm0, %v2628_v7, 0.0 }
 0x1ef   : > { %v2724_v50 = vpop.permute.xlu0 %502 }
 0x20b   : > { %1217 = vadd.xlane.f32.xlu0 %v1216_v6 }
 0x20f   : > { %1220 = vadd.xlane.f32.xlu1 %v1219_v12 }
 0x217   : > { %v2762_v31 = vpop.xlane.xlu1 %991 }
 0x21b   : > { %v2768_v36 = vpop.xlane.xlu1 %985 }
 0x21f   : > { %v1048_v40 = vpop.xlane.xlu1 %1047 }
 0x220   : > { %578 = vrot.lane.b32.xlu1 %v2573_v44, %s2335_s20  ;;  %v1275_v44 = vsel %vm353_vm0, %v2626_v5, 0.0  ;;  %v767_v5 = vsel %vm353_vm0, %v2605_v54, 0.0  ;;  %v2729_v54 = vpop.xlane.xlu0 %994 }
 0x221   : > { %576 = vrot.lane.b32.xlu0 %v2541_v42, %s2335_s20  ;;  %v1222_v42 = vsel %vm353_vm0, %v2659_v39, 0.0  ;;  %v817_v39 = vsel %vm353_vm0, %v2647_v24, 0.0  ;;  %v1284_v24 = vsel %vm353_vm0, %v2668_v4, 0.0  ;;  %v2760_v4 = vld [vmem:[%s3380_s4] ss:$0 sm:$0xff] }
 0x223   : > { %v2780_v46 = vpop.xlane.xlu1 %1041 }
 0x224   : > { %v2736_v18 = vpop.xlane.xlu0 %988 }
 0x228   : > { %v2740_v22 = vpop.xlane.xlu0 %1050 }
 0x22c   : > { %v2744_v30 = vpop.xlane.xlu0 %1044 }
 0x230   : > { %v2751_v7 = vpop.xlane.xlu0 %777 }
 0x234   : > { %v2764_v33 = vpop.xlane.xlu0 %1003 }
 0x238   : > { %v2770_v37 = vpop.xlane.xlu0 %771 }
 0x23b   : > { %v2784_v53 = vpop.xlane.xlu1 %833 }
 0x23c   : > { %v2778_v41 = vpop.xlane.xlu0 %997 }
 0x23f   : > { %v2788_v59 = vpop.xlane.xlu1 %1006 }
 0x240   : > { %1267 = vadd.xlane.f32.xlu0 %v1266_v47  ;;  %v2782_v51 = vpop.xlane.xlu0 %780 }
 0x244   : > { %1270 = vadd.xlane.f32.xlu1 %v1269_v43  ;;  %1273 = vadd.xlane.f32.xlu0 %v1272_v48  ;;  %v2786_v58 = vpop.xlane.xlu0 %1059  ;;  %v516_v43 = vsel %vm353_vm0, %v2595_v49, 0.0  ;;  %v588_v49 = vsel %vm353_vm0, %v2644_v21, 0.0  ;;  %v528_v21 = vsel %vm353_vm0, %v2657_v38, 0.0  ;;  %v537_v38 = vsel %vm353_vm0, %v2671_v9, 0.0 }
 0x245   : > { %v2847_v9 = vmul.f32 0.0625, %v2762_v31  ;;  %v1064_v31 = vmul.f32 0.0625, %v2780_v46  ;;  %v2875_v46 = vmul.f32 0.0625, %v2770_v37 }
 0x247   : > { %v2792_v63 = vpop.xlane.xlu1 %774 }
 0x248   : > { %759 = vadd.xlane.f32.xlu1 %v758_v52  ;;  %1276 = vadd.xlane.f32.xlu0 %v1275_v44  ;;  %v522_v44 = vsel %vm353_vm0, %v2585_v45, 0.0  ;;  %v591_v45 = vsel %vm353_vm0, %v2649_v26, 0.0  ;;  %v534_v26 = vsel %vm353_vm0, %v2654_v34, 0.0 }
 0x24b   : > { %v2796_v12 = vpop.xlane.xlu1 %827 }
 0x24c   : > { %1223 = vadd.xlane.f32.xlu1 %v1222_v42  ;;  %762 = vadd.xlane.f32.xlu0 %v761_v55  ;;  %v519_v42 = vsel %vm353_vm0, %v2638_v14, 0.0  ;;  %v594_v14 = vsel %vm353_vm0, %v2623_v3, 0.0  ;;  %v531_v3 = vsel %vm353_vm0, %v2724_v50, 0.0 }
 0x24f   : > { %v2790_v60 = vpop.xlane.xlu0 %1053  ;;  %v2802_v48 = vpop.xlane.xlu1 %1000 }
 0x250   : > { %765 = vadd.xlane.f32.xlu1 %v764_v61  ;;  %1226 = vadd.xlane.f32.xlu0 %v1225_v62  ;;  %v525_v61 = vsel %vm353_vm0, %v2609_v56, 0.0  ;;  %v597_v56 = vsel %vm353_vm0, %v2633_v10, 0.0 }
 0x253   : > { %v2794_v6 = vpop.xlane.xlu0 %836 }
 0x254   : > { %1229 = vadd.xlane.f32.xlu1 %v1228_v57  ;;  %768 = vadd.xlane.f32.xlu0 %v767_v5 }
 0x257   : > { %v2798_v47 = vpop.xlane.xlu0 %1062 }
 0x258   : > { %815 = vadd.xlane.f32.xlu1 %v814_v0  ;;  %1232 = vadd.xlane.f32.xlu0 %v1231_v19 }
 0x25c   : > { %818 = vadd.xlane.f32.xlu0 %v817_v39  ;;  %1279 = vadd.xlane.f32.xlu1 %v1278_v28 }
 0x25f   : > { %v2804_v52 = vpop.xlane.xlu0 %830 }
 0x260   : > { %1282 = vadd.xlane.f32.xlu0 %v1281_v16  ;;  %821 = vadd.xlane.f32.xlu1 %v820_v11  ;;  %v2843_v16 = vmul.f32 0.0625, %v2729_v54  ;;  %v1067_v11 = vmul.f32 0.0625, %v2740_v22  ;;  %v1065_v54 = vmul.f32 0.0625, %v2744_v30 }
 0x263   : > { %v2810_v55 = vpop.xlane.xlu1 %1056  ;;  %v2816_v62 = vpop.xlane.xlu0 %1211 }
 0x264   : > { %824 = vadd.xlane.f32.xlu0 %v823_v2  ;;  %v1075_v2 = vmul.f32 %v2843_v16, %v2843_v16 }
 0x267   : > { %v2822_v57 = vpop.xlane.xlu1 %1214  ;;  %v573_v5 = vpop.permute.xlu0 %572 }
 0x268   : > { %1285 = vadd.xlane.f32.xlu0 %v1284_v24  ;;  %v600_v10 = vsel %vm353_vm0, %v573_v5, 0.0  ;;  %v1066_v24 = vmul.f32 0.0625, %v1048_v40 }
 0x26b   : > { %v575_v8 = vpop.permute.xlu1 %574 }
 0x26c   : > { %1288 = vadd.xlane.f32.xlu0 %v1287_v25  ;;  %v603_v28 = vsel %vm353_vm0, %v575_v8, 0.0  ;;  %v2852_v25 = vmul.f32 0.0625, %v2736_v18  ;;  %v2884_v8 = vmul.f32 0.0625, %v2782_v51  ;;  %v845_v51 = vmul.f32 0.0625, %v2794_v6 }
 0x26e   : > { %v1073_v40 = vmul.f32 %v2852_v25, %v2852_v25 }
 0x271   : > { %894 = vrot.lane.b32.xlu1 %v2749_v1, %s2339_s26 }
 0x275   : > { %1120 = vrot.lane.b32.xlu1 %v2749_v1, %s2340_s28 }
 0x279   : > { %1131 = vrot.lane.b32.xlu1 %v2760_v4, %s2340_s28 }
 0x27d   : > { %1346 = vrot.lane.b32.xlu1 %v2749_v1, %s2341_s11 }
 0x281   : > { %1357 = vrot.lane.b32.xlu1 %v2760_v4, %s2341_s11 }
 0x282   : > { %905 = vrot.lane.b32.xlu0 %v2760_v4, %s2339_s26 }
 0x298   : > { %v2828_v0 = vpop.xlane.xlu0 %1217 }
 0x29c   : > { %v2834_v19 = vpop.xlane.xlu1 %1220  ;;  %v577_v39 = vpop.permute.xlu0 %576 }
 0x29d   : > { %v606_v13 = vsel %vm353_vm0, %v577_v39, 0.0  ;;  %v850_v39 = vmul.f32 %v2875_v46, %v2875_v46 }
 0x2a0   : > { %v579_v34 = vpop.permute.xlu1 %578 }
 0x2a1   : > { %517 = vadd.xlane.f32.xlu0 %v516_v43  ;;  %v609_v50 = vsel %vm353_vm0, %v579_v34, 0.0  ;;  %v1083_v43 = vsub.f32 %v1067_v11, %v1075_v2  ;;  %v2905_v11 = vmul.f32 0.0625, %v2802_v48  ;;  %v2914_v48 = vmul.f32 0.0625, %v2816_v62 }
 0x2a3   : > { %v1099_v18 = vadd.f32 1e-06, %v1083_v43 }
 0x2a5   : > { %523 = vadd.xlane.f32.xlu0 %v522_v44  ;;  %520 = vadd.xlane.f32.xlu1 %v519_v42  ;;  %v1074_v44 = vmul.f32 %v2847_v9, %v2847_v9  ;;  %v2857_v42 = vmul.f32 0.0625, %v2768_v36  ;;  %v2870_v36 = vmul.f32 0.0625, %v2764_v33  ;;  %2199 = vrsqrt.f32 %v1099_v18 }
 0x2a6   : > { %v2921_v18 = vmul.f32 0.0625, %v2822_v57  ;;  %v1298_v57 = vmul.f32 %v2914_v48, %v2914_v48 }
 0x2a7   : > { %v1082_v22 = vsub.f32 %v1066_v24, %v1074_v44  ;;  %v1078_v37 = vmul.f32 %v2870_v36, %v2870_v36  ;;  %v843_v24 = vmul.f32 0.0625, %v2804_v52  ;;  %v1077_v52 = vmul.f32 %v2905_v11, %v2905_v11 }
 0x2a9   : > { %526 = vadd.xlane.f32.xlu0 %v525_v61  ;;  %589 = vadd.xlane.f32.xlu1 %v588_v49  ;;  %v2862_v61 = vmul.f32 0.0625, %v2751_v7  ;;  %v1072_v49 = vmul.f32 %v2857_v42, %v2857_v42  ;;  %v1098_v5 = vadd.f32 1e-06, %v1082_v22 }
 0x2ab   : > { %v852_v7 = vmul.f32 %v2862_v61, %v2862_v61  ;;  %2201 = vrsqrt.f32 %v1098_v5 }
 0x2ad   : > { %592 = vadd.xlane.f32.xlu0 %v591_v45  ;;  %595 = vadd.xlane.f32.xlu1 %v594_v14  ;;  %v844_v45 = vmul.f32 0.0625, %v2784_v53  ;;  %v1081_v14 = vsub.f32 %v1065_v54, %v1073_v40  ;;  %v1070_v53 = vmul.f32 0.0625, %v2786_v58 }
 0x2af   : > { %v860_v33 = vsub.f32 %v844_v45, %v852_v7  ;;  %v2924_v45 = vmul.f32 0.0625, %v2828_v0  ;;  %v1299_v0 = vmul.f32 %v2921_v18, %v2921_v18 }
 0x2b1   : > { %598 = vadd.xlane.f32.xlu0 %v597_v56  ;;  %529 = vadd.xlane.f32.xlu1 %v528_v21  ;;  %v1080_v56 = vsub.f32 %v1064_v31, %v1072_v49  ;;  %v2880_v21 = vmul.f32 0.0625, %v2778_v41  ;;  %v876_v34 = vadd.f32 1e-06, %v860_v33 }
 0x2b3   : > { %v1096_v58 = vadd.f32 1e-06, %v1080_v56  ;;  %v2200_v56 = vpop.eup %2199 }
 0x2b5   : > { %535 = vadd.xlane.f32.xlu1 %v534_v26  ;;  %532 = vadd.xlane.f32.xlu0 %v531_v3  ;;  %v842_v26 = vmul.f32 0.0625, %v2796_v12  ;;  %v1097_v3 = vadd.f32 1e-06, %v1081_v14  ;;  %v1076_v12 = vmul.f32 %v2880_v21, %v2880_v21 }
 0x2b7   : > { %2203 = vrsqrt.f32 %v1097_v3 }
 0x2b8   : > { %2205 = vrsqrt.f32 %v1096_v58  ;;  %v1300_v58 = vmul.f32 %v2924_v45, %v2924_v45 }
 0x2b9   : > { %538 = vadd.xlane.f32.xlu0 %v537_v38  ;;  %601 = vadd.xlane.f32.xlu1 %v600_v10  ;;  %v2890_v10 = vmul.f32 0.0625, %v2788_v59  ;;  %v1071_v59 = vmul.f32 0.0625, %v2798_v47  ;;  %v1069_v47 = vmul.f32 0.0625, %v2810_v55  ;;  %2207 = vrsqrt.f32 %v876_v34 }
 0x2bb   : > { %v1079_v6 = vmul.f32 %v2890_v10, %v2890_v10 }
 0x2bd   : > { %604 = vadd.xlane.f32.xlu0 %v603_v28  ;;  %607 = vadd.xlane.f32.xlu1 %v606_v13  ;;  %v1086_v28 = vsub.f32 %v1070_v53, %v1078_v37  ;;  %v2899_v13 = vmul.f32 0.0625, %v2792_v63  ;;  %v1087_v31 = vsub.f32 %v1071_v59, %v1079_v6  ;;  %v1085_v53 = vsub.f32 %v1069_v47, %v1077_v52  ;;  %v2202_v37 = vpop.eup %2201 }
 0x2be   : > { %v1089_v6 = vsub.f32 %v2433_v23, %v2852_v25 }
 0x2bf   : > { %v1102_v54 = vadd.f32 1e-06, %v1086_v28  ;;  %v851_v22 = vmul.f32 %v2899_v13, %v2899_v13 }
 0x2c1   : > { %610 = vadd.xlane.f32.xlu0 %v609_v50  ;;  %v858_v50 = vsub.f32 %v842_v26, %v850_v39  ;;  %v859_v49 = vsub.f32 %v843_v24, %v851_v22  ;;  %2209 = vrsqrt.f32 %v1102_v54  ;;  %v1103_v26 = vadd.f32 1e-06, %v1087_v31  ;;  %v2204_v28 = vpop.eup %2203 }
 0x2c2   : > { %v2206_v34 = vpop.eup %2205  ;;  %v1088_v54 = vsub.f32 %v2421_v17, %v2857_v42  ;;  %v2953_v25 = vmul.f32 %v2204_v28, %v1089_v6 }
 0x2c3   : > { %v874_v40 = vadd.f32 1e-06, %v858_v50  ;;  %v2208_v47 = vpop.eup %2207 }
 0x2c4   : > { %v2955_v52 = vmul.f32 %v2206_v34, %v1088_v54 }
 0x2c5   : > { %2211 = vrsqrt.f32 %v874_v40 }
 0x2cd   : > { %v1268_v30 = vpop.xlane.xlu0 %1267 }
 0x2ce   : > { %668 = vrot.lane.b32.xlu1 %v2749_v1, %s2335_s20  ;;  %v1068_v1 = vmul.f32 0.0625, %v2790_v60  ;;  %v853_v60 = vmul.f32 %v2884_v8, %v2884_v8  ;;  %v1290_v14 = vmul.f32 0.0625, %v1268_v30 }
 0x2d0   : > { %v1084_v2 = vsub.f32 %v1068_v1, %v1076_v12  ;;  %v861_v44 = vsub.f32 %v845_v51, %v853_v60  ;;  %v875_v1 = vadd.f32 1e-06, %v859_v49  ;;  %v1101_v51 = vadd.f32 1e-06, %v1085_v53 }
 0x2d1   : > { %v1271_v41 = vpop.xlane.xlu1 %1270  ;;  %v1274_v38 = vpop.xlane.xlu0 %1273  ;;  %v1091_v60 = vsub.f32 %v2425_v20, %v2843_v16  ;;  %v1094_v49 = vsub.f32 %v2451_v27, %v2870_v36 }
 0x2d2   : > { %v1100_v55 = vadd.f32 1e-06, %v1084_v2  ;;  %v877_v7 = vadd.f32 1e-06, %v861_v44  ;;  %v1291_v33 = vmul.f32 0.0625, %v1271_v41  ;;  %v1292_v3 = vmul.f32 0.0625, %v1274_v38 }
 0x2d3   : > { %v1090_v2 = vsub.f32 %v2414_v15, %v2847_v9  ;;  %v2949_v16 = vmul.f32 %v2200_v56, %v1091_v60  ;;  %v1092_v56 = vsub.f32 %v2453_v29, %v2880_v21  ;;  %v869_v21 = vsub.f32 %v2461_v32, %v2884_v8 }
 0x2d4   : > { %2213 = vrsqrt.f32 %v1100_v55  ;;  %v1307_v38 = vsub.f32 %v1291_v33, %v1299_v0  ;;  %v1308_v59 = vsub.f32 %v1292_v3, %v1300_v58  ;;  %v868_v55 = vsub.f32 %v2451_v27, %v2862_v61 }
 0x2d5   : > { %v760_v43 = vpop.xlane.xlu1 %759  ;;  %v1277_v63 = vpop.xlane.xlu0 %1276  ;;  %2215 = vrsqrt.f32 %v877_v7  ;;  %v2951_v40 = vmul.f32 %v2202_v37, %v1090_v2 }
 0x2d6   : > { %v1293_v30 = vmul.f32 0.0625, %v1277_v63  ;;  %2217 = vrsqrt.f32 %v1103_v26  ;;  %v1323_v22 = vadd.f32 1e-06, %v1307_v38  ;;  %v2947_v31 = vmul.f32 0.0625, %v760_v43 }
 0x2d7   : > { %679 = vrot.lane.b32.xlu0 %v2760_v4, %s2335_s20  ;;  %v2927_v4 = vmul.f32 0.0625, %v2834_v19  ;;  %v1306_v19 = vsub.f32 %v1290_v14, %v1298_v57  ;;  %2219 = vrsqrt.f32 %v875_v1  ;;  %v1324_v9 = vadd.f32 1e-06, %v1308_v59  ;;  %v2210_v14 = vpop.eup %2209 }
 0x2d8   : > { %2221 = vrsqrt.f32 %v1101_v51  ;;  %v866_v43 = vsub.f32 %v2453_v29, %v2875_v46  ;;  %v2212_v26 = vpop.eup %2211  ;;  %v846_v61 = vmul.f32 %v2947_v31, %v2947_v31  ;;  %v1095_v46 = vsub.f32 %v2461_v32, %v2890_v10 }
 0x2d9   : > { %v1224_v5 = vpop.xlane.xlu1 %1223  ;;  %v763_v62 = vpop.xlane.xlu0 %762  ;;  %v1301_v12 = vmul.f32 %v2927_v4, %v2927_v4  ;;  %v1322_v24 = vadd.f32 1e-06, %v1306_v19  ;;  %v2977_v0 = vmul.f32 %v2208_v47, %v868_v55  ;;  %v2981_v58 = vmul.f32 %v2210_v14, %v1094_v49 }
 0x2da   : > { %v2965_v7 = vmul.f32 0.0625, %v1224_v5  ;;  %v2969_v57 = vmul.f32 0.0625, %v763_v62  ;;  %v867_v5 = vsub.f32 %v2465_v35, %v2899_v13  ;;  %v890_v34 = vmul.f32 %v2212_v26, %v866_v43 }
 0x2db   : > { %v1309_v50 = vsub.f32 %v1293_v30, %v1301_v12  ;;  %2223 = vrsqrt.f32 %v1322_v24  ;;  %v1093_v30 = vsub.f32 %v2465_v35, %v2905_v11  ;;  %v1315_v47 = vsub.f32 %v2433_v23, %v2921_v18 }
 0x2dc   : > { %2225 = vrsqrt.f32 %v1323_v22  ;;  %v1302_v10 = vmul.f32 %v2965_v7, %v2965_v7  ;;  %v847_v12 = vmul.f32 %v2969_v57, %v2969_v57  ;;  %v1316_v18 = vsub.f32 %v2414_v15, %v2924_v45 }
 0x2dd   : > { %v766_v39 = vpop.xlane.xlu1 %765  ;;  %v1227_v41 = vpop.xlane.xlu0 %1226  ;;  %v1325_v42 = vadd.f32 1e-06, %v1309_v50  ;;  %2227 = vrsqrt.f32 %v1324_v9  ;;  %v863_v45 = vsub.f32 %v2433_v23, %v2969_v57 }
 0x2de   : > { %v2214_v3 = vpop.eup %2213  ;;  %v2985_v19 = vmul.f32 0.0625, %v766_v39  ;;  %v2987_v8 = vmul.f32 0.0625, %v1227_v41  ;;  %v1314_v39 = vsub.f32 %v2421_v17, %v2914_v48 }
 0x2df   : > { %v2216_v37 = vpop.eup %2215  ;;  %2229 = vrsqrt.f32 %v1325_v42  ;;  %v2991_v60 = vmul.f32 %v2214_v3, %v1092_v56 }
 0x2e0   : > { %v2218_v1 = vpop.eup %2217  ;;  %v2993_v50 = vmul.f32 %v2216_v37, %v869_v21  ;;  %v848_v54 = vmul.f32 %v2985_v19, %v2985_v19  ;;  %v1303_v22 = vmul.f32 %v2987_v8, %v2987_v8  ;;  %v862_v37 = vsub.f32 %v2421_v17, %v2947_v31 }
 0x2e1   : > { %v2943_v63 = vpop.xlane.xlu1 %1229  ;;  %v769_v44 = vpop.xlane.xlu0 %768  ;;  %v2997_v41 = vmul.f32 %v2218_v1, %v1095_v46  ;;  %v864_v31 = vsub.f32 %v2414_v15, %v2985_v19 }
 0x2e2   : > { %v2220_v59 = vpop.eup %2219  ;;  %v3005_v9 = vmul.f32 0.0625, %v769_v44  ;;  %v3012_v3 = vmul.f32 0.0625, %v2943_v63 }
 0x2e3   : > { %v2222_v6 = vpop.eup %2221 }
 0x2e4   : > { %v1117_v26 = vmul.f32 %v2222_v6, %v1093_v30  ;;  %v849_v1 = vmul.f32 %v3005_v9, %v3005_v9  ;;  %v865_v6 = vsub.f32 %v2425_v20, %v3005_v9 }
 0x2e5   : > { %v816_v53 = vpop.xlane.xlu1 %815  ;;  %v1233_v33 = vpop.xlane.xlu0 %1232 }
 0x2e6   : > { %v838_v36 = vmul.f32 0.0625, %v816_v53  ;;  %v2224_v56 = vpop.eup %2223  ;;  %v891_v53 = vmul.f32 %v2220_v59, %v867_v5  ;;  %v1318_v5 = vsub.f32 %v2453_v29, %v2965_v7  ;;  %v3020_v30 = vmul.f32 0.0625, %v1233_v33 }
 0x2e7   : > { %v1319_v7 = vsub.f32 %v2465_v35, %v2987_v8 }
 0x2e8   : > { %v854_v62 = vsub.f32 %v838_v36, %v846_v61  ;;  %v1317_v61 = vsub.f32 %v2425_v20, %v2927_v4  ;;  %v2226_v36 = vpop.eup %2225 }
 0x2e9   : > { %v1280_v13 = vpop.xlane.xlu1 %1279  ;;  %v819_v51 = vpop.xlane.xlu0 %818 }
 0x2ea   : > { %v870_v38 = vadd.f32 1e-06, %v854_v62  ;;  %v1294_v28 = vmul.f32 0.0625, %v1280_v13  ;;  %v839_v11 = vmul.f32 0.0625, %v819_v51  ;;  %v2228_v21 = vpop.eup %2227  ;;  %v3026_v51 = vmul.f32 %v2224_v56, %v1314_v39 }
 0x2eb   : > { %v2230_v63 = vpop.eup %2229  ;;  %v1320_v39 = vsub.f32 %v2451_v27, %v3012_v3 }
 0x2ec   : > { %2231 = vrsqrt.f32 %v870_v38  ;;  %v1310_v2 = vsub.f32 %v1294_v28, %v1302_v10  ;;  %v855_v24 = vsub.f32 %v839_v11, %v847_v12  ;;  %v3032_v12 = vmul.f32 %v2226_v36, %v1315_v47 }
 0x2ed   : > { %v822_v55 = vpop.xlane.xlu1 %821  ;;  %v1283_v49 = vpop.xlane.xlu0 %1282  ;;  %v3034_v38 = vmul.f32 %v2228_v21, %v1316_v18  ;;  %v1304_v28 = vmul.f32 %v3012_v3, %v3012_v3  ;;  %v3038_v59 = vmul.f32 %v2230_v63, %v1317_v61 }
 0x2ee   : > { %v1326_v48 = vadd.f32 1e-06, %v1310_v2  ;;  %v871_v42 = vadd.f32 1e-06, %v855_v24  ;;  %v840_v14 = vmul.f32 0.0625, %v822_v55  ;;  %v1295_v43 = vmul.f32 0.0625, %v1283_v49 }
 0x2ef   : > { %v1305_v2 = vmul.f32 %v3020_v30, %v3020_v30 }
 0x2f0   : > { %2233 = vrsqrt.f32 %v1326_v48  ;;  %v856_v44 = vsub.f32 %v840_v14, %v848_v54  ;;  %v1311_v46 = vsub.f32 %v1295_v43, %v1303_v22  ;;  %v1321_v22 = vsub.f32 %v2461_v32, %v3020_v30 }
 0x2f1   : > { %v3022_v4 = vpop.permute.xlu1 %894  ;;  %v825_v62 = vpop.xlane.xlu0 %824  ;;  %2235 = vrsqrt.f32 %v871_v42 }
 0x2f2   : > { %v872_v10 = vadd.f32 1e-06, %v856_v44  ;;  %v841_v13 = vmul.f32 0.0625, %v825_v62  ;;  %v1327_v33 = vadd.f32 1e-06, %v1311_v46  ;;  %v901_v48 = vmul.f32 %v3022_v4, %v890_v34 }
 0x2f3   : > { %v902_v42 = vmul.f32 %v3022_v4, %v891_v53  ;;  %v903_v14 = vmul.f32 %v3022_v4, %v2977_v0  ;;  %v904_v34 = vmul.f32 %v3022_v4, %v2993_v50 }
 0x2f4   : > { %v857_v11 = vsub.f32 %v841_v13, %v849_v1  ;;  %2237 = vrsqrt.f32 %v872_v10 }
 0x2f5   : > { %v1121_v24 = vpop.permute.xlu1 %1120  ;;  %v1286_v47 = vpop.xlane.xlu0 %1285  ;;  %2239 = vrsqrt.f32 %v1327_v33 }
 0x2f6   : > { %v2232_v54 = vpop.eup %2231  ;;  %v873_v55 = vadd.f32 1e-06, %v857_v11  ;;  %v1296_v49 = vmul.f32 0.0625, %v1286_v47  ;;  %v1123_v18 = vmul.f32 %v1121_v24, %v2955_v52  ;;  %v1124_v61 = vmul.f32 %v1121_v24, %v2953_v25 }
 0x2f7   : > { %v886_v43 = vmul.f32 %v2232_v54, %v862_v37  ;;  %v1127_v46 = vmul.f32 %v1121_v24, %v2991_v60  ;;  %v1128_v21 = vmul.f32 %v1121_v24, %v1117_v26  ;;  %v1125_v1 = vmul.f32 %v1121_v24, %v2951_v40 }
 0x2f8   : > { %v1312_v56 = vsub.f32 %v1296_v49, %v1304_v28  ;;  %2241 = vrsqrt.f32 %v873_v55  ;;  %v1126_v10 = vmul.f32 %v1121_v24, %v2949_v16  ;;  %v1129_v50 = vmul.f32 %v1121_v24, %v2981_v58 }
 0x2f9   : > { %v3054_v36 = vpop.permute.xlu1 %1131  ;;  %v1289_v44 = vpop.xlane.xlu0 %1288  ;;  %v897_v13 = vmul.f32 %v3022_v4, %v886_v43  ;;  %v3068_v33 = vmul.f32 %v1121_v24, %v2997_v41 }
 0x2fa   : > { %v2234_v53 = vpop.eup %2233  ;;  %v1328_v62 = vadd.f32 1e-06, %v1312_v56  ;;  %v1297_v63 = vmul.f32 0.0625, %v1289_v44  ;;  %v1134_v0 = vadd.f32 %v3054_v36, %v1123_v18  ;;  %v1135_v37 = vadd.f32 %v3054_v36, %v1124_v61 }
 0x2fb   : > { %v1138_v52 = vadd.f32 %v3054_v36, %v1127_v46  ;;  %v1139_v25 = vadd.f32 %v3054_v36, %v1128_v21  ;;  %v2236_v60 = vpop.eup %2235  ;;  %v3070_v28 = vmul.f32 %v2234_v53, %v1318_v5  ;;  %v1136_v40 = vadd.f32 %v3054_v36, %v1125_v1 }
 0x2fc   : > { %v1313_v26 = vsub.f32 %v1297_v63, %v1305_v2  ;;  %v1150_v54 = vmul.f32 0.70710677, %v1134_v0  ;;  %v1151_v55 = vmul.f32 0.70710677, %v1135_v37  ;;  %2243 = vrsqrt.f32 %v1328_v62 }
 0x2fd   : > { %v3072_v11 = vpop.permute.xlu1 %1346  ;;  %v3074_v47 = vpop.permute.xlu0 %905  ;;  %v1154_v2 = vmul.f32 0.70710677, %v1138_v52  ;;  %v887_v58 = vmul.f32 %v2236_v60, %v863_v45  ;;  %v1155_v41 = vmul.f32 0.70710677, %v1139_v25  ;;  %v1142_v43 = vmul.f32 0.5, %v1134_v0 }
 0x2fe   : > { %v1329_v16 = vadd.f32 1e-06, %v1313_v26  ;;  %v912_v49 = vadd.f32 %v3074_v47, %v901_v48  ;;  %2245 = verf.f32 %v1150_v54  ;;  %v913_v5 = vadd.f32 %v3074_v47, %v902_v42  ;;  %v2238_v24 = vpop.eup %2237 }
 0x2ff   : > { %v3082_v56 = vmul.f32 0.5, %v1135_v37  ;;  %v2240_v61 = vpop.eup %2239  ;;  %v3086_v46 = vmul.f32 0.5, %v1138_v52  ;;  %v1349_v57 = vmul.f32 %v3072_v11, %v3026_v51  ;;  %v1350_v45 = vmul.f32 %v3072_v11, %v3032_v12 }
 0x300   : > { %2247 = vrsqrt.f32 %v1329_v16  ;;  %v928_v18 = vmul.f32 0.70710677, %v912_v49  ;;  %v929_v48 = vmul.f32 0.70710677, %v913_v5  ;;  %v914_v42 = vadd.f32 %v3074_v47, %v903_v14 }
 0x301   : > { %v3084_v44 = vpop.permute.xlu1 %1357  ;;  %2249 = verf.f32 %v1151_v55  ;;  %v915_v21 = vadd.f32 %v3074_v47, %v904_v34  ;;  %v888_v62 = vmul.f32 %v2238_v24, %v864_v31  ;;  %v1147_v63 = vmul.f32 0.5, %v1139_v25 }
 0x302   : > { %2251 = verf.f32 %v1154_v2  ;;  %v2242_v53 = vpop.eup %2241  ;;  %v1360_v0 = vadd.f32 %v3084_v44, %v1349_v57  ;;  %v3101_v51 = vmul.f32 %v2240_v61, %v1319_v7  ;;  %v1361_v12 = vadd.f32 %v3084_v44, %v1350_v45 }
 0x303   : > { %2253 = verf.f32 %v1155_v41  ;;  %v1137_v14 = vadd.f32 %v3054_v36, %v1126_v10  ;;  %v920_v34 = vmul.f32 0.5, %v912_v49  ;;  %v930_v52 = vmul.f32 0.70710677, %v914_v42 }
 0x304   : > { %2255 = verf.f32 %v928_v18  ;;  %v1376_v37 = vmul.f32 0.70710677, %v1360_v0  ;;  %v889_v19 = vmul.f32 %v2242_v53, %v865_v6  ;;  %v921_v31 = vmul.f32 0.5, %v913_v5 }
 0x305   : > { %2257 = verf.f32 %v929_v48  ;;  %v1377_v25 = vmul.f32 0.70710677, %v1361_v12  ;;  %v931_v1 = vmul.f32 0.70710677, %v915_v21  ;;  %v3108_v8 = vmul.f32 0.5, %v914_v42 }
 0x306   : > { %2259 = verf.f32 %v1376_v37  ;;  %v3110_v7 = vmul.f32 0.5, %v915_v21  ;;  %v1152_v60 = vmul.f32 0.70710677, %v1136_v40  ;;  %v2244_v26 = vpop.eup %2243  ;;  %v1153_v10 = vmul.f32 0.70710677, %v1137_v14 }
 0x307   : > { %2261 = verf.f32 %v1377_v25  ;;  %v898_v54 = vmul.f32 %v3022_v4, %v887_v58  ;;  %v908_v55 = vadd.f32 %v3074_v47, %v897_v13  ;;  %v1368_v2 = vmul.f32 0.5, %v1360_v0 }
 0x308   : > { %v2246_v16 = vpop.eup %2245  ;;  %v1369_v9 = vmul.f32 0.5, %v1361_v12  ;;  %2263 = verf.f32 %v930_v52  ;;  %v3115_v6 = vadd.f32 %v3054_v36, %v1129_v50  ;;  %v3122_v24 = vadd.f32 %v3054_v36, %v3068_v33 }
 0x309   : > { %v1166_v41 = vadd.f32 1.0, %v2246_v16  ;;  %2265 = verf.f32 %v931_v1  ;;  %v3118_v5 = vadd.f32 %v3074_v47, %v898_v54  ;;  %v3127_v13 = vmul.f32 %v2244_v26, %v1320_v39 }
 0x30a   : > { %v2248_v49 = vpop.eup %2247  ;;  %v3129_v18 = vmul.f32 0.5, %v1136_v40  ;;  %2267 = verf.f32 %v1152_v60  ;;  %v924_v50 = vmul.f32 0.70710677, %v908_v55  ;;  %v3131_v45 = vmul.f32 0.5, %v1137_v14 }
 0x30b   : > { %v2250_v58 = vpop.eup %2249  ;;  %v1174_v57 = vmul.f32 %v1166_v41, %v1142_v43  ;;  %2269 = verf.f32 %v1153_v10  ;;  %v925_v36 = vmul.f32 0.70710677, %v3118_v5  ;;  %v899_v33 = vmul.f32 %v3022_v4, %v888_v62 }
 0x30c   : > { %v2252_v61 = vpop.eup %2251  ;;  %v1167_v48 = vadd.f32 1.0, %v2250_v58  ;;  %2271 = verf.f32 %v924_v50  ;;  %v1156_v53 = vmul.f32 0.70710677, %v3115_v6  ;;  %v1157_v0 = vmul.f32 0.70710677, %v3122_v24 }
 0x30d   : > { %v2254_v42 = vpop.eup %2253  ;;  %v1170_v21 = vadd.f32 1.0, %v2252_v61  ;;  %2273 = verf.f32 %v925_v36  ;;  %v900_v37 = vmul.f32 %v3022_v4, %v889_v19  ;;  %v916_v19 = vmul.f32 0.5, %v908_v55 }
 0x30e   : > { %v2256_v3 = vpop.eup %2255  ;;  %v1175_v39 = vmul.f32 %v1167_v48, %v3082_v56  ;;  %v1171_v40 = vadd.f32 1.0, %v2254_v42  ;;  %2275 = verf.f32 %v1156_v53  ;;  %v3141_v56 = vadd.f32 %v3074_v47, %v899_v33 }
 0x30f   : > { %v2258_v12 = vpop.eup %2257  ;;  %v1178_v43 = vmul.f32 %v1170_v21, %v3086_v46  ;;  %v944_v14 = vadd.f32 1.0, %v2256_v3  ;;  %2277 = verf.f32 %v1157_v0  ;;  %v3144_v26 = vadd.f32 %v3074_v47, %v900_v37 }
 0x310   : > { %v1182_v52 = vpack.c.bf16 %v1175_v39, %v1174_v57  ;;  %v1179_v25 = vmul.f32 %v1171_v40, %v1147_v63  ;;  %v945_v1 = vadd.f32 1.0, %v2258_v12  ;;  %v2260_v62 = vpop.eup %2259  ;;  %v1345_v46 = vmul.f32 %v2248_v49, %v1321_v22 }
 0x311   : > { %v952_v60 = vmul.f32 %v944_v14, %v920_v34  ;;  %v2262_v10 = vpop.eup %2261  ;;  %v1392_v63 = vadd.f32 1.0, %v2260_v62  ;;  %v926_v41 = vmul.f32 0.70710677, %v3141_v56  ;;  %v1351_v58 = vmul.f32 %v3072_v11, %v3034_v38 }
 0x312   : > { %1428 = vrot.lane.b32.xlu0 %v1182_v52, %s2340_s28  ;;  %v953_v4 = vmul.f32 %v945_v1, %v921_v31  ;;  %v2264_v54 = vpop.eup %2263  ;;  %v1184_v16 = vpack.c.bf16 %v1179_v25, %v1178_v43  ;;  %v1393_v34 = vadd.f32 1.0, %v2262_v10  ;;  %v927_v30 = vmul.f32 0.70710677, %v3144_v26 }
 0x313   : > { %v2266_v47 = vpop.eup %2265  ;;  %v1400_v61 = vmul.f32 %v1392_v63, %v1368_v2  ;;  %v946_v48 = vadd.f32 1.0, %v2264_v54  ;;  %2279 = verf.f32 %v926_v41  ;;  %v1352_v31 = vmul.f32 %v3072_v11, %v3038_v59 }
 0x314   : > { %v958_v50 = vpack.c.bf16 %v953_v4, %v952_v60  ;;  %v2268_v22 = vpop.eup %2267  ;;  %v1401_v49 = vmul.f32 %v1393_v34, %v1369_v9  ;;  %v947_v57 = vadd.f32 1.0, %v2266_v47  ;;  %2281 = verf.f32 %v927_v30 }
 0x315   : > { %v2270_v55 = vpop.eup %2269  ;;  %v954_v38 = vmul.f32 %v946_v48, %v3108_v8  ;;  %v1168_v42 = vadd.f32 1.0, %v2268_v22  ;;  %v1362_v2 = vadd.f32 %v3084_v44, %v1351_v58  ;;  %v1363_v3 = vadd.f32 %v3084_v44, %v1352_v31 }
 0x316   : > { %1432 = vrot.lane.b32.xlu0 %v1184_v16, %s2340_s28  ;;  %1420 = vrot.lane.b32.xlu1 %v958_v50, %s2341_s11  ;;  %v2272_v21 = vpop.eup %2271  ;;  %v1408_v36 = vpack.c.bf16 %v1401_v49, %v1400_v61  ;;  %v955_v9 = vmul.f32 %v947_v57, %v3110_v7  ;;  %v1169_v33 = vadd.f32 1.0, %v2270_v55  ;;  %v917_v59 = vmul.f32 0.5, %v3118_v5 }
 0x317   : > { %v940_v39 = vadd.f32 1.0, %v2272_v21  ;;  %v1148_v40 = vmul.f32 0.5, %v3115_v6  ;;  %v1378_v53 = vmul.f32 0.70710677, %v1362_v2  ;;  %v2274_v0 = vpop.eup %2273  ;;  %v1176_v8 = vmul.f32 %v1168_v42, %v3129_v18 }
 0x318   : > { %v959_v12 = vpack.c.bf16 %v955_v9, %v954_v38  ;;  %v1177_v43 = vmul.f32 %v1169_v33, %v3131_v45  ;;  %v1379_v14 = vmul.f32 0.70710677, %v1363_v3  ;;  %v2276_v37 = vpop.eup %2275  ;;  %v941_v7 = vadd.f32 1.0, %v2274_v0  ;;  %v2198_v33 = vld [vmem:[%s3381_s5] sm:$0xff]  }
 0x319   : > { %v948_v52 = vmul.f32 %v940_v39, %v916_v19  ;;  %2283 = verf.f32 %v1378_v53  ;;  %v1353_v5 = vmul.f32 %v3072_v11, %v3070_v28  ;;  %v2278_v25 = vpop.eup %2277  ;;  %v1149_v6 = vmul.f32 0.5, %v3122_v24  ;;  %2146 = vmatprep.subr.bf16.mxu0 %v2198_v33  ;;  %2180 = vmatprep.subr.bf16.mxu1 %v2198_v33 }
 0x31a   : > { %1440 = vrot.lane.b32.xlu0 %v1408_v36, %s2339_s26  ;;  %1422 = vrot.lane.b32.xlu1 %v959_v12, %s2341_s11  ;;  %v1172_v1 = vadd.f32 1.0, %v2276_v37  ;;  %2285 = verf.f32 %v1379_v14  ;;  %v1354_v18 = vmul.f32 %v3072_v11, %v3101_v51  ;;  %v949_v45 = vmul.f32 %v941_v7, %v917_v59 }
 0x31b   : > { %v1173_v62 = vadd.f32 1.0, %v2278_v25  ;;  %v1364_v60 = vadd.f32 %v3084_v44, %v1353_v5  ;;  %v1355_v10 = vmul.f32 %v3072_v11, %v3127_v13  ;;  %v1183_v4 = vpack.c.bf16 %v1177_v43, %v1176_v8  ;;  %2147 = vmatpush3.bf16.msra.mxu0 %v2198_v33  ;;  %2181 = vmatpush3.bf16.msra.mxu1 %v2198_v33 }
 0x31c   : > { %v1180_v63 = vmul.f32 %v1172_v1, %v1148_v40  ;;  %v1365_v28 = vadd.f32 %v3084_v44, %v1354_v18  ;;  %v1356_v19 = vmul.f32 %v3072_v11, %v1345_v46  ;;  %v956_v54 = vpack.c.bf16 %v949_v45, %v948_v52 }
 0x31d   : > { %v1181_v24 = vmul.f32 %v1173_v62, %v1149_v6  ;;  %v1380_v16 = vmul.f32 0.70710677, %v1364_v60  ;;  %v2280_v34 = vpop.eup %2279  ;;  %v1366_v41 = vadd.f32 %v3084_v44, %v1355_v10  ;;  %v918_v13 = vmul.f32 0.5, %v3141_v56 }
 0x31e   : > { %1430 = vrot.lane.b32.xlu1 %v1183_v4, %s2340_s28  ;;  %v1381_v51 = vmul.f32 0.70710677, %v1365_v28  ;;  %v1367_v58 = vadd.f32 %v3084_v44, %v1356_v19  ;;  %v2282_v47 = vpop.eup %2281  ;;  %1416 = vrot.lane.b32.xlu0 %v956_v54, %s2341_s11  ;;  %v942_v50 = vadd.f32 1.0, %v2280_v34  ;;  %v919_v11 = vmul.f32 0.5, %v3144_v26 }
 0x31f   : > { %2287 = verf.f32 %v1380_v16  ;;  %v1185_v61 = vpack.c.bf16 %v1181_v24, %v1180_v63  ;;  %v943_v46 = vadd.f32 1.0, %v2282_v47  ;;  %v1382_v48 = vmul.f32 0.70710677, %v1366_v41 }
 0x320   : > { %2289 = verf.f32 %v1381_v51  ;;  %v1383_v30 = vmul.f32 0.70710677, %v1367_v58  ;;  %v950_v22 = vmul.f32 %v942_v50, %v918_v13  ;;  %v1370_v55 = vmul.f32 0.5, %v1362_v2 }
 0x321   : > { %v951_v49 = vmul.f32 %v943_v46, %v919_v11  ;;  %2291 = verf.f32 %v1382_v48  ;;  %v1371_v56 = vmul.f32 0.5, %v1363_v3  ;;  %v1372_v39 = vmul.f32 0.5, %v1364_v60 }
 0x322   : > { %1434 = vrot.lane.b32.xlu1 %v1185_v61, %s2340_s28  ;;  %2293 = verf.f32 %v1383_v30  ;;  %v1373_v2 = vmul.f32 0.5, %v1365_v28  ;;  %v1374_v7 = vmul.f32 0.5, %v1366_v41  ;;  %v1375_v52 = vmul.f32 0.5, %v1367_v58 }
 0x323   : > { %v2284_v57 = vpop.eup %2283  ;;  %v957_v31 = vpack.c.bf16 %v951_v49, %v950_v22 }
 0x324   : > { %v2286_v44 = vpop.eup %2285  ;;  %v1394_v38 = vadd.f32 1.0, %v2284_v57 }
 0x325   : > { %v1395_v42 = vadd.f32 1.0, %v2286_v44  ;;  %1418 = vrot.lane.b32.xlu0 %v957_v31, %s2341_s11 }
 0x326   : > { %v1402_v26 = vmul.f32 %v1394_v38, %v1370_v55 }
 0x327   : > { %v1403_v21 = vmul.f32 %v1395_v42, %v1371_v56 }
 0x329   : > { %v2288_v36 = vpop.eup %2287  ;;  %v1409_v9 = vpack.c.bf16 %v1403_v21, %v1402_v26 }
 0x32a   : > { %v2290_v59 = vpop.eup %2289  ;;  %v1396_v40 = vadd.f32 1.0, %v2288_v36 }
 0x32b   : > { %1442 = vrot.lane.b32.xlu1 %v1409_v9, %s2339_s26  ;;  %v1397_v53 = vadd.f32 1.0, %v2290_v59  ;;  %v2292_v0 = vpop.eup %2291 }
 0x32c   : > { %v1404_v3 = vmul.f32 %v1396_v40, %v1372_v39  ;;  %v2294_v43 = vpop.eup %2293  ;;  %v1398_v14 = vadd.f32 1.0, %v2292_v0 }
 0x32d   : > { %v1405_v12 = vmul.f32 %v1397_v53, %v1373_v2  ;;  %v1399_v5 = vadd.f32 1.0, %v2294_v43 }
 0x32e   : > { %v518_v8 = vpop.xlane.xlu0 %517  ;;  %v1406_v25 = vmul.f32 %v1398_v14, %v1374_v7 }
 0x32f   : > { %v1410_v37 = vpack.c.bf16 %v1405_v12, %v1404_v3  ;;  %v1407_v6 = vmul.f32 %v1399_v5, %v1375_v52  ;;  %v540_v34 = vmul.f32 0.0625, %v518_v8 }
 0x331   : > { %1444 = vrot.lane.b32.xlu1 %v1410_v37, %s2339_s26  ;;  %v1411_v18 = vpack.c.bf16 %v1407_v6, %v1406_v25  ;;  %v620_v11 = vmul.f32 %v540_v34, %v540_v34 }
 0x332   : > { %v524_v1 = vpop.xlane.xlu0 %523  ;;  %v521_v62 = vpop.xlane.xlu1 %520 }
 0x333   : > { %v541_v16 = vmul.f32 0.0625, %v521_v62  ;;  %v3192_v58 = vmul.f32 0.0625, %v524_v1 }
 0x335   : > { %1446 = vrot.lane.b32.xlu1 %v1411_v18, %s2339_s26  ;;  %v621_v50 = vmul.f32 %v541_v16, %v541_v16  ;;  %v622_v57 = vmul.f32 %v3192_v58, %v3192_v58 }
 0x336   : > { %v527_v45 = vpop.xlane.xlu0 %526  ;;  %v590_v10 = vpop.xlane.xlu1 %589 }
 0x337   : > { %v543_v51 = vmul.f32 0.0625, %v527_v45  ;;  %v612_v47 = vmul.f32 0.0625, %v590_v10  ;;  %v637_v45 = vsub.f32 %v2433_v23, %v541_v16 }
 0x339   : > { %v623_v30 = vmul.f32 %v543_v51, %v543_v51  ;;  %v628_v44 = vsub.f32 %v612_v47, %v620_v11 }
 0x33a   : > { %v593_v60 = vpop.xlane.xlu0 %592  ;;  %v596_v63 = vpop.xlane.xlu1 %595 }
 0x33b   : > { %v613_v41 = vmul.f32 0.0625, %v593_v60  ;;  %v614_v46 = vmul.f32 0.0625, %v596_v63  ;;  %v644_v33 = vadd.f32 1e-06, %v628_v44  ;;  %v636_v60 = vsub.f32 %v2421_v17, %v540_v34 }
 0x33d   : > { %v629_v22 = vsub.f32 %v613_v41, %v621_v50  ;;  %v630_v56 = vsub.f32 %v614_v46, %v622_v57 }
 0x33e   : > { %v599_v4 = vpop.xlane.xlu0 %598  ;;  %v530_v19 = vpop.xlane.xlu1 %529 }
 0x33f   : > { %v615_v61 = vmul.f32 0.0625, %v599_v4  ;;  %v544_v31 = vmul.f32 0.0625, %v530_v19  ;;  %v645_v26 = vadd.f32 1e-06, %v629_v22  ;;  %v646_v0 = vadd.f32 1e-06, %v630_v56 }
 0x340   : > { %v639_v4 = vsub.f32 %v2425_v20, %v543_v51  ;;  %v638_v19 = vsub.f32 %v2414_v15, %v3192_v58 }
 0x341   : > { %v631_v55 = vsub.f32 %v615_v61, %v623_v30  ;;  %v624_v59 = vmul.f32 %v544_v31, %v544_v31  ;;  %2295 = vrsqrt.f32 %v645_v26  ;;  %v640_v34 = vsub.f32 %v2453_v29, %v544_v31 }
 0x342   : > { %v533_v28 = vpop.xlane.xlu0 %532  ;;  %v536_v24 = vpop.xlane.xlu1 %535  ;;  %2297 = vrsqrt.f32 %v644_v33 }
 0x343   : > { %v545_v49 = vmul.f32 0.0625, %v533_v28  ;;  %v647_v40 = vadd.f32 1e-06, %v631_v55  ;;  %v546_v2 = vmul.f32 0.0625, %v536_v24 }
 0x345   : > { %v625_v21 = vmul.f32 %v545_v49, %v545_v49  ;;  %2299 = vrsqrt.f32 %v647_v40  ;;  %v626_v14 = vmul.f32 %v546_v2, %v546_v2  ;;  %v641_v23 = vsub.f32 %v2465_v35, %v545_v49 }
 0x346   : > { %v539_v54 = vpop.xlane.xlu0 %538  ;;  %v602_v48 = vpop.xlane.xlu1 %601  ;;  %2301 = vrsqrt.f32 %v646_v0  ;;  %v642_v22 = vsub.f32 %v2451_v27, %v546_v2 }
 0x347   : > { %v616_v36 = vmul.f32 0.0625, %v602_v48  ;;  %v547_v9 = vmul.f32 0.0625, %v539_v54 }
 0x349   : > { %v632_v12 = vsub.f32 %v616_v36, %v624_v59  ;;  %v627_v8 = vmul.f32 %v547_v9, %v547_v9  ;;  %v643_v15 = vsub.f32 %v2461_v32, %v547_v9 }
 0x34a   : > { %v605_v13 = vpop.xlane.xlu0 %604  ;;  %v608_v39 = vpop.xlane.xlu1 %607 }
 0x34b   : > { %v617_v38 = vmul.f32 0.0625, %v605_v13  ;;  %v618_v43 = vmul.f32 0.0625, %v608_v39  ;;  %v648_v52 = vadd.f32 1e-06, %v632_v12  ;;  %v2296_v1 = vpop.eup %2295 }
 0x34c   : > { %v2298_v18 = vpop.eup %2297  ;;  %v661_v63 = vmul.f32 %v2296_v1, %v637_v45 }
 0x34d   : > { %v633_v53 = vsub.f32 %v617_v38, %v625_v21  ;;  %v634_v5 = vsub.f32 %v618_v43, %v626_v14  ;;  %v660_v54 = vmul.f32 %v2298_v18, %v636_v60 }
 0x34e   : > { %v611_v42 = vpop.xlane.xlu0 %610  ;;  %v669_v28 = vpop.permute.xlu1 %668 }
 0x34f   : > { %v619_v3 = vmul.f32 0.0625, %v611_v42  ;;  %v649_v37 = vadd.f32 1e-06, %v633_v53  ;;  %v650_v6 = vadd.f32 1e-06, %v634_v5  ;;  %v2300_v62 = vpop.eup %2299  ;;  %v671_v50 = vmul.f32 %v669_v28, %v660_v54 }
 0x350   : > { %v2302_v10 = vpop.eup %2301  ;;  %v663_v24 = vmul.f32 %v2300_v62, %v639_v4  ;;  %v672_v16 = vmul.f32 %v669_v28, %v661_v63 }
 0x351   : > { %v635_v7 = vsub.f32 %v619_v3, %v627_v8  ;;  %2303 = vrsqrt.f32 %v649_v37  ;;  %v662_v13 = vmul.f32 %v2302_v10, %v638_v19 }
 0x352   : > { %2305 = vrsqrt.f32 %v648_v52  ;;  %v680_v41 = vpop.permute.xlu0 %679  ;;  %v674_v51 = vmul.f32 %v669_v28, %v663_v24 }
 0x353   : > { %v651_v25 = vadd.f32 1e-06, %v635_v7  ;;  %v682_v17 = vadd.f32 %v680_v41, %v671_v50  ;;  %v683_v20 = vadd.f32 %v680_v41, %v672_v16  ;;  %v673_v48 = vmul.f32 %v669_v28, %v662_v13 }
 0x354   : > { %v685_v49 = vadd.f32 %v680_v41, %v674_v51 }
 0x355   : > { %2307 = vrsqrt.f32 %v651_v25  ;;  %v698_v57 = vmul.f32 0.70710677, %v682_v17  ;;  %v684_v44 = vadd.f32 %v680_v41, %v673_v48  ;;  %v699_v35 = vmul.f32 0.70710677, %v683_v20 }
 0x356   : > { %2309 = vrsqrt.f32 %v650_v6  ;;  %v701_v31 = vmul.f32 0.70710677, %v685_v49  ;;  %v690_v14 = vmul.f32 0.5, %v682_v17  ;;  %v691_v37 = vmul.f32 0.5, %v683_v20 }
 0x357   : > { %2311 = verf.f32 %v698_v57  ;;  %v700_v29 = vmul.f32 0.70710677, %v684_v44  ;;  %v692_v45 = vmul.f32 0.5, %v684_v44  ;;  %v693_v62 = vmul.f32 0.5, %v685_v49 }
 0x358   : > { %2313 = verf.f32 %v699_v35 }
 0x359   : > { %2315 = verf.f32 %v700_v29 }
 0x35a   : > { %2317 = verf.f32 %v701_v31 }
 0x35b   : > { %v2304_v47 = vpop.eup %2303 }
 0x35c   : > { %v2306_v61 = vpop.eup %2305  ;;  %v665_v11 = vmul.f32 %v2304_v47, %v641_v23 }
 0x35d   : > { %v664_v30 = vmul.f32 %v2306_v61, %v640_v34 }
 0x35e   : > { %v676_v38 = vmul.f32 %v669_v28, %v665_v11 }
 0x35f   : > { %v2308_v46 = vpop.eup %2307  ;;  %v675_v42 = vmul.f32 %v669_v28, %v664_v30 }
 0x360   : > { %v2310_v58 = vpop.eup %2309  ;;  %v667_v55 = vmul.f32 %v2308_v46, %v643_v15  ;;  %v687_v26 = vadd.f32 %v680_v41, %v676_v38 }
 0x361   : > { %v666_v56 = vmul.f32 %v2310_v58, %v642_v22  ;;  %v686_v36 = vadd.f32 %v680_v41, %v675_v42  ;;  %v2312_v40 = vpop.eup %2311 }
 0x362   : > { %v678_v21 = vmul.f32 %v669_v28, %v667_v55  ;;  %v703_v32 = vmul.f32 0.70710677, %v687_v26  ;;  %v2314_v2 = vpop.eup %2313  ;;  %v714_v0 = vadd.f32 1.0, %v2312_v40  ;;  %v695_v24 = vmul.f32 0.5, %v687_v26 }
 0x363   : > { %v677_v33 = vmul.f32 %v669_v28, %v666_v56  ;;  %v702_v9 = vmul.f32 0.70710677, %v686_v36  ;;  %v2316_v3 = vpop.eup %2315  ;;  %v715_v12 = vadd.f32 1.0, %v2314_v2  ;;  %v694_v23 = vmul.f32 0.5, %v686_v36 }
 0x364   : > { %v689_v27 = vadd.f32 %v680_v41, %v678_v21  ;;  %2319 = verf.f32 %v703_v32  ;;  %v2318_v8 = vpop.eup %2317  ;;  %v722_v7 = vmul.f32 %v714_v0, %v690_v14  ;;  %v716_v5 = vadd.f32 1.0, %v2316_v3 }
 0x365   : > { %v688_v59 = vadd.f32 %v680_v41, %v677_v33  ;;  %2321 = verf.f32 %v702_v9  ;;  %v723_v52 = vmul.f32 %v715_v12, %v691_v37  ;;  %v717_v25 = vadd.f32 1.0, %v2318_v8  ;;  %v3248_v12 = vld [vmem:[%s3382_s6] ss:$0 sm:$0xff] }
 0x366   : > { %v705_v39 = vmul.f32 0.70710677, %v689_v27  ;;  %v724_v4 = vmul.f32 %v716_v5, %v692_v45  ;;  %v697_v34 = vmul.f32 0.5, %v689_v27 }
 0x367   : > { %v704_v53 = vmul.f32 0.70710677, %v688_v59  ;;  %v730_v10 = vpack.c.bf16 %v723_v52, %v722_v7  ;;  %v725_v63 = vmul.f32 %v717_v25, %v693_v62  ;;  %v696_v51 = vmul.f32 0.5, %v688_v59 }
 0x368   : > { %2323 = verf.f32 %v705_v39 }
 0x369   : > { %2325 = verf.f32 %v704_v53  ;;  %v731_v50 = vpack.c.bf16 %v725_v63, %v724_v4 }
 0x36e   : > { %v2320_v6 = vpop.eup %2319 }
 0x36f   : > { %v2322_v60 = vpop.eup %2321  ;;  %v719_v28 = vadd.f32 1.0, %v2320_v6 }
 0x370   : > { %v718_v41 = vadd.f32 1.0, %v2322_v60 }
 0x371   : > { %v727_v16 = vmul.f32 %v719_v28, %v695_v24 }
 0x372   : > { %v2324_v19 = vpop.eup %2323  ;;  %v726_v17 = vmul.f32 %v718_v41, %v694_v23 }
 0x373   : > { %v2326_v47 = vpop.eup %2325  ;;  %v721_v61 = vadd.f32 1.0, %v2324_v19 }
 0x374   : > { %v720_v11 = vadd.f32 1.0, %v2326_v47  ;;  %v732_v20 = vpack.c.bf16 %v727_v16, %v726_v17 }
 0x375   : > { %v729_v46 = vmul.f32 %v721_v61, %v697_v34 }
 0x376   : > { %v728_v15 = vmul.f32 %v720_v11, %v696_v51 }
 0x378   : > { %v733_v58 = vpack.c.bf16 %v729_v46, %v728_v15 }
 0x384   : > { %v1429_v1 = vpop.permute.xlu0 %1428 }
 0x388   : > { %v1421_v43 = vpop.permute.xlu1 %1420  ;;  %v1433_v13 = vpop.permute.xlu0 %1432 }
 0x389   : > { %1473 = vrot.lane.b32.xlu0 %v1421_v43, %s2335_s20 }
 0x38c   : > { %v1423_v18 = vpop.permute.xlu1 %1422  ;;  %v1441_v48 = vpop.permute.xlu0 %1440 }
 0x38d   : > { %1477 = vrot.lane.b32.xlu0 %v1429_v1, %s2335_s20  ;;  %1475 = vrot.lane.b32.xlu1 %v1423_v18, %s2335_s20 }
 0x390   : > { %v1431_v54 = vpop.permute.xlu1 %1430  ;;  %v1417_v22 = vpop.permute.xlu0 %1416 }
 0x391   : > { %1461 = vrot.lane.b32.xlu0 %v730_v10, %s2335_s20  ;;  %1479 = vrot.lane.b32.xlu1 %v1431_v54, %s2335_s20 }
 0x394   : > { %v1435_v30 = vpop.permute.xlu1 %1434 }
 0x395   : > { %1463 = vrot.lane.b32.xlu0 %v731_v50, %s2335_s20  ;;  %1481 = vrot.lane.b32.xlu1 %v1433_v13, %s2335_s20 }
 0x397   : > { %v1419_v44 = vpop.permute.xlu0 %1418 }
 0x399   : > { %1465 = vrot.lane.b32.xlu0 %v732_v20, %s2335_s20  ;;  %1483 = vrot.lane.b32.xlu1 %v1435_v30, %s2335_s20 }
 0x39d   : > { %1467 = vrot.lane.b32.xlu0 %v733_v58, %s2335_s20  ;;  %v1443_v57 = vpop.permute.xlu1 %1442  ;;  %1485 = vrot.lane.b32.xlu1 %v1441_v48, %s2335_s20 }
 0x3a1   : > { %1469 = vrot.lane.b32.xlu0 %v1417_v22, %s2335_s20  ;;  %1487 = vrot.lane.b32.xlu1 %v1443_v57, %s2335_s20 }
 0x3a3   : > { %v1445_v55 = vpop.permute.xlu1 %1444 }
 0x3a5   : > { %1471 = vrot.lane.b32.xlu0 %v1419_v44, %s2335_s20  ;;  %1489 = vrot.lane.b32.xlu1 %v1445_v55, %s2335_s20 }
 0x3a7   : > { %v1447_v35 = vpop.permute.xlu1 %1446 }
 0x3a9   : > { %1491 = vrot.lane.b32.xlu1 %v1447_v35, %s2335_s20 }
 0x3fb   : > { %v1474_v49 = vpop.permute.xlu0 %1473 }
 0x3fc   : > { %2160 = vmatprep.mubr.msk.bf16.mxu1 %vm353_vm0, %v1474_v49 }
 0x3ff   : > { %v1478_v38 = vpop.permute.xlu0 %1477  ;;  %v1476_v56 = vpop.permute.xlu1 %1475 }
 0x400   : > { %2161 = vmatmul.mubr.msk.bf16.vlgmr.msra.gmra.mrb[0].mxu1 %vm353_vm0, %v1476_v56 }
 0x401   : > { %2164 = vmatprep.mubr.msk.bf16.mxu1 %vm353_vm0, %v1478_v38 }
 0x403   : > { %v1462_v42 = vpop.permute.xlu0 %1461  ;;  %v1480_v29 = vpop.permute.xlu1 %1479 }
 0x404   : > { %2148 = vmatprep.mubr.msk.bf16.mxu0 %vm353_vm0, %v1462_v42 }
 0x407   : > { %v1464_v31 = vpop.permute.xlu0 %1463  ;;  %v1482_v26 = vpop.permute.xlu1 %1481 }
 0x408   : > { %2149 = vmatmul.mubr.msk.bf16.vlgmr.msra.gmra.mrb[8].mxu0 %vm353_vm0, %v1464_v31  ;;  %2165 = vmatmul.mubr.msk.bf16.gmra.mrb[4].mxu1 %vm353_vm0, %v1480_v29 }
 0x409   : > { %2168 = vmatprep.mubr.msk.bf16.mxu1 %vm353_vm0, %v1482_v26 }
 0x40b   : > { %v1466_v21 = vpop.permute.xlu0 %1465  ;;  %v1484_v36 = vpop.permute.xlu1 %1483 }
 0x40c   : > { %2152 = vmatprep.mubr.msk.bf16.mxu0 %vm353_vm0, %v1466_v21 }
 0x40f   : > { %v1468_v33 = vpop.permute.xlu0 %1467  ;;  %v1486_v32 = vpop.permute.xlu1 %1485 }
 0x410   : > { %2153 = vmatmul.mubr.msk.bf16.gmra.mrb[12].mxu0 %vm353_vm0, %v1468_v33  ;;  %2169 = vmatmul.mubr.msk.bf16.gmra.mrb[8].mxu1 %vm353_vm0, %v1484_v36 }
 0x411   : > { %2172 = vmatprep.mubr.msk.bf16.mxu1 %vm353_vm0, %v1486_v32 }
 0x413   : > { %v1470_v27 = vpop.permute.xlu0 %1469  ;;  %v1488_v9 = vpop.permute.xlu1 %1487 }
 0x414   : > { %2156 = vmatprep.mubr.msk.bf16.mxu0 %vm353_vm0, %v1470_v27 }
 0x417   : > { %v1472_v59 = vpop.permute.xlu0 %1471  ;;  %v1490_v39 = vpop.permute.xlu1 %1489 }
 0x418   : > { %2157 = vmatmul.mubr.msk.bf16.gmra.mrb[16].mxu0 %vm353_vm0, %v1472_v59  ;;  %2173 = vmatmul.mubr.msk.bf16.gmra.mrb[12].mxu1 %vm353_vm0, %v1488_v9 }
 0x419   : > { %2176 = vmatprep.mubr.msk.bf16.mxu1 %vm353_vm0, %v1490_v39 }
 0x41b   : > { %v1492_v40 = vpop.permute.xlu1 %1491 }
 0x420   : > { %2177 = vmatmul.mubr.msk.bf16.gmra.mrb[16].mxu1 %vm353_vm0, %v1492_v40 }
 0x4d3   : > { %v3237_v2 = vpop.f32.mrb[0].mxu1 }
 0x4d4   : > { %v3239_v53 = vpop.f32.mrb[1].mxu1 }
 0x4d5   : > { %v3241_v3 = vpop.f32.mrb[2].mxu1 }
 0x4d6   : > { %v3243_v0 = vpop.f32.mrb[3].mxu1 }
 0x4db   : > { %v2150_v8 = vpop.f32.mrb[8].mxu0  ;;  %v2166_v14 = vpop.f32.mrb[4].mxu1 }
 0x4dc   : > { %v1590_v43 = vadd.f32 %v2150_v8, %v3248_v12  ;;  %v1581_v37 = vpop.f32.mrb[9].mxu0  ;;  %v1654_v7 = vadd.f32 %v2166_v14, %v3248_v12  ;;  %v1645_v5 = vpop.f32.mrb[5].mxu1 }
 0x4dd   : > { %v1582_v52 = vadd.f32 %v3248_v12, %v1581_v37  ;;  %v2151_v25 = vpop.f32.mrb[10].mxu0  ;;  %v1646_v1 = vadd.f32 %v3248_v12, %v1645_v5  ;;  %v2167_v45 = vpop.f32.mrb[6].mxu1  ;;  %v1638_v37 = vadd.f32 %v3237_v2, %v3248_v12 }
 0x4de   : > { %v2084_v6 = vpack.c.bf16 %v1590_v43, %v1590_v43  ;;  %v1593_v18 = vadd.f32 %v2151_v25, %v3248_v12  ;;  %v1584_v62 = vpop.f32.mrb[11].mxu0  ;;  %v2100_v60 = vpack.c.bf16 %v1654_v7, %v1654_v7  ;;  %v1657_v4 = vadd.f32 %v2167_v45, %v3248_v12  ;;  %v1648_v28 = vpop.f32.mrb[7].mxu1 }
 0x4df   : > { %v2082_v10 = vpack.c.bf16 %v1582_v52, %v1582_v52  ;;  %v1585_v63 = vadd.f32 %v3248_v12, %v1584_v62  ;;  %v2098_v19 = vpack.c.bf16 %v1646_v1, %v1646_v1  ;;  %v1649_v24 = vadd.f32 %v3248_v12, %v1648_v28 }
 0x4e0   : > { %1742 = vst.msk [vmem:[%s3256_s18 + $0x10] sm:$0xf] %vm463_vm1, %v2084_v6  ;;  %v2085_v54 = vpack.c.bf16 %v1593_v18, %v1593_v18  ;;  %1839 = vst.msk [vmem:[%s3256_s18 + $0x14] sm:$0xf] %vm463_vm1, %v2100_v60  ;;  %v2101_v41 = vpack.c.bf16 %v1657_v4, %v1657_v4  ;;  %v1641_v52 = vadd.f32 %v3241_v3, %v3248_v12 }
 0x4e1   : > { %1740 = vst.msk [vmem:[%s3256_s18] sm:$0xf] %vm463_vm1, %v2082_v10  ;;  %v2083_v47 = vpack.c.bf16 %v1585_v63, %v1585_v63  ;;  %1837 = vst.msk [vmem:[%s3256_s18 + $0x4] sm:$0xf] %vm463_vm1, %v2098_v19  ;;  %v2099_v13 = vpack.c.bf16 %v1649_v24, %v1649_v24  ;;  %v2096_v1 = vpack.c.bf16 %v1638_v37, %v1638_v37 }
 0x4e2   : > { %1743 = vst.msk [vmem:[%s3256_s18 + $0x18] sm:$0xf] %vm463_vm1, %v2085_v54  ;;  %1840 = vst.msk [vmem:[%s3256_s18 + $0x1c] sm:$0xf] %vm463_vm1, %v2101_v41  ;;  %v1630_v18 = vadd.f32 %v3248_v12, %v3239_v53  ;;  %v2097_v2 = vpack.c.bf16 %v1641_v52, %v1641_v52  ;;  %v1633_v60 = vadd.f32 %v3248_v12, %v3243_v0 }
 0x4e3   : > { %1741 = vst.msk [vmem:[%s3256_s18 + $0x8] sm:$0xf] %vm463_vm1, %v2083_v47  ;;  %v2154_v50 = vpop.f32.mrb[12].mxu0  ;;  %1838 = vst.msk [vmem:[%s3256_s18 + $0xc] sm:$0xf] %vm463_vm1, %v2099_v13  ;;  %v2170_v16 = vpop.f32.mrb[8].mxu1 }
 0x4e4   : > { %v1606_v23 = vadd.f32 %v2154_v50, %v3248_v12  ;;  %v1597_v61 = vpop.f32.mrb[13].mxu0  ;;  %v1670_v17 = vadd.f32 %v2170_v16, %v3248_v12  ;;  %v1661_v11 = vpop.f32.mrb[9].mxu1  ;;  %v2094_v3 = vpack.c.bf16 %v1630_v18, %v1630_v18  ;;  %v2095_v4 = vpack.c.bf16 %v1633_v60, %v1633_v60 }
 0x4e5   : > { %v1598_v34 = vadd.f32 %v3248_v12, %v1597_v61  ;;  %v2155_v20 = vpop.f32.mrb[14].mxu0  ;;  %v1662_v46 = vadd.f32 %v3248_v12, %v1661_v11  ;;  %v2171_v30 = vpop.f32.mrb[10].mxu1 }
 0x4e6   : > { %v2088_v51 = vpack.c.bf16 %v1606_v23, %v1606_v23  ;;  %v1609_v48 = vadd.f32 %v2155_v20, %v3248_v12  ;;  %v1600_v15 = vpop.f32.mrb[15].mxu0  ;;  %v2104_v58 = vpack.c.bf16 %v1670_v17, %v1670_v17  ;;  %v1673_v57 = vadd.f32 %v2171_v30, %v3248_v12  ;;  %v1664_v55 = vpop.f32.mrb[11].mxu1 }
 0x4e7   : > { %v2086_v22 = vpack.c.bf16 %v1598_v34, %v1598_v34  ;;  %v1601_v44 = vadd.f32 %v3248_v12, %v1600_v15  ;;  %v2102_v35 = vpack.c.bf16 %v1662_v46, %v1662_v46  ;;  %v1665_v38 = vadd.f32 %v3248_v12, %v1664_v55 }
 0x4e8   : > { %1746 = vst.msk [vmem:[%s3256_s18 + $0x30] sm:$0xf] %vm463_vm1, %v2088_v51  ;;  %v2089_v49 = vpack.c.bf16 %v1609_v48, %v1609_v48  ;;  %1843 = vst.msk [vmem:[%s3256_s18 + $0x34] sm:$0xf] %vm463_vm1, %v2104_v58  ;;  %v2105_v56 = vpack.c.bf16 %v1673_v57, %v1673_v57 }
 0x4e9   : > { %1744 = vst.msk [vmem:[%s3256_s18 + $0x20] sm:$0xf] %vm463_vm1, %v2086_v22  ;;  %v2087_v42 = vpack.c.bf16 %v1601_v44, %v1601_v44  ;;  %1841 = vst.msk [vmem:[%s3256_s18 + $0x24] sm:$0xf] %vm463_vm1, %v2102_v35  ;;  %v2103_v29 = vpack.c.bf16 %v1665_v38, %v1665_v38 }
 0x4ea   : > { %1747 = vst.msk [vmem:[%s3256_s18 + $0x38] sm:$0xf] %vm463_vm1, %v2089_v49  ;;  %1844 = vst.msk [vmem:[%s3256_s18 + $0x3c] sm:$0xf] %vm463_vm1, %v2105_v56 }
 0x4eb   : > { %1745 = vst.msk [vmem:[%s3256_s18 + $0x28] sm:$0xf] %vm463_vm1, %v2087_v42  ;;  %v2158_v31 = vpop.f32.mrb[16].mxu0  ;;  %1842 = vst.msk [vmem:[%s3256_s18 + $0x2c] sm:$0xf] %vm463_vm1, %v2103_v29  ;;  %v2174_v21 = vpop.f32.mrb[12].mxu1 }
 0x4ec   : > { %v1622_v26 = vadd.f32 %v2158_v31, %v3248_v12  ;;  %v1613_v36 = vpop.f32.mrb[17].mxu0  ;;  %v1677_v33 = vpop.f32.mrb[13].mxu1  ;;  %v1686_v10 = vadd.f32 %v2174_v21, %v3248_v12 }
 0x4ed   : > { %v2159_v32 = vpop.f32.mrb[18].mxu0  ;;  %v1614_v9 = vadd.f32 %v3248_v12, %v1613_v36  ;;  %v2175_v39 = vpop.f32.mrb[14].mxu1  ;;  %v1678_v28 = vadd.f32 %v3248_v12, %v1677_v33 }
 0x4ee   : > { %v2092_v27 = vpack.c.bf16 %v1622_v26, %v1622_v26  ;;  %v1625_v59 = vadd.f32 %v2159_v32, %v3248_v12  ;;  %v1616_v40 = vpop.f32.mrb[19].mxu0  ;;  %v1680_v8 = vpop.f32.mrb[15].mxu1  ;;  %v1689_v63 = vadd.f32 %v2175_v39, %v3248_v12  ;;  %v2108_v53 = vpack.c.bf16 %v1686_v10, %v1686_v10 }
 0x4ef   : > { %v1617_v14 = vadd.f32 %v3248_v12, %v1616_v40  ;;  %v2090_v7 = vpack.c.bf16 %v1614_v9, %v1614_v9  ;;  %v1681_v0 = vadd.f32 %v3248_v12, %v1680_v8  ;;  %v2106_v54 = vpack.c.bf16 %v1678_v28, %v1678_v28 }
 0x4f0   : > { %v2093_v43 = vpack.c.bf16 %v1625_v59, %v1625_v59  ;;  %1776 = vrot.lane.b32.xlu0 %v2092_v27, %s2335_s20  ;;  %v2109_v19 = vpack.c.bf16 %v1689_v63, %v1689_v63 }
 0x4f1   : > { %v2091_v5 = vpack.c.bf16 %v1617_v14, %v1617_v14  ;;  %v2107_v41 = vpack.c.bf16 %v1681_v0, %v1681_v0 }
 0x4f2   : > { %1778 = vrot.lane.b32.xlu1 %v2093_v43, %s2335_s20 }
 0x4f3   : > { %v2178_v25 = vpop.f32.mrb[16].mxu1 }
 0x4f4   : > { %1772 = vrot.lane.b32.xlu0 %v2090_v7, %s2335_s20  ;;  %v1693_v6 = vpop.f32.mrb[17].mxu1  ;;  %v1702_v13 = vadd.f32 %v2178_v25, %v3248_v12 }
 0x4f5   : > { %v2179_v45 = vpop.f32.mrb[18].mxu1  ;;  %v1694_v24 = vadd.f32 %v3248_v12, %v1693_v6 }
 0x4f6   : > { %1774 = vrot.lane.b32.xlu1 %v2091_v5, %s2335_s20  ;;  %v1696_v62 = vpop.f32.mrb[19].mxu1  ;;  %v1705_v23 = vadd.f32 %v2179_v45, %v3248_v12  ;;  %v2112_v61 = vpack.c.bf16 %v1702_v13, %v1702_v13 }
 0x4f7   : > { %v1697_v47 = vadd.f32 %v3248_v12, %v1696_v62  ;;  %v2110_v50 = vpack.c.bf16 %v1694_v24, %v1694_v24 }
 0x4f8   : > { %1784 = vrot.lane.b32.xlu0 %v2096_v1, %s2335_s20  ;;  %v2113_v17 = vpack.c.bf16 %v1705_v23, %v1705_v23 }
 0x4f9   : > { %v2111_v16 = vpack.c.bf16 %v1697_v47, %v1697_v47 }
 0x4fa   : > { %1786 = vrot.lane.b32.xlu1 %v2097_v2, %s2335_s20 }
 0x4fc   : > { %1780 = vrot.lane.b32.xlu0 %v2094_v3, %s2335_s20 }
 0x4fe   : > { %1782 = vrot.lane.b32.xlu1 %v2095_v4, %s2335_s20 }
 0x500   : > { %1873 = vrot.lane.b32.xlu0 %v2108_v53, %s2335_s20 }
 0x502   : > { %1875 = vrot.lane.b32.xlu1 %v2109_v19, %s2335_s20 }
 0x504   : > { %1869 = vrot.lane.b32.xlu0 %v2106_v54, %s2335_s20 }
 0x506   : > { %1871 = vrot.lane.b32.xlu1 %v2107_v41, %s2335_s20 }
 0x508   : > { %1877 = vrot.lane.b32.xlu0 %v2110_v50, %s2335_s20 }
 0x50a   : > { %1879 = vrot.lane.b32.xlu1 %v2111_v16, %s2335_s20 }
 0x50c   : > { %1881 = vrot.lane.b32.xlu0 %v2112_v61, %s2335_s20 }
 0x50e   : > { %1883 = vrot.lane.b32.xlu1 %v2113_v17, %s2335_s20 }
 0x562   : > { %v1777_v34 = vpop.permute.xlu0 %1776 }
 0x563   : > { %1799 = vst.msk [vmem:[%s3256_s18 + $0x10] sm:$0xf] %vm1796_vm2, %v1777_v34 }
 0x564   : > { %v1779_v12 = vpop.permute.xlu1 %1778 }
 0x565   : > { %1800 = vst.msk [vmem:[%s3256_s18 + $0x18] sm:$0xf] %vm1796_vm2, %v1779_v12 }
 0x566   : > { %v1773_v11 = vpop.permute.xlu0 %1772 }
 0x567   : > { %1797 = vst.msk [vmem:[%s3256_s18] sm:$0xf] %vm1796_vm2, %v1773_v11 }
 0x568   : > { %v1775_v20 = vpop.permute.xlu1 %1774 }
 0x569   : > { %1798 = vst.msk [vmem:[%s3256_s18 + $0x8] sm:$0xf] %vm1796_vm2, %v1775_v20 }
 0x56a   : > { %v1785_v51 = vpop.permute.xlu0 %1784 }
 0x56b   : > { %1803 = vst.msk [vmem:[%s3256_s18 + $0x30] sm:$0xf] %vm1796_vm2, %v1785_v51 }
 0x56c   : > { %v1787_v46 = vpop.permute.xlu1 %1786 }
 0x56d   : > { %1804 = vst.msk [vmem:[%s3256_s18 + $0x38] sm:$0xf] %vm1796_vm2, %v1787_v46 }
 0x56e   : > { %v1781_v48 = vpop.permute.xlu0 %1780 }
 0x56f   : > { %1801 = vst.msk [vmem:[%s3256_s18 + $0x20] sm:$0xf] %vm1796_vm2, %v1781_v48 }
 0x570   : > { %v1783_v30 = vpop.permute.xlu1 %1782 }
 0x571   : > { %1802 = vst.msk [vmem:[%s3256_s18 + $0x28] sm:$0xf] %vm1796_vm2, %v1783_v30 }
 0x572   : > { %v1874_v15 = vpop.permute.xlu0 %1873 }
 0x573   : > { %1895 = vst.msk [vmem:[%s3256_s18 + $0x14] sm:$0xf] %vm1796_vm2, %v1874_v15 }
 0x574   : > { %v1876_v58 = vpop.permute.xlu1 %1875 }
 0x575   : > { %1896 = vst.msk [vmem:[%s3256_s18 + $0x1c] sm:$0xf] %vm1796_vm2, %v1876_v58 }
 0x576   : > { %v1870_v22 = vpop.permute.xlu0 %1869 }
 0x577   : > { %1893 = vst.msk [vmem:[%s3256_s18 + $0x4] sm:$0xf] %vm1796_vm2, %v1870_v22 }
 0x578   : > { %v1872_v57 = vpop.permute.xlu1 %1871 }
 0x579   : > { %1894 = vst.msk [vmem:[%s3256_s18 + $0xc] sm:$0xf] %vm1796_vm2, %v1872_v57 }
 0x57a   : > { %v1878_v44 = vpop.permute.xlu0 %1877 }
 0x57b   : > { %1897 = vst.msk [vmem:[%s3256_s18 + $0x24] sm:$0xf] %vm1796_vm2, %v1878_v44 }
 0x57c   : > { %v1880_v55 = vpop.permute.xlu1 %1879 }
 0x57d   : > { %1898 = vst.msk [vmem:[%s3256_s18 + $0x2c] sm:$0xf] %vm1796_vm2, %v1880_v55 }
 0x57e   : > { %v1882_v35 = vpop.permute.xlu0 %1881 }
 0x57f   : > { %1899 = vst.msk [vmem:[%s3256_s18 + $0x34] sm:$0xf] %vm1796_vm2, %v1882_v35 }
 0x580   : > { %v1884_v49 = vpop.permute.xlu1 %1883 }
 0x581   : > { %1900 = vst.msk [vmem:[%s3256_s18 + $0x3c] sm:$0xf] %vm1796_vm2, %v1884_v49 }
 0x582 PF: > { %s19_s27 = sadd.s32 1, %s2333_s27  }
 0x583   : > { %p16_p4 = scmp.ge.s32.totalorder %s19_s27, 4  }
 0x585   :  { %18 = sbr.rel (!%p16_p4) target bundleno = 1 (0x1), region = 90 }

// kernel: tile.18
= control target key start
LH: loop header
LB: loop body
LE: loop exit
PB: predicated region body
PF: predicated region fallthrough
CT: control target
= control target key end

     0   :  { %s22_s0 = inlined_call_operand.vmem [shape: f32[16], index: 0, kind: input, shape index: {}]   ;;  %s23_s1 = inlined_call_operand.vmem [shape: f32[4,16], index: 1, kind: output, shape index: {}]  }
   0x1   :  { %v4_v0 = vld [vmem:[%s22_s0] ss:$0 sm:$0xff] }
   0x2   :  { %5 = vst [vmem:[%s23_s1] sm:$0xf] %v4_v0 }

// kernel: tile.19
= control target key start
LH: loop header
LB: loop body
LE: loop exit
PB: predicated region body
PF: predicated region fallthrough
CT: control target
= control target key end

     0   :  { %vm7_vm0 = vcmask 130048   ;;  %s37_s8 = smov 16   ;;  %s38_s9 = smov 32   ;;  %vm13_vm1 = vcmask 523648   ;;  %vm19_vm2 = vcmask 392448   ;;  %vm25_vm3 = vcmask 261248   ;;  %s55_s0 = inlined_call_operand.vmem [shape: f32[4,16], index: 0, kind: input, shape index: {}]   ;;  %s56_s1 = inlined_call_operand.vmem [shape: f32[1,64], index: 1, kind: output, shape index: {}]  }
   0x1   :  { %v4_v0 = vld [vmem:[%s55_s0] sm:$0xf]  ;;  %s36_s0 = smov 48  }
   0x2   :  { %5 = vst [vmem:[#allocation1] sm:$0xf] %v4_v0 }
   0x9   :  { %v10_v1 = vld [vmem:[#allocation1 + $0x3] sm:$0x1]   ;;  %v22_v2 = vld [vmem:[#allocation1 + $0x1] sm:$0x1]   ;;  %v6_v3 = vld [vmem:[#allocation1] sm:$0x1]  }
   0xa   :  { %11 = vrot.lane.b32.xlu0 %v10_v1, %s36_s0  ;;  %23 = vrot.lane.b32.xlu1 %v22_v2, %s37_s8  ;;  %v16_v4 = vld [vmem:[#allocation1 + $0x2] sm:$0x1]   ;;  %8 = vst.msk [vmem:[#allocation0] sm:$0x1] %vm7_vm0, %v6_v3  }
   0xe   :  { %17 = vrot.lane.b32.xlu0 %v16_v4, %s38_s9 }
  0x7c   :  { %v12_v5 = vpop.permute.xlu0 %11   ;;  %v24_v6 = vpop.permute.xlu1 %23  }
  0x7d   :  { %14 = vst.msk [vmem:[#allocation0] sm:$0x1] %vm13_vm1, %v12_v5  }
  0x80   :  { %v18_v7 = vpop.permute.xlu0 %17  }
  0x81   :  { %20 = vst.msk [vmem:[#allocation0] sm:$0x1] %vm19_vm2, %v18_v7  }
  0x82   :  { %26 = vst.msk [vmem:[#allocation0] sm:$0x1] %vm25_vm3, %v24_v6  }
  0x89   :  { %v30_v8 = vld [vmem:[#allocation0] sm:$0x1] }
  0x8a   :  { %32 = vst [vmem:[%s56_s1] sm:$0x1] %v30_v8 }

// kernel: fpn_head_forward.1
= control target key start
LH: loop header
LB: loop body
LE: loop exit
PB: predicated region body
PF: predicated region fallthrough
CT: control target
= control target key end

     0   :  { %s2387_s27 = smov 0   ;;  %s3376_s0 = inlined_call_operand.vmem [shape: f32[128,16], index: 0, kind: input, shape index: {}]   ;;  %s3377_s1 = inlined_call_operand.vmem [shape: bf16[16,128], index: 1, kind: input, shape index: {}]   ;;  %s3378_s2 = inlined_call_operand.vmem [shape: f32[1,128], index: 2, kind: input, shape index: {}]   ;;  %s3379_s3 = inlined_call_operand.vmem [shape: f32[1,16], index: 3, kind: input, shape index: {}]   ;;  %s3380_s4 = inlined_call_operand.vmem [shape: f32[1,16], index: 4, kind: input, shape index: {}]   ;;  %s3381_s5 = inlined_call_operand.vmem [shape: bf16[16,64], index: 5, kind: input, shape index: {}]   ;;  %s3382_s6 = inlined_call_operand.vmem [shape: f32[1,64], index: 6, kind: input, shape index: {}]   ;;  %s3383_s7 = inlined_call_operand.vmem [shape: bf16[128,64], index: 7, kind: output, shape index: {0}]   ;;  %s3384_s8 = inlined_call_operand.vmem [shape: bf16[128,256], index: 8, kind: output, shape index: {1}]  }
   0x1 LB: > { %s1993_s28 = sadd.s32 4294967295, %s2333_s27   ;;  %p1997_p0 = scmp.ge.s32.totalorder %s2333_s27, 1  ;;  %s2333_s27 = sphi %s2387_s27, %s19_s27  }
   0x2   : > { %p266_p1 = scmp.lt.s32.totalorder %s2333_s27, 3 }
   0x4   : > { %p267_p2 = pnand %p1997_p0, %p266_p1 }
   0x5   : > { %v2197_v0 = vld [vmem:[%s3377_s1] sm:$0xff] (!%p267_p2)   ;;  %s1998_s9 = sshll.u32 (!%p267_p2), %s1993_s28, 3  ;;  %vm353_vm0 = vcmask (!%p267_p2), 130048   ;;  %vm463_vm1 = vcmask (!%p267_p2), 519168   ;;  %s2335_s20 = smov (!%p267_p2), 64   ;;  %vm1796_vm2 = vcmask (!%p267_p2), 1043968  }
   0x6   : > { %270 = sbr.rel (%p267_p2) target bundleno = 1410 (0x582), region = 48  ;;  %p307_p3 = scmp.lt.s32.totalorder (!%p267_p2), %s1998_s9, 15  ;;  %2136 = vmatprep.subr.bf16.mxu0 (!%p267_p2), %v2197_v0  ;;  %v2005_v13 = vld [vmem:[%s3378_s2] ss:$0 sm:$0xff] (!%p267_p2) }
   0x7   : > { %2137 = vmatpush3.bf16.msra.mxu0 (!%p267_p2), %v2197_v0  ;;  %s2336_s21 = smov (!%p267_p2), 32   ;;  %s2337_s22 = smov (!%p267_p2), 16  }
   0x8   : > { %s2338_s23 = smov (!%p267_p2), 48   ;;  %s2339_s26 = smov (!%p267_p2), 80  }
   0x9   : > { %s2340_s28 = smov (!%p267_p2), 96   ;;  %s2341_s11 = smov (!%p267_p2), 112  }
   0xd   : > { %s3386_s9 = smov (!%p307_p3, %s1998_s9), 15 }
   0xe   : > { %s1999_s10 = sshll.u32 %s3386_s9, 3  ;;  %s2001_s16 = sshll.u32 %s3386_s9, 2 }
   0xf   : > { %s310_s13 = scalar_lea.vmem %s3376_s0, %s1999_s10  ;;  %s2419_s19 = scalar_lea.vmem %s3383_s7, %s2001_s16 }
  0x10   : > { %v326_v1 = vld [vmem:[%s310_s13] sm:$0xff]  ;;  %v327_v2 = vld [vmem:[%s310_s13 + $0x8] sm:$0xff]  ;;  %v328_v3 = vld [vmem:[%s310_s13 + $0x10] sm:$0xff]  ;;  %s3256_s18 = scalar_lea.vmem %s3384_s8, %s1999_s10 }
  0x11   : > { %v334_v4 = vpack.c.bf16 %v327_v2, %v326_v1  ;;  %v329_v5 = vld [vmem:[%s310_s13 + $0x18] sm:$0xff]  ;;  %v330_v6 = vld [vmem:[%s310_s13 + $0x20] sm:$0xff]  ;;  %v331_v7 = vld [vmem:[%s310_s13 + $0x28] sm:$0xff] }
  0x12   : > { %v335_v8 = vpack.c.bf16 %v329_v5, %v328_v3  ;;  %v336_v9 = vpack.c.bf16 %v331_v7, %v330_v6  ;;  %v332_v10 = vld [vmem:[%s310_s13 + $0x30] sm:$0xff]  ;;  %v333_v11 = vld [vmem:[%s310_s13 + $0x38] sm:$0xff] }
  0x13   : > { %2138 = vmatprep.mubr.msk.bf16.mxu0 %vm353_vm0, %v334_v4  ;;  %v337_v12 = vpack.c.bf16 %v333_v11, %v332_v10 }
  0x14   : > { %2139 = vmatmul.mubr.msk.bf16.vlgmr.msra.gmra.mrb[0].mxu0 %vm353_vm0, %v335_v8 }
  0x15   : > { %2142 = vmatprep.mubr.msk.bf16.mxu0 %vm353_vm0, %v336_v9 }
  0x1c   : > { %2143 = vmatmul.mubr.msk.bf16.gmra.mrb[4].mxu0 %vm353_vm0, %v337_v12 }
  0xe7   : > { %v2140_v14 = vpop.f32.mrb[0].mxu0 }
  0xe8   : > { %v2414_v15 = vadd.f32 %v2140_v14, %v2005_v13  ;;  %v400_v16 = vpop.f32.mrb[1].mxu0 }
  0xe9   : > { %v2421_v17 = vadd.f32 %v2005_v13, %v400_v16  ;;  %v2141_v18 = vpop.f32.mrb[2].mxu0 }
  0xea   : > { %v2076_v19 = vpack.c.bf16 %v2414_v15, %v2414_v15  ;;  %v2425_v20 = vadd.f32 %v2141_v18, %v2005_v13  ;;  %496 = vrot.lane.b32.xlu1 %v2414_v15, %s2335_s20  ;;  %964 = vrot.lane.b32.xlu0 %v2414_v15, %s2336_s21  ;;  %v403_v21 = vpop.f32.mrb[3].mxu0  ;;  %v550_v38 = vmul.f32 %v2414_v15, %v2414_v15 }
  0xeb   : > { %v2074_v22 = vpack.c.bf16 %v2421_v17, %v2421_v17  ;;  %v2433_v23 = vadd.f32 %v2005_v13, %v403_v21  ;;  %v548_v40 = vmul.f32 %v2421_v17, %v2421_v17 }
  0xec   : > { %466 = vst.msk [vmem:[%s2419_s19 + $0x8] sm:$0xf] %vm463_vm1, %v2076_v19  ;;  %v2077_v24 = vpack.c.bf16 %v2425_v20, %v2425_v20  ;;  %v551_v39 = vmul.f32 %v2425_v20, %v2425_v20 }
  0xed   : > { %464 = vst.msk [vmem:[%s2419_s19] sm:$0xf] %vm463_vm1, %v2074_v22  ;;  %v2075_v25 = vpack.c.bf16 %v2433_v23, %v2433_v23  ;;  %v549_v41 = vmul.f32 %v2433_v23, %v2433_v23 }
  0xee   : > { %467 = vst.msk [vmem:[%s2419_s19 + $0xc] sm:$0xf] %vm463_vm1, %v2077_v24  ;;  %1190 = vrot.lane.b32.xlu0 %v2414_v15, %s2337_s22  ;;  %492 = vrot.lane.b32.xlu1 %v2421_v17, %s2335_s20 }
  0xef   : > { %465 = vst.msk [vmem:[%s2419_s19 + $0x4] sm:$0xf] %vm463_vm1, %v2075_v25  ;;  %v2144_v26 = vpop.f32.mrb[4].mxu0 }
  0xf0   : > { %v2451_v27 = vadd.f32 %v2144_v26, %v2005_v13  ;;  %v416_v28 = vpop.f32.mrb[5].mxu0 }
  0xf1   : > { %v2453_v29 = vadd.f32 %v2005_v13, %v416_v28  ;;  %v2145_v30 = vpop.f32.mrb[6].mxu0 }
  0xf2   : > { %738 = vrot.lane.b32.xlu0 %v2414_v15, %s2338_s23  ;;  %966 = vrot.lane.b32.xlu1 %v2425_v20, %s2336_s21  ;;  %v2080_v31 = vpack.c.bf16 %v2451_v27, %v2451_v27  ;;  %v2461_v32 = vadd.f32 %v2145_v30, %v2005_v13  ;;  %v419_v33 = vpop.f32.mrb[7].mxu0  ;;  %v2541_v42 = vmul.f32 %v2451_v27, %v2451_v27 }
  0xf3   : > { %v2078_v34 = vpack.c.bf16 %v2453_v29, %v2453_v29  ;;  %v2465_v35 = vadd.f32 %v2005_v13, %v419_v33  ;;  %v2561_v43 = vmul.f32 %v2453_v29, %v2453_v29 }
  0xf4   : > { %470 = vst.msk [vmem:[%s2419_s19 + $0x18] sm:$0xf] %vm463_vm1, %v2080_v31  ;;  %v2081_v36 = vpack.c.bf16 %v2461_v32, %v2461_v32  ;;  %v2573_v44 = vmul.f32 %v2461_v32, %v2461_v32 }
  0xf5   : > { %468 = vst.msk [vmem:[%s2419_s19 + $0x10] sm:$0xf] %vm463_vm1, %v2078_v34  ;;  %v2079_v37 = vpack.c.bf16 %v2465_v35, %v2465_v35  ;;  %v2589_v47 = vmul.f32 %v2465_v35, %v2465_v35 }
  0xf6   : > { %1192 = vrot.lane.b32.xlu1 %v2425_v20, %s2337_s22  ;;  %960 = vrot.lane.b32.xlu0 %v2421_v17, %s2336_s21  ;;  %471 = vst.msk [vmem:[%s2419_s19 + $0x1c] sm:$0xf] %vm463_vm1, %v2081_v36 }
  0xf7   : > { %469 = vst.msk [vmem:[%s2419_s19 + $0x14] sm:$0xf] %vm463_vm1, %v2079_v37 }
  0xfa   : > { %740 = vrot.lane.b32.xlu1 %v2425_v20, %s2338_s23  ;;  %1186 = vrot.lane.b32.xlu0 %v2421_v17, %s2337_s22 }
  0xfe   : > { %498 = vrot.lane.b32.xlu1 %v2425_v20, %s2335_s20  ;;  %734 = vrot.lane.b32.xlu0 %v2421_v17, %s2338_s23 }
 0x102   : > { %962 = vrot.lane.b32.xlu1 %v2433_v23, %s2336_s21  ;;  %1020 = vrot.lane.b32.xlu0 %v550_v38, %s2336_s21 }
 0x106   : > { %1188 = vrot.lane.b32.xlu1 %v2433_v23, %s2337_s22  ;;  %1246 = vrot.lane.b32.xlu0 %v550_v38, %s2337_s22 }
 0x10a   : > { %736 = vrot.lane.b32.xlu1 %v2433_v23, %s2338_s23  ;;  %794 = vrot.lane.b32.xlu0 %v550_v38, %s2338_s23 }
 0x10e   : > { %1022 = vrot.lane.b32.xlu1 %v551_v39, %s2336_s21  ;;  %568 = vrot.lane.b32.xlu0 %v550_v38, %s2335_s20 }
 0x112   : > { %1248 = vrot.lane.b32.xlu1 %v551_v39, %s2337_s22  ;;  %1016 = vrot.lane.b32.xlu0 %v548_v40, %s2336_s21 }
 0x116   : > { %796 = vrot.lane.b32.xlu1 %v551_v39, %s2338_s23  ;;  %1242 = vrot.lane.b32.xlu0 %v548_v40, %s2337_s22 }
 0x11a   : > { %570 = vrot.lane.b32.xlu1 %v551_v39, %s2335_s20  ;;  %790 = vrot.lane.b32.xlu0 %v548_v40, %s2338_s23 }
 0x11e   : > { %1018 = vrot.lane.b32.xlu1 %v549_v41, %s2336_s21  ;;  %494 = vrot.lane.b32.xlu0 %v2433_v23, %s2335_s20 }
 0x122   : > { %1244 = vrot.lane.b32.xlu1 %v549_v41, %s2337_s22  ;;  %564 = vrot.lane.b32.xlu0 %v548_v40, %s2335_s20 }
 0x126   : > { %792 = vrot.lane.b32.xlu1 %v549_v41, %s2338_s23  ;;  %972 = vrot.lane.b32.xlu0 %v2451_v27, %s2336_s21 }
 0x12a   : > { %566 = vrot.lane.b32.xlu1 %v549_v41, %s2335_s20  ;;  %1198 = vrot.lane.b32.xlu0 %v2451_v27, %s2337_s22 }
 0x12e   : > { %746 = vrot.lane.b32.xlu1 %v2451_v27, %s2338_s23  ;;  %742 = vrot.lane.b32.xlu0 %v2453_v29, %s2338_s23 }
 0x132   : > { %504 = vrot.lane.b32.xlu1 %v2451_v27, %s2335_s20  ;;  %968 = vrot.lane.b32.xlu0 %v2453_v29, %s2336_s21 }
 0x136   : > { %500 = vrot.lane.b32.xlu1 %v2453_v29, %s2335_s20  ;;  %1194 = vrot.lane.b32.xlu0 %v2453_v29, %s2337_s22 }
 0x13a   : > { %748 = vrot.lane.b32.xlu1 %v2461_v32, %s2338_s23  ;;  %802 = vrot.lane.b32.xlu0 %v2541_v42, %s2338_s23 }
 0x13e   : > { %974 = vrot.lane.b32.xlu1 %v2461_v32, %s2336_s21  ;;  %1028 = vrot.lane.b32.xlu0 %v2541_v42, %s2336_s21 }
 0x142   : > { %1200 = vrot.lane.b32.xlu1 %v2461_v32, %s2337_s22  ;;  %1254 = vrot.lane.b32.xlu0 %v2541_v42, %s2337_s22 }
 0x146   : > { %506 = vrot.lane.b32.xlu1 %v2461_v32, %s2335_s20  ;;  %744 = vrot.lane.b32.xlu0 %v2465_v35, %s2338_s23 }
 0x14a   : > { %970 = vrot.lane.b32.xlu1 %v2465_v35, %s2336_s21  ;;  %798 = vrot.lane.b32.xlu0 %v2561_v43, %s2338_s23 }
 0x14e   : > { %1196 = vrot.lane.b32.xlu1 %v2465_v35, %s2337_s22  ;;  %1024 = vrot.lane.b32.xlu0 %v2561_v43, %s2336_s21 }
 0x152   : > { %804 = vrot.lane.b32.xlu1 %v2573_v44, %s2338_s23  ;;  %1250 = vrot.lane.b32.xlu0 %v2561_v43, %s2337_s22 }
 0x156   : > { %1030 = vrot.lane.b32.xlu1 %v2573_v44, %s2336_s21  ;;  %502 = vrot.lane.b32.xlu0 %v2465_v35, %s2335_s20 }
 0x15a   : > { %1256 = vrot.lane.b32.xlu1 %v2573_v44, %s2337_s22 }
 0x15c   : > { %v2585_v45 = vpop.permute.xlu1 %496  ;;  %v965_v46 = vpop.permute.xlu0 %964 }
 0x15d   : > { %v990_v9 = vsel %vm353_vm0, %v965_v46, 0.0 }
 0x15e   : > { %800 = vrot.lane.b32.xlu1 %v2589_v47, %s2338_s23 }
 0x160   : > { %v2593_v48 = vpop.permute.xlu0 %1190  ;;  %v2595_v49 = vpop.permute.xlu1 %492 }
 0x162   : > { %1026 = vrot.lane.b32.xlu1 %v2589_v47, %s2336_s21 }
 0x164   : > { %v2599_v50 = vpop.permute.xlu0 %738  ;;  %v967_v51 = vpop.permute.xlu1 %966 }
 0x165   : > { %v993_v60 = vsel %vm353_vm0, %v967_v51, 0.0 }
 0x166   : > { %1252 = vrot.lane.b32.xlu1 %v2589_v47, %s2337_s22 }
 0x168   : > { %v2603_v52 = vpop.permute.xlu1 %1192  ;;  %v961_v53 = vpop.permute.xlu0 %960 }
 0x169   : > { %v984_v12 = vsel %vm353_vm0, %v961_v53, 0.0 }
 0x16c   : > { %v2605_v54 = vpop.permute.xlu1 %740  ;;  %v2607_v55 = vpop.permute.xlu0 %1186 }
 0x170   : > { %v2609_v56 = vpop.permute.xlu1 %498  ;;  %v2611_v57 = vpop.permute.xlu0 %734 }
 0x174   : > { %v963_v58 = vpop.permute.xlu1 %962  ;;  %v1021_v59 = vpop.permute.xlu0 %1020 }
 0x175   : > { %994 = vadd.xlane.f32.xlu0 %v993_v60  ;;  %v987_v63 = vsel %vm353_vm0, %v963_v58, 0.0  ;;  %v1046_v16 = vsel %vm353_vm0, %v1021_v59, 0.0 }
 0x178   : > { %v2614_v61 = vpop.permute.xlu1 %1188  ;;  %v2616_v62 = vpop.permute.xlu0 %1246 }
 0x179   : > { %988 = vadd.xlane.f32.xlu0 %v987_v63 }
 0x17c   : > { %v2619_v0 = vpop.permute.xlu1 %736  ;;  %v2621_v1 = vpop.permute.xlu0 %794 }
 0x180   : > { %v1023_v2 = vpop.permute.xlu1 %1022  ;;  %v2623_v3 = vpop.permute.xlu0 %568 }
 0x181   : > { %v1049_v4 = vsel %vm353_vm0, %v1023_v2, 0.0 }
 0x182   : > { %1050 = vadd.xlane.f32.xlu0 %v1049_v4 }
 0x184   : > { %v2626_v5 = vpop.permute.xlu1 %1248  ;;  %v1017_v6 = vpop.permute.xlu0 %1016 }
 0x185   : > { %v1040_v22 = vsel %vm353_vm0, %v1017_v6, 0.0 }
 0x188   : > { %v2628_v7 = vpop.permute.xlu1 %796  ;;  %v2630_v8 = vpop.permute.xlu0 %1242 }
 0x18a   : > { %991 = vadd.xlane.f32.xlu1 %v990_v9 }
 0x18c   : > { %v2633_v10 = vpop.permute.xlu1 %570  ;;  %v2635_v11 = vpop.permute.xlu0 %790 }
 0x18e   : > { %985 = vadd.xlane.f32.xlu1 %v984_v12 }
 0x190   : > { %v1019_v13 = vpop.permute.xlu1 %1018  ;;  %v2638_v14 = vpop.permute.xlu0 %494 }
 0x191   : > { %v1043_v18 = vsel %vm353_vm0, %v1019_v13, 0.0 }
 0x192   : > { %1047 = vadd.xlane.f32.xlu1 %v1046_v16  ;;  %1044 = vadd.xlane.f32.xlu0 %v1043_v18 }
 0x194   : > { %v2642_v19 = vpop.permute.xlu1 %1244  ;;  %v2644_v21 = vpop.permute.xlu0 %564 }
 0x196   : > { %1041 = vadd.xlane.f32.xlu1 %v1040_v22 }
 0x198   : > { %v2647_v24 = vpop.permute.xlu1 %792  ;;  %v973_v25 = vpop.permute.xlu0 %972 }
 0x199   : > { %v1002_v37 = vsel %vm353_vm0, %v973_v25, 0.0 }
 0x19c   : > { %v2649_v26 = vpop.permute.xlu1 %566  ;;  %v2651_v28 = vpop.permute.xlu0 %1198 }
 0x1a0   : > { %v747_v30 = vpop.permute.xlu1 %746  ;;  %v743_v31 = vpop.permute.xlu0 %742 }
 0x1a1   : > { %v776_v33 = vsel %vm353_vm0, %v747_v30, 0.0  ;;  %v770_v40 = vsel %vm353_vm0, %v743_v31, 0.0 }
 0x1a2   : > { %777 = vadd.xlane.f32.xlu0 %v776_v33 }
 0x1a4   : > { %v2654_v34 = vpop.permute.xlu1 %504  ;;  %v969_v36 = vpop.permute.xlu0 %968 }
 0x1a5   : > { %v996_v51 = vsel %vm353_vm0, %v969_v36, 0.0 }
 0x1a6   : > { %1003 = vadd.xlane.f32.xlu0 %v1002_v37 }
 0x1a8   : > { %v2657_v38 = vpop.permute.xlu1 %500  ;;  %v2659_v39 = vpop.permute.xlu0 %1194 }
 0x1aa   : > { %771 = vadd.xlane.f32.xlu0 %v770_v40 }
 0x1ac   : > { %v749_v41 = vpop.permute.xlu1 %748  ;;  %v803_v46 = vpop.permute.xlu0 %802 }
 0x1ad   : > { %v832_v53 = vsel %vm353_vm0, %v803_v46, 0.0  ;;  %v779_v60 = vsel %vm353_vm0, %v749_v41, 0.0 }
 0x1ae   : > { %997 = vadd.xlane.f32.xlu0 %v996_v51  ;;  %833 = vadd.xlane.f32.xlu1 %v832_v53 }
 0x1b0   : > { %v975_v58 = vpop.permute.xlu1 %974  ;;  %v1029_v59 = vpop.permute.xlu0 %1028 }
 0x1b1   : > { %v1005_v63 = vsel %vm353_vm0, %v975_v58, 0.0  ;;  %v1058_v6 = vsel %vm353_vm0, %v1029_v59, 0.0 }
 0x1b2   : > { %780 = vadd.xlane.f32.xlu0 %v779_v60  ;;  %1006 = vadd.xlane.f32.xlu1 %v1005_v63  ;;  %v1210_v60 = vsel %vm353_vm0, %v2607_v55, 0.0  ;;  %v1213_v63 = vsel %vm353_vm0, %v2614_v61, 0.0  ;;  %v761_v55 = vsel %vm353_vm0, %v2619_v0, 0.0  ;;  %v764_v61 = vsel %vm353_vm0, %v2599_v50, 0.0 }
 0x1b3   : > { %v814_v0 = vsel %vm353_vm0, %v2635_v11, 0.0  ;;  %v820_v11 = vsel %vm353_vm0, %v2621_v1, 0.0  ;;  %v2749_v1 = vld [vmem:[%s3379_s3] ss:$0 sm:$0xff] }
 0x1b4   : > { %v2666_v2 = vpop.permute.xlu1 %1200  ;;  %v2668_v4 = vpop.permute.xlu0 %1254 }
 0x1b6   : > { %1059 = vadd.xlane.f32.xlu0 %v1058_v6  ;;  %v1216_v6 = vsel %vm353_vm0, %v2593_v48, 0.0  ;;  %v1272_v48 = vsel %vm353_vm0, %v2616_v62, 0.0 }
 0x1b8   : > { %v2671_v9 = vpop.permute.xlu1 %506  ;;  %v745_v12 = vpop.permute.xlu0 %744 }
 0x1b9   : > { %v773_v13 = vsel %vm353_vm0, %v745_v12, 0.0  ;;  %v1219_v12 = vsel %vm353_vm0, %v2603_v52, 0.0  ;;  %v758_v52 = vsel %vm353_vm0, %v2611_v57, 0.0  ;;  %v1228_v57 = vsel %vm353_vm0, %v2651_v28, 0.0 }
 0x1ba   : > { %774 = vadd.xlane.f32.xlu1 %v773_v13 }
 0x1bc   : > { %v971_v16 = vpop.permute.xlu1 %970  ;;  %v799_v18 = vpop.permute.xlu0 %798 }
 0x1bd   : > { %v826_v22 = vsel %vm353_vm0, %v799_v18, 0.0  ;;  %v999_v31 = vsel %vm353_vm0, %v971_v16, 0.0 }
 0x1be   : > { %827 = vadd.xlane.f32.xlu1 %v826_v22 }
 0x1c0   : > { %v1197_v25 = vpop.permute.xlu1 %1196  ;;  %v1025_v30 = vpop.permute.xlu0 %1024 }
 0x1c1   : > { %v1052_v33 = vsel %vm353_vm0, %v1025_v30, 0.0  ;;  %v1225_v62 = vsel %vm353_vm0, %v1197_v25, 0.0 }
 0x1c2   : > { %1000 = vadd.xlane.f32.xlu1 %v999_v31  ;;  %1053 = vadd.xlane.f32.xlu0 %v1052_v33 }
 0x1c4   : > { %v805_v36 = vpop.permute.xlu1 %804 }
 0x1c5   : > { %v835_v37 = vsel %vm353_vm0, %v805_v36, 0.0 }
 0x1c6   : > { %836 = vadd.xlane.f32.xlu0 %v835_v37 }
 0x1c8   : > { %v1031_v40 = vpop.permute.xlu1 %1030 }
 0x1c9   : > { %v1061_v41 = vsel %vm353_vm0, %v1031_v40, 0.0 }
 0x1ca   : > { %1062 = vadd.xlane.f32.xlu0 %v1061_v41 }
 0x1cc   : > { %v2679_v46 = vpop.permute.xlu1 %1256 }
 0x1cd   : > { %v1287_v25 = vsel %vm353_vm0, %v2679_v46, 0.0 }
 0x1d0   : > { %v801_v51 = vpop.permute.xlu1 %800 }
 0x1d1   : > { %v829_v53 = vsel %vm353_vm0, %v801_v51, 0.0 }
 0x1d2   : > { %830 = vadd.xlane.f32.xlu0 %v829_v53 }
 0x1d4   : > { %v1027_v58 = vpop.permute.xlu1 %1026 }
 0x1d5   : > { %v1055_v59 = vsel %vm353_vm0, %v1027_v58, 0.0 }
 0x1d6   : > { %1056 = vadd.xlane.f32.xlu1 %v1055_v59  ;;  %1211 = vadd.xlane.f32.xlu0 %v1210_v60 }
 0x1d8   : > { %v1253_v13 = vpop.permute.xlu1 %1252 }
 0x1d9   : > { %v1281_v16 = vsel %vm353_vm0, %v1253_v13, 0.0 }
 0x1da   : > { %1214 = vadd.xlane.f32.xlu1 %v1213_v63 }
 0x1eb   : > { %574 = vrot.lane.b32.xlu1 %v2589_v47, %s2335_s20  ;;  %v1266_v47 = vsel %vm353_vm0, %v2630_v8, 0.0  ;;  %v1251_v8 = vpop.permute.xlu0 %1250 }
 0x1ec   : > { %572 = vrot.lane.b32.xlu0 %v2561_v43, %s2335_s20  ;;  %v1269_v43 = vsel %vm353_vm0, %v2642_v19, 0.0  ;;  %v1231_v19 = vsel %vm353_vm0, %v2666_v2, 0.0  ;;  %v1278_v28 = vsel %vm353_vm0, %v1251_v8, 0.0  ;;  %v823_v2 = vsel %vm353_vm0, %v2628_v7, 0.0 }
 0x1ef   : > { %v2724_v50 = vpop.permute.xlu0 %502 }
 0x20b   : > { %1217 = vadd.xlane.f32.xlu0 %v1216_v6 }
 0x20f   : > { %1220 = vadd.xlane.f32.xlu1 %v1219_v12 }
 0x217   : > { %v2762_v31 = vpop.xlane.xlu1 %991 }
 0x21b   : > { %v2768_v36 = vpop.xlane.xlu1 %985 }
 0x21f   : > { %v1048_v40 = vpop.xlane.xlu1 %1047 }
 0x220   : > { %578 = vrot.lane.b32.xlu1 %v2573_v44, %s2335_s20  ;;  %v1275_v44 = vsel %vm353_vm0, %v2626_v5, 0.0  ;;  %v767_v5 = vsel %vm353_vm0, %v2605_v54, 0.0  ;;  %v2729_v54 = vpop.xlane.xlu0 %994 }
 0x221   : > { %576 = vrot.lane.b32.xlu0 %v2541_v42, %s2335_s20  ;;  %v1222_v42 = vsel %vm353_vm0, %v2659_v39, 0.0  ;;  %v817_v39 = vsel %vm353_vm0, %v2647_v24, 0.0  ;;  %v1284_v24 = vsel %vm353_vm0, %v2668_v4, 0.0  ;;  %v2760_v4 = vld [vmem:[%s3380_s4] ss:$0 sm:$0xff] }
 0x223   : > { %v2780_v46 = vpop.xlane.xlu1 %1041 }
 0x224   : > { %v2736_v18 = vpop.xlane.xlu0 %988 }
 0x228   : > { %v2740_v22 = vpop.xlane.xlu0 %1050 }
 0x22c   : > { %v2744_v30 = vpop.xlane.xlu0 %1044 }
 0x230   : > { %v2751_v7 = vpop.xlane.xlu0 %777 }
 0x234   : > { %v2764_v33 = vpop.xlane.xlu0 %1003 }
 0x238   : > { %v2770_v37 = vpop.xlane.xlu0 %771 }
 0x23b   : > { %v2784_v53 = vpop.xlane.xlu1 %833 }
 0x23c   : > { %v2778_v41 = vpop.xlane.xlu0 %997 }
 0x23f   : > { %v2788_v59 = vpop.xlane.xlu1 %1006 }
 0x240   : > { %1267 = vadd.xlane.f32.xlu0 %v1266_v47  ;;  %v2782_v51 = vpop.xlane.xlu0 %780 }
 0x244   : > { %1270 = vadd.xlane.f32.xlu1 %v1269_v43  ;;  %1273 = vadd.xlane.f32.xlu0 %v1272_v48  ;;  %v2786_v58 = vpop.xlane.xlu0 %1059  ;;  %v516_v43 = vsel %vm353_vm0, %v2595_v49, 0.0  ;;  %v588_v49 = vsel %vm353_vm0, %v2644_v21, 0.0  ;;  %v528_v21 = vsel %vm353_vm0, %v2657_v38, 0.0  ;;  %v537_v38 = vsel %vm353_vm0, %v2671_v9, 0.0 }
 0x245   : > { %v2847_v9 = vmul.f32 0.0625, %v2762_v31  ;;  %v1064_v31 = vmul.f32 0.0625, %v2780_v46  ;;  %v2875_v46 = vmul.f32 0.0625, %v2770_v37 }
 0x247   : > { %v2792_v63 = vpop.xlane.xlu1 %774 }
 0x248   : > { %759 = vadd.xlane.f32.xlu1 %v758_v52  ;;  %1276 = vadd.xlane.f32.xlu0 %v1275_v44  ;;  %v522_v44 = vsel %vm353_vm0, %v2585_v45, 0.0  ;;  %v591_v45 = vsel %vm353_vm0, %v2649_v26, 0.0  ;;  %v534_v26 = vsel %vm353_vm0, %v2654_v34, 0.0 }
 0x24b   : > { %v2796_v12 = vpop.xlane.xlu1 %827 }
 0x24c   : > { %1223 = vadd.xlane.f32.xlu1 %v1222_v42  ;;  %762 = vadd.xlane.f32.xlu0 %v761_v55  ;;  %v519_v42 = vsel %vm353_vm0, %v2638_v14, 0.0  ;;  %v594_v14 = vsel %vm353_vm0, %v2623_v3, 0.0  ;;  %v531_v3 = vsel %vm353_vm0, %v2724_v50, 0.0 }
 0x24f   : > { %v2790_v60 = vpop.xlane.xlu0 %1053  ;;  %v2802_v48 = vpop.xlane.xlu1 %1000 }
 0x250   : > { %765 = vadd.xlane.f32.xlu1 %v764_v61  ;;  %1226 = vadd.xlane.f32.xlu0 %v1225_v62  ;;  %v525_v61 = vsel %vm353_vm0, %v2609_v56, 0.0  ;;  %v597_v56 = vsel %vm353_vm0, %v2633_v10, 0.0 }
 0x253   : > { %v2794_v6 = vpop.xlane.xlu0 %836 }
 0x254   : > { %1229 = vadd.xlane.f32.xlu1 %v1228_v57  ;;  %768 = vadd.xlane.f32.xlu0 %v767_v5 }
 0x257   : > { %v2798_v47 = vpop.xlane.xlu0 %1062 }
 0x258   : > { %815 = vadd.xlane.f32.xlu1 %v814_v0  ;;  %1232 = vadd.xlane.f32.xlu0 %v1231_v19 }
 0x25c   : > { %818 = vadd.xlane.f32.xlu0 %v817_v39  ;;  %1279 = vadd.xlane.f32.xlu1 %v1278_v28 }
 0x25f   : > { %v2804_v52 = vpop.xlane.xlu0 %830 }
 0x260   : > { %1282 = vadd.xlane.f32.xlu0 %v1281_v16  ;;  %821 = vadd.xlane.f32.xlu1 %v820_v11  ;;  %v2843_v16 = vmul.f32 0.0625, %v2729_v54  ;;  %v1067_v11 = vmul.f32 0.0625, %v2740_v22  ;;  %v1065_v54 = vmul.f32 0.0625, %v2744_v30 }
 0x263   : > { %v2810_v55 = vpop.xlane.xlu1 %1056  ;;  %v2816_v62 = vpop.xlane.xlu0 %1211 }
 0x264   : > { %824 = vadd.xlane.f32.xlu0 %v823_v2  ;;  %v1075_v2 = vmul.f32 %v2843_v16, %v2843_v16 }
 0x267   : > { %v2822_v57 = vpop.xlane.xlu1 %1214  ;;  %v573_v5 = vpop.permute.xlu0 %572 }
 0x268   : > { %1285 = vadd.xlane.f32.xlu0 %v1284_v24  ;;  %v600_v10 = vsel %vm353_vm0, %v573_v5, 0.0  ;;  %v1066_v24 = vmul.f32 0.0625, %v1048_v40 }
 0x26b   : > { %v575_v8 = vpop.permute.xlu1 %574 }
 0x26c   : > { %1288 = vadd.xlane.f32.xlu0 %v1287_v25  ;;  %v603_v28 = vsel %vm353_vm0, %v575_v8, 0.0  ;;  %v2852_v25 = vmul.f32 0.0625, %v2736_v18  ;;  %v2884_v8 = vmul.f32 0.0625, %v2782_v51  ;;  %v845_v51 = vmul.f32 0.0625, %v2794_v6 }
 0x26e   : > { %v1073_v40 = vmul.f32 %v2852_v25, %v2852_v25 }
 0x271   : > { %894 = vrot.lane.b32.xlu1 %v2749_v1, %s2339_s26 }
 0x275   : > { %1120 = vrot.lane.b32.xlu1 %v2749_v1, %s2340_s28 }
 0x279   : > { %1131 = vrot.lane.b32.xlu1 %v2760_v4, %s2340_s28 }
 0x27d   : > { %1346 = vrot.lane.b32.xlu1 %v2749_v1, %s2341_s11 }
 0x281   : > { %1357 = vrot.lane.b32.xlu1 %v2760_v4, %s2341_s11 }
 0x282   : > { %905 = vrot.lane.b32.xlu0 %v2760_v4, %s2339_s26 }
 0x298   : > { %v2828_v0 = vpop.xlane.xlu0 %1217 }
 0x29c   : > { %v2834_v19 = vpop.xlane.xlu1 %1220  ;;  %v577_v39 = vpop.permute.xlu0 %576 }
 0x29d   : > { %v606_v13 = vsel %vm353_vm0, %v577_v39, 0.0  ;;  %v850_v39 = vmul.f32 %v2875_v46, %v2875_v46 }
 0x2a0   : > { %v579_v34 = vpop.permute.xlu1 %578 }
 0x2a1   : > { %517 = vadd.xlane.f32.xlu0 %v516_v43  ;;  %v609_v50 = vsel %vm353_vm0, %v579_v34, 0.0  ;;  %v1083_v43 = vsub.f32 %v1067_v11, %v1075_v2  ;;  %v2905_v11 = vmul.f32 0.0625, %v2802_v48  ;;  %v2914_v48 = vmul.f32 0.0625, %v2816_v62 }
 0x2a3   : > { %v1099_v18 = vadd.f32 1e-06, %v1083_v43 }
 0x2a5   : > { %523 = vadd.xlane.f32.xlu0 %v522_v44  ;;  %520 = vadd.xlane.f32.xlu1 %v519_v42  ;;  %v1074_v44 = vmul.f32 %v2847_v9, %v2847_v9  ;;  %v2857_v42 = vmul.f32 0.0625, %v2768_v36  ;;  %v2870_v36 = vmul.f32 0.0625, %v2764_v33  ;;  %2199 = vrsqrt.f32 %v1099_v18 }
 0x2a6   : > { %v2921_v18 = vmul.f32 0.0625, %v2822_v57  ;;  %v1298_v57 = vmul.f32 %v2914_v48, %v2914_v48 }
 0x2a7   : > { %v1082_v22 = vsub.f32 %v1066_v24, %v1074_v44  ;;  %v1078_v37 = vmul.f32 %v2870_v36, %v2870_v36  ;;  %v843_v24 = vmul.f32 0.0625, %v2804_v52  ;;  %v1077_v52 = vmul.f32 %v2905_v11, %v2905_v11 }
 0x2a9   : > { %526 = vadd.xlane.f32.xlu0 %v525_v61  ;;  %589 = vadd.xlane.f32.xlu1 %v588_v49  ;;  %v2862_v61 = vmul.f32 0.0625, %v2751_v7  ;;  %v1072_v49 = vmul.f32 %v2857_v42, %v2857_v42  ;;  %v1098_v5 = vadd.f32 1e-06, %v1082_v22 }
 0x2ab   : > { %v852_v7 = vmul.f32 %v2862_v61, %v2862_v61  ;;  %2201 = vrsqrt.f32 %v1098_v5 }
 0x2ad   : > { %592 = vadd.xlane.f32.xlu0 %v591_v45  ;;  %595 = vadd.xlane.f32.xlu1 %v594_v14  ;;  %v844_v45 = vmul.f32 0.0625, %v2784_v53  ;;  %v1081_v14 = vsub.f32 %v1065_v54, %v1073_v40  ;;  %v1070_v53 = vmul.f32 0.0625, %v2786_v58 }
 0x2af   : > { %v860_v33 = vsub.f32 %v844_v45, %v852_v7  ;;  %v2924_v45 = vmul.f32 0.0625, %v2828_v0  ;;  %v1299_v0 = vmul.f32 %v2921_v18, %v2921_v18 }
 0x2b1   : > { %598 = vadd.xlane.f32.xlu0 %v597_v56  ;;  %529 = vadd.xlane.f32.xlu1 %v528_v21  ;;  %v1080_v56 = vsub.f32 %v1064_v31, %v1072_v49  ;;  %v2880_v21 = vmul.f32 0.0625, %v2778_v41  ;;  %v876_v34 = vadd.f32 1e-06, %v860_v33 }
 0x2b3   : > { %v1096_v58 = vadd.f32 1e-06, %v1080_v56  ;;  %v2200_v56 = vpop.eup %2199 }
 0x2b5   : > { %535 = vadd.xlane.f32.xlu1 %v534_v26  ;;  %532 = vadd.xlane.f32.xlu0 %v531_v3  ;;  %v842_v26 = vmul.f32 0.0625, %v2796_v12  ;;  %v1097_v3 = vadd.f32 1e-06, %v1081_v14  ;;  %v1076_v12 = vmul.f32 %v2880_v21, %v2880_v21 }
 0x2b7   : > { %2203 = vrsqrt.f32 %v1097_v3 }
 0x2b8   : > { %2205 = vrsqrt.f32 %v1096_v58  ;;  %v1300_v58 = vmul.f32 %v2924_v45, %v2924_v45 }
 0x2b9   : > { %538 = vadd.xlane.f32.xlu0 %v537_v38  ;;  %601 = vadd.xlane.f32.xlu1 %v600_v10  ;;  %v2890_v10 = vmul.f32 0.0625, %v2788_v59  ;;  %v1071_v59 = vmul.f32 0.0625, %v2798_v47  ;;  %v1069_v47 = vmul.f32 0.0625, %v2810_v55  ;;  %2207 = vrsqrt.f32 %v876_v34 }
 0x2bb   : > { %v1079_v6 = vmul.f32 %v2890_v10, %v2890_v10 }
 0x2bd   : > { %604 = vadd.xlane.f32.xlu0 %v603_v28  ;;  %607 = vadd.xlane.f32.xlu1 %v606_v13  ;;  %v1086_v28 = vsub.f32 %v1070_v53, %v1078_v37  ;;  %v2899_v13 = vmul.f32 0.0625, %v2792_v63  ;;  %v1087_v31 = vsub.f32 %v1071_v59, %v1079_v6  ;;  %v1085_v53 = vsub.f32 %v1069_v47, %v1077_v52  ;;  %v2202_v37 = vpop.eup %2201 }
 0x2be   : > { %v1089_v6 = vsub.f32 %v2433_v23, %v2852_v25 }
 0x2bf   : > { %v1102_v54 = vadd.f32 1e-06, %v1086_v28  ;;  %v851_v22 = vmul.f32 %v2899_v13, %v2899_v13 }
 0x2c1   : > { %610 = vadd.xlane.f32.xlu0 %v609_v50  ;;  %v858_v50 = vsub.f32 %v842_v26, %v850_v39  ;;  %v859_v49 = vsub.f32 %v843_v24, %v851_v22  ;;  %2209 = vrsqrt.f32 %v1102_v54  ;;  %v1103_v26 = vadd.f32 1e-06, %v1087_v31  ;;  %v2204_v28 = vpop.eup %2203 }
 0x2c2   : > { %v2206_v34 = vpop.eup %2205  ;;  %v1088_v54 = vsub.f32 %v2421_v17, %v2857_v42  ;;  %v2953_v25 = vmul.f32 %v2204_v28, %v1089_v6 }
 0x2c3   : > { %v874_v40 = vadd.f32 1e-06, %v858_v50  ;;  %v2208_v47 = vpop.eup %2207 }
 0x2c4   : > { %v2955_v52 = vmul.f32 %v2206_v34, %v1088_v54 }
 0x2c5   : > { %2211 = vrsqrt.f32 %v874_v40 }
 0x2cd   : > { %v1268_v30 = vpop.xlane.xlu0 %1267 }
 0x2ce   : > { %668 = vrot.lane.b32.xlu1 %v2749_v1, %s2335_s20  ;;  %v1068_v1 = vmul.f32 0.0625, %v2790_v60  ;;  %v853_v60 = vmul.f32 %v2884_v8, %v2884_v8  ;;  %v1290_v14 = vmul.f32 0.0625, %v1268_v30 }
 0x2d0   : > { %v1084_v2 = vsub.f32 %v1068_v1, %v1076_v12  ;;  %v861_v44 = vsub.f32 %v845_v51, %v853_v60  ;;  %v875_v1 = vadd.f32 1e-06, %v859_v49  ;;  %v1101_v51 = vadd.f32 1e-06, %v1085_v53 }
 0x2d1   : > { %v1271_v41 = vpop.xlane.xlu1 %1270  ;;  %v1274_v38 = vpop.xlane.xlu0 %1273  ;;  %v1091_v60 = vsub.f32 %v2425_v20, %v2843_v16  ;;  %v1094_v49 = vsub.f32 %v2451_v27, %v2870_v36 }
 0x2d2   : > { %v1100_v55 = vadd.f32 1e-06, %v1084_v2  ;;  %v877_v7 = vadd.f32 1e-06, %v861_v44  ;;  %v1291_v33 = vmul.f32 0.0625, %v1271_v41  ;;  %v1292_v3 = vmul.f32 0.0625, %v1274_v38 }
 0x2d3   : > { %v1090_v2 = vsub.f32 %v2414_v15, %v2847_v9  ;;  %v2949_v16 = vmul.f32 %v2200_v56, %v1091_v60  ;;  %v1092_v56 = vsub.f32 %v2453_v29, %v2880_v21  ;;  %v869_v21 = vsub.f32 %v2461_v32, %v2884_v8 }
 0x2d4   : > { %2213 = vrsqrt.f32 %v1100_v55  ;;  %v1307_v38 = vsub.f32 %v1291_v33, %v1299_v0  ;;  %v1308_v59 = vsub.f32 %v1292_v3, %v1300_v58  ;;  %v868_v55 = vsub.f32 %v2451_v27, %v2862_v61 }
 0x2d5   : > { %v760_v43 = vpop.xlane.xlu1 %759  ;;  %v1277_v63 = vpop.xlane.xlu0 %1276  ;;  %2215 = vrsqrt.f32 %v877_v7  ;;  %v2951_v40 = vmul.f32 %v2202_v37, %v1090_v2 }
 0x2d6   : > { %v1293_v30 = vmul.f32 0.0625, %v1277_v63  ;;  %2217 = vrsqrt.f32 %v1103_v26  ;;  %v1323_v22 = vadd.f32 1e-06, %v1307_v38  ;;  %v2947_v31 = vmul.f32 0.0625, %v760_v43 }
 0x2d7   : > { %679 = vrot.lane.b32.xlu0 %v2760_v4, %s2335_s20  ;;  %v2927_v4 = vmul.f32 0.0625, %v2834_v19  ;;  %v1306_v19 = vsub.f32 %v1290_v14, %v1298_v57  ;;  %2219 = vrsqrt.f32 %v875_v1  ;;  %v1324_v9 = vadd.f32 1e-06, %v1308_v59  ;;  %v2210_v14 = vpop.eup %2209 }
 0x2d8   : > { %2221 = vrsqrt.f32 %v1101_v51  ;;  %v866_v43 = vsub.f32 %v2453_v29, %v2875_v46  ;;  %v2212_v26 = vpop.eup %2211  ;;  %v846_v61 = vmul.f32 %v2947_v31, %v2947_v31  ;;  %v1095_v46 = vsub.f32 %v2461_v32, %v2890_v10 }
 0x2d9   : > { %v1224_v5 = vpop.xlane.xlu1 %1223  ;;  %v763_v62 = vpop.xlane.xlu0 %762  ;;  %v1301_v12 = vmul.f32 %v2927_v4, %v2927_v4  ;;  %v1322_v24 = vadd.f32 1e-06, %v1306_v19  ;;  %v2977_v0 = vmul.f32 %v2208_v47, %v868_v55  ;;  %v2981_v58 = vmul.f32 %v2210_v14, %v1094_v49 }
 0x2da   : > { %v2965_v7 = vmul.f32 0.0625, %v1224_v5  ;;  %v2969_v57 = vmul.f32 0.0625, %v763_v62  ;;  %v867_v5 = vsub.f32 %v2465_v35, %v2899_v13  ;;  %v890_v34 = vmul.f32 %v2212_v26, %v866_v43 }
 0x2db   : > { %v1309_v50 = vsub.f32 %v1293_v30, %v1301_v12  ;;  %2223 = vrsqrt.f32 %v1322_v24  ;;  %v1093_v30 = vsub.f32 %v2465_v35, %v2905_v11  ;;  %v1315_v47 = vsub.f32 %v2433_v23, %v2921_v18 }
 0x2dc   : > { %2225 = vrsqrt.f32 %v1323_v22  ;;  %v1302_v10 = vmul.f32 %v2965_v7, %v2965_v7  ;;  %v847_v12 = vmul.f32 %v2969_v57, %v2969_v57  ;;  %v1316_v18 = vsub.f32 %v2414_v15, %v2924_v45 }
 0x2dd   : > { %v766_v39 = vpop.xlane.xlu1 %765  ;;  %v1227_v41 = vpop.xlane.xlu0 %1226  ;;  %v1325_v42 = vadd.f32 1e-06, %v1309_v50  ;;  %2227 = vrsqrt.f32 %v1324_v9  ;;  %v863_v45 = vsub.f32 %v2433_v23, %v2969_v57 }
 0x2de   : > { %v2214_v3 = vpop.eup %2213  ;;  %v2985_v19 = vmul.f32 0.0625, %v766_v39  ;;  %v2987_v8 = vmul.f32 0.0625, %v1227_v41  ;;  %v1314_v39 = vsub.f32 %v2421_v17, %v2914_v48 }
 0x2df   : > { %v2216_v37 = vpop.eup %2215  ;;  %2229 = vrsqrt.f32 %v1325_v42  ;;  %v2991_v60 = vmul.f32 %v2214_v3, %v1092_v56 }
 0x2e0   : > { %v2218_v1 = vpop.eup %2217  ;;  %v2993_v50 = vmul.f32 %v2216_v37, %v869_v21  ;;  %v848_v54 = vmul.f32 %v2985_v19, %v2985_v19  ;;  %v1303_v22 = vmul.f32 %v2987_v8, %v2987_v8  ;;  %v862_v37 = vsub.f32 %v2421_v17, %v2947_v31 }
 0x2e1   : > { %v2943_v63 = vpop.xlane.xlu1 %1229  ;;  %v769_v44 = vpop.xlane.xlu0 %768  ;;  %v2997_v41 = vmul.f32 %v2218_v1, %v1095_v46  ;;  %v864_v31 = vsub.f32 %v2414_v15, %v2985_v19 }
 0x2e2   : > { %v2220_v59 = vpop.eup %2219  ;;  %v3005_v9 = vmul.f32 0.0625, %v769_v44  ;;  %v3012_v3 = vmul.f32 0.0625, %v2943_v63 }
 0x2e3   : > { %v2222_v6 = vpop.eup %2221 }
 0x2e4   : > { %v1117_v26 = vmul.f32 %v2222_v6, %v1093_v30  ;;  %v849_v1 = vmul.f32 %v3005_v9, %v3005_v9  ;;  %v865_v6 = vsub.f32 %v2425_v20, %v3005_v9 }
 0x2e5   : > { %v816_v53 = vpop.xlane.xlu1 %815  ;;  %v1233_v33 = vpop.xlane.xlu0 %1232 }
 0x2e6   : > { %v838_v36 = vmul.f32 0.0625, %v816_v53  ;;  %v2224_v56 = vpop.eup %2223  ;;  %v891_v53 = vmul.f32 %v2220_v59, %v867_v5  ;;  %v1318_v5 = vsub.f32 %v2453_v29, %v2965_v7  ;;  %v3020_v30 = vmul.f32 0.0625, %v1233_v33 }
 0x2e7   : > { %v1319_v7 = vsub.f32 %v2465_v35, %v2987_v8 }
 0x2e8   : > { %v854_v62 = vsub.f32 %v838_v36, %v846_v61  ;;  %v1317_v61 = vsub.f32 %v2425_v20, %v2927_v4  ;;  %v2226_v36 = vpop.eup %2225 }
 0x2e9   : > { %v1280_v13 = vpop.xlane.xlu1 %1279  ;;  %v819_v51 = vpop.xlane.xlu0 %818 }
 0x2ea   : > { %v870_v38 = vadd.f32 1e-06, %v854_v62  ;;  %v1294_v28 = vmul.f32 0.0625, %v1280_v13  ;;  %v839_v11 = vmul.f32 0.0625, %v819_v51  ;;  %v2228_v21 = vpop.eup %2227  ;;  %v3026_v51 = vmul.f32 %v2224_v56, %v1314_v39 }
 0x2eb   : > { %v2230_v63 = vpop.eup %2229  ;;  %v1320_v39 = vsub.f32 %v2451_v27, %v3012_v3 }
 0x2ec   : > { %2231 = vrsqrt.f32 %v870_v38  ;;  %v1310_v2 = vsub.f32 %v1294_v28, %v1302_v10  ;;  %v855_v24 = vsub.f32 %v839_v11, %v847_v12  ;;  %v3032_v12 = vmul.f32 %v2226_v36, %v1315_v47 }
 0x2ed   : > { %v822_v55 = vpop.xlane.xlu1 %821  ;;  %v1283_v49 = vpop.xlane.xlu0 %1282  ;;  %v3034_v38 = vmul.f32 %v2228_v21, %v1316_v18  ;;  %v1304_v28 = vmul.f32 %v3012_v3, %v3012_v3  ;;  %v3038_v59 = vmul.f32 %v2230_v63, %v1317_v61 }
 0x2ee   : > { %v1326_v48 = vadd.f32 1e-06, %v1310_v2  ;;  %v871_v42 = vadd.f32 1e-06, %v855_v24  ;;  %v840_v14 = vmul.f32 0.0625, %v822_v55  ;;  %v1295_v43 = vmul.f32 0.0625, %v1283_v49 }
 0x2ef   : > { %v1305_v2 = vmul.f32 %v3020_v30, %v3020_v30 }
 0x2f0   : > { %2233 = vrsqrt.f32 %v1326_v48  ;;  %v856_v44 = vsub.f32 %v840_v14, %v848_v54  ;;  %v1311_v46 = vsub.f32 %v1295_v43, %v1303_v22  ;;  %v1321_v22 = vsub.f32 %v2461_v32, %v3020_v30 }
 0x2f1   : > { %v3022_v4 = vpop.permute.xlu1 %894  ;;  %v825_v62 = vpop.xlane.xlu0 %824  ;;  %2235 = vrsqrt.f32 %v871_v42 }
 0x2f2   : > { %v872_v10 = vadd.f32 1e-06, %v856_v44  ;;  %v841_v13 = vmul.f32 0.0625, %v825_v62  ;;  %v1327_v33 = vadd.f32 1e-06, %v1311_v46  ;;  %v901_v48 = vmul.f32 %v3022_v4, %v890_v34 }
 0x2f3   : > { %v902_v42 = vmul.f32 %v3022_v4, %v891_v53  ;;  %v903_v14 = vmul.f32 %v3022_v4, %v2977_v0  ;;  %v904_v34 = vmul.f32 %v3022_v4, %v2993_v50 }
 0x2f4   : > { %v857_v11 = vsub.f32 %v841_v13, %v849_v1  ;;  %2237 = vrsqrt.f32 %v872_v10 }
 0x2f5   : > { %v1121_v24 = vpop.permute.xlu1 %1120  ;;  %v1286_v47 = vpop.xlane.xlu0 %1285  ;;  %2239 = vrsqrt.f32 %v1327_v33 }
 0x2f6   : > { %v2232_v54 = vpop.eup %2231  ;;  %v873_v55 = vadd.f32 1e-06, %v857_v11  ;;  %v1296_v49 = vmul.f32 0.0625, %v1286_v47  ;;  %v1123_v18 = vmul.f32 %v1121_v24, %v2955_v52  ;;  %v1124_v61 = vmul.f32 %v1121_v24, %v2953_v25 }
 0x2f7   : > { %v886_v43 = vmul.f32 %v2232_v54, %v862_v37  ;;  %v1127_v46 = vmul.f32 %v1121_v24, %v2991_v60  ;;  %v1128_v21 = vmul.f32 %v1121_v24, %v1117_v26  ;;  %v1125_v1 = vmul.f32 %v1121_v24, %v2951_v40 }
 0x2f8   : > { %v1312_v56 = vsub.f32 %v1296_v49, %v1304_v28  ;;  %2241 = vrsqrt.f32 %v873_v55  ;;  %v1126_v10 = vmul.f32 %v1121_v24, %v2949_v16  ;;  %v1129_v50 = vmul.f32 %v1121_v24, %v2981_v58 }
 0x2f9   : > { %v3054_v36 = vpop.permute.xlu1 %1131  ;;  %v1289_v44 = vpop.xlane.xlu0 %1288  ;;  %v897_v13 = vmul.f32 %v3022_v4, %v886_v43  ;;  %v3068_v33 = vmul.f32 %v1121_v24, %v2997_v41 }
 0x2fa   : > { %v2234_v53 = vpop.eup %2233  ;;  %v1328_v62 = vadd.f32 1e-06, %v1312_v56  ;;  %v1297_v63 = vmul.f32 0.0625, %v1289_v44  ;;  %v1134_v0 = vadd.f32 %v3054_v36, %v1123_v18  ;;  %v1135_v37 = vadd.f32 %v3054_v36, %v1124_v61 }
 0x2fb   : > { %v1138_v52 = vadd.f32 %v3054_v36, %v1127_v46  ;;  %v1139_v25 = vadd.f32 %v3054_v36, %v1128_v21  ;;  %v2236_v60 = vpop.eup %2235  ;;  %v3070_v28 = vmul.f32 %v2234_v53, %v1318_v5  ;;  %v1136_v40 = vadd.f32 %v3054_v36, %v1125_v1 }
 0x2fc   : > { %v1313_v26 = vsub.f32 %v1297_v63, %v1305_v2  ;;  %v1150_v54 = vmul.f32 0.70710677, %v1134_v0  ;;  %v1151_v55 = vmul.f32 0.70710677, %v1135_v37  ;;  %2243 = vrsqrt.f32 %v1328_v62 }
 0x2fd   : > { %v3072_v11 = vpop.permute.xlu1 %1346  ;;  %v3074_v47 = vpop.permute.xlu0 %905  ;;  %v1154_v2 = vmul.f32 0.70710677, %v1138_v52  ;;  %v887_v58 = vmul.f32 %v2236_v60, %v863_v45  ;;  %v1155_v41 = vmul.f32 0.70710677, %v1139_v25  ;;  %v1142_v43 = vmul.f32 0.5, %v1134_v0 }
 0x2fe   : > { %v1329_v16 = vadd.f32 1e-06, %v1313_v26  ;;  %v912_v49 = vadd.f32 %v3074_v47, %v901_v48  ;;  %2245 = verf.f32 %v1150_v54  ;;  %v913_v5 = vadd.f32 %v3074_v47, %v902_v42  ;;  %v2238_v24 = vpop.eup %2237 }
 0x2ff   : > { %v3082_v56 = vmul.f32 0.5, %v1135_v37  ;;  %v2240_v61 = vpop.eup %2239  ;;  %v3086_v46 = vmul.f32 0.5, %v1138_v52  ;;  %v1349_v57 = vmul.f32 %v3072_v11, %v3026_v51  ;;  %v1350_v45 = vmul.f32 %v3072_v11, %v3032_v12 }
 0x300   : > { %2247 = vrsqrt.f32 %v1329_v16  ;;  %v928_v18 = vmul.f32 0.70710677, %v912_v49  ;;  %v929_v48 = vmul.f32 0.70710677, %v913_v5  ;;  %v914_v42 = vadd.f32 %v3074_v47, %v903_v14 }
 0x301   : > { %v3084_v44 = vpop.permute.xlu1 %1357  ;;  %2249 = verf.f32 %v1151_v55  ;;  %v915_v21 = vadd.f32 %v3074_v47, %v904_v34  ;;  %v888_v62 = vmul.f32 %v2238_v24, %v864_v31  ;;  %v1147_v63 = vmul.f32 0.5, %v1139_v25 }
 0x302   : > { %2251 = verf.f32 %v1154_v2  ;;  %v2242_v53 = vpop.eup %2241  ;;  %v1360_v0 = vadd.f32 %v3084_v44, %v1349_v57  ;;  %v3101_v51 = vmul.f32 %v2240_v61, %v1319_v7  ;;  %v1361_v12 = vadd.f32 %v3084_v44, %v1350_v45 }
 0x303   : > { %2253 = verf.f32 %v1155_v41  ;;  %v1137_v14 = vadd.f32 %v3054_v36, %v1126_v10  ;;  %v920_v34 = vmul.f32 0.5, %v912_v49  ;;  %v930_v52 = vmul.f32 0.70710677, %v914_v42 }
 0x304   : > { %2255 = verf.f32 %v928_v18  ;;  %v1376_v37 = vmul.f32 0.70710677, %v1360_v0  ;;  %v889_v19 = vmul.f32 %v2242_v53, %v865_v6  ;;  %v921_v31 = vmul.f32 0.5, %v913_v5 }
 0x305   : > { %2257 = verf.f32 %v929_v48  ;;  %v1377_v25 = vmul.f32 0.70710677, %v1361_v12  ;;  %v931_v1 = vmul.f32 0.70710677, %v915_v21  ;;  %v3108_v8 = vmul.f32 0.5, %v914_v42 }
 0x306   : > { %2259 = verf.f32 %v1376_v37  ;;  %v3110_v7 = vmul.f32 0.5, %v915_v21  ;;  %v1152_v60 = vmul.f32 0.70710677, %v1136_v40  ;;  %v2244_v26 = vpop.eup %2243  ;;  %v1153_v10 = vmul.f32 0.70710677, %v1137_v14 }
 0x307   : > { %2261 = verf.f32 %v1377_v25  ;;  %v898_v54 = vmul.f32 %v3022_v4, %v887_v58  ;;  %v908_v55 = vadd.f32 %v3074_v47, %v897_v13  ;;  %v1368_v2 = vmul.f32 0.5, %v1360_v0 }
 0x308   : > { %v2246_v16 = vpop.eup %2245  ;;  %v1369_v9 = vmul.f32 0.5, %v1361_v12  ;;  %2263 = verf.f32 %v930_v52  ;;  %v3115_v6 = vadd.f32 %v3054_v36, %v1129_v50  ;;  %v3122_v24 = vadd.f32 %v3054_v36, %v3068_v33 }
 0x309   : > { %v1166_v41 = vadd.f32 1.0, %v2246_v16  ;;  %2265 = verf.f32 %v931_v1  ;;  %v3118_v5 = vadd.f32 %v3074_v47, %v898_v54  ;;  %v3127_v13 = vmul.f32 %v2244_v26, %v1320_v39 }
 0x30a   : > { %v2248_v49 = vpop.eup %2247  ;;  %v3129_v18 = vmul.f32 0.5, %v1136_v40  ;;  %2267 = verf.f32 %v1152_v60  ;;  %v924_v50 = vmul.f32 0.70710677, %v908_v55  ;;  %v3131_v45 = vmul.f32 0.5, %v1137_v14 }
 0x30b   : > { %v2250_v58 = vpop.eup %2249  ;;  %v1174_v57 = vmul.f32 %v1166_v41, %v1142_v43  ;;  %2269 = verf.f32 %v1153_v10  ;;  %v925_v36 = vmul.f32 0.70710677, %v3118_v5  ;;  %v899_v33 = vmul.f32 %v3022_v4, %v888_v62 }
 0x30c   : > { %v2252_v61 = vpop.eup %2251  ;;  %v1167_v48 = vadd.f32 1.0, %v2250_v58  ;;  %2271 = verf.f32 %v924_v50  ;;  %v1156_v53 = vmul.f32 0.70710677, %v3115_v6  ;;  %v1157_v0 = vmul.f32 0.70710677, %v3122_v24 }
 0x30d   : > { %v2254_v42 = vpop.eup %2253  ;;  %v1170_v21 = vadd.f32 1.0, %v2252_v61  ;;  %2273 = verf.f32 %v925_v36  ;;  %v900_v37 = vmul.f32 %v3022_v4, %v889_v19  ;;  %v916_v19 = vmul.f32 0.5, %v908_v55 }
 0x30e   : > { %v2256_v3 = vpop.eup %2255  ;;  %v1175_v39 = vmul.f32 %v1167_v48, %v3082_v56  ;;  %v1171_v40 = vadd.f32 1.0, %v2254_v42  ;;  %2275 = verf.f32 %v1156_v53  ;;  %v3141_v56 = vadd.f32 %v3074_v47, %v899_v33 }
 0x30f   : > { %v2258_v12 = vpop.eup %2257  ;;  %v1178_v43 = vmul.f32 %v1170_v21, %v3086_v46  ;;  %v944_v14 = vadd.f32 1.0, %v2256_v3  ;;  %2277 = verf.f32 %v1157_v0  ;;  %v3144_v26 = vadd.f32 %v3074_v47, %v900_v37 }
 0x310   : > { %v1182_v52 = vpack.c.bf16 %v1175_v39, %v1174_v57  ;;  %v1179_v25 = vmul.f32 %v1171_v40, %v1147_v63  ;;  %v945_v1 = vadd.f32 1.0, %v2258_v12  ;;  %v2260_v62 = vpop.eup %2259  ;;  %v1345_v46 = vmul.f32 %v2248_v49, %v1321_v22 }
 0x311   : > { %v952_v60 = vmul.f32 %v944_v14, %v920_v34  ;;  %v2262_v10 = vpop.eup %2261  ;;  %v1392_v63 = vadd.f32 1.0, %v2260_v62  ;;  %v926_v41 = vmul.f32 0.70710677, %v3141_v56  ;;  %v1351_v58 = vmul.f32 %v3072_v11, %v3034_v38 }
 0x312   : > { %1428 = vrot.lane.b32.xlu0 %v1182_v52, %s2340_s28  ;;  %v953_v4 = vmul.f32 %v945_v1, %v921_v31  ;;  %v2264_v54 = vpop.eup %2263  ;;  %v1184_v16 = vpack.c.bf16 %v1179_v25, %v1178_v43  ;;  %v1393_v34 = vadd.f32 1.0, %v2262_v10  ;;  %v927_v30 = vmul.f32 0.70710677, %v3144_v26 }
 0x313   : > { %v2266_v47 = vpop.eup %2265  ;;  %v1400_v61 = vmul.f32 %v1392_v63, %v1368_v2  ;;  %v946_v48 = vadd.f32 1.0, %v2264_v54  ;;  %2279 = verf.f32 %v926_v41  ;;  %v1352_v31 = vmul.f32 %v3072_v11, %v3038_v59 }
 0x314   : > { %v958_v50 = vpack.c.bf16 %v953_v4, %v952_v60  ;;  %v2268_v22 = vpop.eup %2267  ;;  %v1401_v49 = vmul.f32 %v1393_v34, %v1369_v9  ;;  %v947_v57 = vadd.f32 1.0, %v2266_v47  ;;  %2281 = verf.f32 %v927_v30 }
 0x315   : > { %v2270_v55 = vpop.eup %2269  ;;  %v954_v38 = vmul.f32 %v946_v48, %v3108_v8  ;;  %v1168_v42 = vadd.f32 1.0, %v2268_v22  ;;  %v1362_v2 = vadd.f32 %v3084_v44, %v1351_v58  ;;  %v1363_v3 = vadd.f32 %v3084_v44, %v1352_v31 }
 0x316   : > { %1432 = vrot.lane.b32.xlu0 %v1184_v16, %s2340_s28  ;;  %1420 = vrot.lane.b32.xlu1 %v958_v50, %s2341_s11  ;;  %v2272_v21 = vpop.eup %2271  ;;  %v1408_v36 = vpack.c.bf16 %v1401_v49, %v1400_v61  ;;  %v955_v9 = vmul.f32 %v947_v57, %v3110_v7  ;;  %v1169_v33 = vadd.f32 1.0, %v2270_v55  ;;  %v917_v59 = vmul.f32 0.5, %v3118_v5 }
 0x317   : > { %v940_v39 = vadd.f32 1.0, %v2272_v21  ;;  %v1148_v40 = vmul.f32 0.5, %v3115_v6  ;;  %v1378_v53 = vmul.f32 0.70710677, %v1362_v2  ;;  %v2274_v0 = vpop.eup %2273  ;;  %v1176_v8 = vmul.f32 %v1168_v42, %v3129_v18 }
 0x318   : > { %v959_v12 = vpack.c.bf16 %v955_v9, %v954_v38  ;;  %v1177_v43 = vmul.f32 %v1169_v33, %v3131_v45  ;;  %v1379_v14 = vmul.f32 0.70710677, %v1363_v3  ;;  %v2276_v37 = vpop.eup %2275  ;;  %v941_v7 = vadd.f32 1.0, %v2274_v0  ;;  %v2198_v33 = vld [vmem:[%s3381_s5] sm:$0xff]  }
 0x319   : > { %v948_v52 = vmul.f32 %v940_v39, %v916_v19  ;;  %2283 = verf.f32 %v1378_v53  ;;  %v1353_v5 = vmul.f32 %v3072_v11, %v3070_v28  ;;  %v2278_v25 = vpop.eup %2277  ;;  %v1149_v6 = vmul.f32 0.5, %v3122_v24  ;;  %2146 = vmatprep.subr.bf16.mxu0 %v2198_v33  ;;  %2180 = vmatprep.subr.bf16.mxu1 %v2198_v33 }
 0x31a   : > { %1440 = vrot.lane.b32.xlu0 %v1408_v36, %s2339_s26  ;;  %1422 = vrot.lane.b32.xlu1 %v959_v12, %s2341_s11  ;;  %v1172_v1 = vadd.f32 1.0, %v2276_v37  ;;  %2285 = verf.f32 %v1379_v14  ;;  %v1354_v18 = vmul.f32 %v3072_v11, %v3101_v51  ;;  %v949_v45 = vmul.f32 %v941_v7, %v917_v59 }
 0x31b   : > { %v1173_v62 = vadd.f32 1.0, %v2278_v25  ;;  %v1364_v60 = vadd.f32 %v3084_v44, %v1353_v5  ;;  %v1355_v10 = vmul.f32 %v3072_v11, %v3127_v13  ;;  %v1183_v4 = vpack.c.bf16 %v1177_v43, %v1176_v8  ;;  %2147 = vmatpush3.bf16.msra.mxu0 %v2198_v33  ;;  %2181 = vmatpush3.bf16.msra.mxu1 %v2198_v33 }
 0x31c   : > { %v1180_v63 = vmul.f32 %v1172_v1, %v1148_v40  ;;  %v1365_v28 = vadd.f32 %v3084_v44, %v1354_v18  ;;  %v1356_v19 = vmul.f32 %v3072_v11, %v1345_v46  ;;  %v956_v54 = vpack.c.bf16 %v949_v45, %v948_v52 }
 0x31d   : > { %v1181_v24 = vmul.f32 %v1173_v62, %v1149_v6  ;;  %v1380_v16 = vmul.f32 0.70710677, %v1364_v60  ;;  %v2280_v34 = vpop.eup %2279  ;;  %v1366_v41 = vadd.f32 %v3084_v44, %v1355_v10  ;;  %v918_v13 = vmul.f32 0.5, %v3141_v56 }
 0x31e   : > { %1430 = vrot.lane.b32.xlu1 %v1183_v4, %s2340_s28  ;;  %v1381_v51 = vmul.f32 0.70710677, %v1365_v28  ;;  %v1367_v58 = vadd.f32 %v3084_v44, %v1356_v19  ;;  %v2282_v47 = vpop.eup %2281  ;;  %1416 = vrot.lane.b32.xlu0 %v956_v54, %s2341_s11  ;;  %v942_v50 = vadd.f32 1.0, %v2280_v34  ;;  %v919_v11 = vmul.f32 0.5, %v3144_v26 }
 0x31f   : > { %2287 = verf.f32 %v1380_v16  ;;  %v1185_v61 = vpack.c.bf16 %v1181_v24, %v1180_v63  ;;  %v943_v46 = vadd.f32 1.0, %v2282_v47  ;;  %v1382_v48 = vmul.f32 0.70710677, %v1366_v41 }
 0x320   : > { %2289 = verf.f32 %v1381_v51  ;;  %v1383_v30 = vmul.f32 0.70710677, %v1367_v58  ;;  %v950_v22 = vmul.f32 %v942_v50, %v918_v13  ;;  %v1370_v55 = vmul.f32 0.5, %v1362_v2 }
 0x321   : > { %v951_v49 = vmul.f32 %v943_v46, %v919_v11  ;;  %2291 = verf.f32 %v1382_v48  ;;  %v1371_v56 = vmul.f32 0.5, %v1363_v3  ;;  %v1372_v39 = vmul.f32 0.5, %v1364_v60 }
 0x322   : > { %1434 = vrot.lane.b32.xlu1 %v1185_v61, %s2340_s28  ;;  %2293 = verf.f32 %v1383_v30  ;;  %v1373_v2 = vmul.f32 0.5, %v1365_v28  ;;  %v1374_v7 = vmul.f32 0.5, %v1366_v41  ;;  %v1375_v52 = vmul.f32 0.5, %v1367_v58 }
 0x323   : > { %v2284_v57 = vpop.eup %2283  ;;  %v957_v31 = vpack.c.bf16 %v951_v49, %v950_v22 }
 0x324   : > { %v2286_v44 = vpop.eup %2285  ;;  %v1394_v38 = vadd.f32 1.0, %v2284_v57 }
 0x325   : > { %v1395_v42 = vadd.f32 1.0, %v2286_v44  ;;  %1418 = vrot.lane.b32.xlu0 %v957_v31, %s2341_s11 }
 0x326   : > { %v1402_v26 = vmul.f32 %v1394_v38, %v1370_v55 }
 0x327   : > { %v1403_v21 = vmul.f32 %v1395_v42, %v1371_v56 }
 0x329   : > { %v2288_v36 = vpop.eup %2287  ;;  %v1409_v9 = vpack.c.bf16 %v1403_v21, %v1402_v26 }
 0x32a   : > { %v2290_v59 = vpop.eup %2289  ;;  %v1396_v40 = vadd.f32 1.0, %v2288_v36 }
 0x32b   : > { %1442 = vrot.lane.b32.xlu1 %v1409_v9, %s2339_s26  ;;  %v1397_v53 = vadd.f32 1.0, %v2290_v59  ;;  %v2292_v0 = vpop.eup %2291 }
 0x32c   : > { %v1404_v3 = vmul.f32 %v1396_v40, %v1372_v39  ;;  %v2294_v43 = vpop.eup %2293  ;;  %v1398_v14 = vadd.f32 1.0, %v2292_v0 }
 0x32d   : > { %v1405_v12 = vmul.f32 %v1397_v53, %v1373_v2  ;;  %v1399_v5 = vadd.f32 1.0, %v2294_v43 }
 0x32e   : > { %v518_v8 = vpop.xlane.xlu0 %517  ;;  %v1406_v25 = vmul.f32 %v1398_v14, %v1374_v7 }
 0x32f   : > { %v1410_v37 = vpack.c.bf16 %v1405_v12, %v1404_v3  ;;  %v1407_v6 = vmul.f32 %v1399_v5, %v1375_v52  ;;  %v540_v34 = vmul.f32 0.0625, %v518_v8 }
 0x331   : > { %1444 = vrot.lane.b32.xlu1 %v1410_v37, %s2339_s26  ;;  %v1411_v18 = vpack.c.bf16 %v1407_v6, %v1406_v25  ;;  %v620_v11 = vmul.f32 %v540_v34, %v540_v34 }
 0x332   : > { %v524_v1 = vpop.xlane.xlu0 %523  ;;  %v521_v62 = vpop.xlane.xlu1 %520 }
 0x333   : > { %v541_v16 = vmul.f32 0.0625, %v521_v62  ;;  %v3192_v58 = vmul.f32 0.0625, %v524_v1 }
 0x335   : > { %1446 = vrot.lane.b32.xlu1 %v1411_v18, %s2339_s26  ;;  %v621_v50 = vmul.f32 %v541_v16, %v541_v16  ;;  %v622_v57 = vmul.f32 %v3192_v58, %v3192_v58 }
 0x336   : > { %v527_v45 = vpop.xlane.xlu0 %526  ;;  %v590_v10 = vpop.xlane.xlu1 %589 }
 0x337   : > { %v543_v51 = vmul.f32 0.0625, %v527_v45  ;;  %v612_v47 = vmul.f32 0.0625, %v590_v10  ;;  %v637_v45 = vsub.f32 %v2433_v23, %v541_v16 }
 0x339   : > { %v623_v30 = vmul.f32 %v543_v51, %v543_v51  ;;  %v628_v44 = vsub.f32 %v612_v47, %v620_v11 }
 0x33a   : > { %v593_v60 = vpop.xlane.xlu0 %592  ;;  %v596_v63 = vpop.xlane.xlu1 %595 }
 0x33b   : > { %v613_v41 = vmul.f32 0.0625, %v593_v60  ;;  %v614_v46 = vmul.f32 0.0625, %v596_v63  ;;  %v644_v33 = vadd.f32 1e-06, %v628_v44  ;;  %v636_v60 = vsub.f32 %v2421_v17, %v540_v34 }
 0x33d   : > { %v629_v22 = vsub.f32 %v613_v41, %v621_v50  ;;  %v630_v56 = vsub.f32 %v614_v46, %v622_v57 }
 0x33e   : > { %v599_v4 = vpop.xlane.xlu0 %598  ;;  %v530_v19 = vpop.xlane.xlu1 %529 }
 0x33f   : > { %v615_v61 = vmul.f32 0.0625, %v599_v4  ;;  %v544_v31 = vmul.f32 0.0625, %v530_v19  ;;  %v645_v26 = vadd.f32 1e-06, %v629_v22  ;;  %v646_v0 = vadd.f32 1e-06, %v630_v56 }
 0x340   : > { %v639_v4 = vsub.f32 %v2425_v20, %v543_v51  ;;  %v638_v19 = vsub.f32 %v2414_v15, %v3192_v58 }
 0x341   : > { %v631_v55 = vsub.f32 %v615_v61, %v623_v30  ;;  %v624_v59 = vmul.f32 %v544_v31, %v544_v31  ;;  %2295 = vrsqrt.f32 %v645_v26  ;;  %v640_v34 = vsub.f32 %v2453_v29, %v544_v31 }
 0x342   : > { %v533_v28 = vpop.xlane.xlu0 %532  ;;  %v536_v24 = vpop.xlane.xlu1 %535  ;;  %2297 = vrsqrt.f32 %v644_v33 }
 0x343   : > { %v545_v49 = vmul.f32 0.0625, %v533_v28  ;;  %v647_v40 = vadd.f32 1e-06, %v631_v55  ;;  %v546_v2 = vmul.f32 0.0625, %v536_v24 }
 0x345   : > { %v625_v21 = vmul.f32 %v545_v49, %v545_v49  ;;  %2299 = vrsqrt.f32 %v647_v40  ;;  %v626_v14 = vmul.f32 %v546_v2, %v546_v2  ;;  %v641_v23 = vsub.f32 %v2465_v35, %v545_v49 }
 0x346   : > { %v539_v54 = vpop.xlane.xlu0 %538  ;;  %v602_v48 = vpop.xlane.xlu1 %601  ;;  %2301 = vrsqrt.f32 %v646_v0  ;;  %v642_v22 = vsub.f32 %v2451_v27, %v546_v2 }
 0x347   : > { %v616_v36 = vmul.f32 0.0625, %v602_v48  ;;  %v547_v9 = vmul.f32 0.0625, %v539_v54 }
 0x349   : > { %v632_v12 = vsub.f32 %v616_v36, %v624_v59  ;;  %v627_v8 = vmul.f32 %v547_v9, %v547_v9  ;;  %v643_v15 = vsub.f32 %v2461_v32, %v547_v9 }
 0x34a   : > { %v605_v13 = vpop.xlane.xlu0 %604  ;;  %v608_v39 = vpop.xlane.xlu1 %607 }
 0x34b   : > { %v617_v38 = vmul.f32 0.0625, %v605_v13  ;;  %v618_v43 = vmul.f32 0.0625, %v608_v39  ;;  %v648_v52 = vadd.f32 1e-06, %v632_v12  ;;  %v2296_v1 = vpop.eup %2295 }
 0x34c   : > { %v2298_v18 = vpop.eup %2297  ;;  %v661_v63 = vmul.f32 %v2296_v1, %v637_v45 }
 0x34d   : > { %v633_v53 = vsub.f32 %v617_v38, %v625_v21  ;;  %v634_v5 = vsub.f32 %v618_v43, %v626_v14  ;;  %v660_v54 = vmul.f32 %v2298_v18, %v636_v60 }
 0x34e   : > { %v611_v42 = vpop.xlane.xlu0 %610  ;;  %v669_v28 = vpop.permute.xlu1 %668 }
 0x34f   : > { %v619_v3 = vmul.f32 0.0625, %v611_v42  ;;  %v649_v37 = vadd.f32 1e-06, %v633_v53  ;;  %v650_v6 = vadd.f32 1e-06, %v634_v5  ;;  %v2300_v62 = vpop.eup %2299  ;;  %v671_v50 = vmul.f32 %v669_v28, %v660_v54 }
 0x350   : > { %v2302_v10 = vpop.eup %2301  ;;  %v663_v24 = vmul.f32 %v2300_v62, %v639_v4  ;;  %v672_v16 = vmul.f32 %v669_v28, %v661_v63 }
 0x351   : > { %v635_v7 = vsub.f32 %v619_v3, %v627_v8  ;;  %2303 = vrsqrt.f32 %v649_v37  ;;  %v662_v13 = vmul.f32 %v2302_v10, %v638_v19 }
 0x352   : > { %2305 = vrsqrt.f32 %v648_v52  ;;  %v680_v41 = vpop.permute.xlu0 %679  ;;  %v674_v51 = vmul.f32 %v669_v28, %v663_v24 }
 0x353   : > { %v651_v25 = vadd.f32 1e-06, %v635_v7  ;;  %v682_v17 = vadd.f32 %v680_v41, %v671_v50  ;;  %v683_v20 = vadd.f32 %v680_v41, %v672_v16  ;;  %v673_v48 = vmul.f32 %v669_v28, %v662_v13 }
 0x354   : > { %v685_v49 = vadd.f32 %v680_v41, %v674_v51 }
 0x355   : > { %2307 = vrsqrt.f32 %v651_v25  ;;  %v698_v57 = vmul.f32 0.70710677, %v682_v17  ;;  %v684_v44 = vadd.f32 %v680_v41, %v673_v48  ;;  %v699_v35 = vmul.f32 0.70710677, %v683_v20 }
 0x356   : > { %2309 = vrsqrt.f32 %v650_v6  ;;  %v701_v31 = vmul.f32 0.70710677, %v685_v49  ;;  %v690_v14 = vmul.f32 0.5, %v682_v17  ;;  %v691_v37 = vmul.f32 0.5, %v683_v20 }
 0x357   : > { %2311 = verf.f32 %v698_v57  ;;  %v700_v29 = vmul.f32 0.70710677, %v684_v44  ;;  %v692_v45 = vmul.f32 0.5, %v684_v44  ;;  %v693_v62 = vmul.f32 0.5, %v685_v49 }
 0x358   : > { %2313 = verf.f32 %v699_v35 }
 0x359   : > { %2315 = verf.f32 %v700_v29 }
 0x35a   : > { %2317 = verf.f32 %v701_v31 }
 0x35b   : > { %v2304_v47 = vpop.eup %2303 }
 0x35c   : > { %v2306_v61 = vpop.eup %2305  ;;  %v665_v11 = vmul.f32 %v2304_v47, %v641_v23 }
 0x35d   : > { %v664_v30 = vmul.f32 %v2306_v61, %v640_v34 }
 0x35e   : > { %v676_v38 = vmul.f32 %v669_v28, %v665_v11 }
 0x35f   : > { %v2308_v46 = vpop.eup %2307  ;;  %v675_v42 = vmul.f32 %v669_v28, %v664_v30 }
 0x360   : > { %v2310_v58 = vpop.eup %2309  ;;  %v667_v55 = vmul.f32 %v2308_v46, %v643_v15  ;;  %v687_v26 = vadd.f32 %v680_v41, %v676_v38 }
 0x361   : > { %v666_v56 = vmul.f32 %v2310_v58, %v642_v22  ;;  %v686_v36 = vadd.f32 %v680_v41, %v675_v42  ;;  %v2312_v40 = vpop.eup %2311 }
 0x362   : > { %v678_v21 = vmul.f32 %v669_v28, %v667_v55  ;;  %v703_v32 = vmul.f32 0.70710677, %v687_v26  ;;  %v2314_v2 = vpop.eup %2313  ;;  %v714_v0 = vadd.f32 1.0, %v2312_v40  ;;  %v695_v24 = vmul.f32 0.5, %v687_v26 }
 0x363   : > { %v677_v33 = vmul.f32 %v669_v28, %v666_v56  ;;  %v702_v9 = vmul.f32 0.70710677, %v686_v36  ;;  %v2316_v3 = vpop.eup %2315  ;;  %v715_v12 = vadd.f32 1.0, %v2314_v2  ;;  %v694_v23 = vmul.f32 0.5, %v686_v36 }
 0x364   : > { %v689_v27 = vadd.f32 %v680_v41, %v678_v21  ;;  %2319 = verf.f32 %v703_v32  ;;  %v2318_v8 = vpop.eup %2317  ;;  %v722_v7 = vmul.f32 %v714_v0, %v690_v14  ;;  %v716_v5 = vadd.f32 1.0, %v2316_v3 }
 0x365   : > { %v688_v59 = vadd.f32 %v680_v41, %v677_v33  ;;  %2321 = verf.f32 %v702_v9  ;;  %v723_v52 = vmul.f32 %v715_v12, %v691_v37  ;;  %v717_v25 = vadd.f32 1.0, %v2318_v8  ;;  %v3248_v12 = vld [vmem:[%s3382_s6] ss:$0 sm:$0xff] }
 0x366   : > { %v705_v39 = vmul.f32 0.70710677, %v689_v27  ;;  %v724_v4 = vmul.f32 %v716_v5, %v692_v45  ;;  %v697_v34 = vmul.f32 0.5, %v689_v27 }
 0x367   : > { %v704_v53 = vmul.f32 0.70710677, %v688_v59  ;;  %v730_v10 = vpack.c.bf16 %v723_v52, %v722_v7  ;;  %v725_v63 = vmul.f32 %v717_v25, %v693_v62  ;;  %v696_v51 = vmul.f32 0.5, %v688_v59 }
 0x368   : > { %2323 = verf.f32 %v705_v39 }
 0x369   : > { %2325 = verf.f32 %v704_v53  ;;  %v731_v50 = vpack.c.bf16 %v725_v63, %v724_v4 }
 0x36e   : > { %v2320_v6 = vpop.eup %2319 }
 0x36f   : > { %v2322_v60 = vpop.eup %2321  ;;  %v719_v28 = vadd.f32 1.0, %v2320_v6 }
 0x370   : > { %v718_v41 = vadd.f32 1.0, %v2322_v60 }
 0x371   : > { %v727_v16 = vmul.f32 %v719_v28, %v695_v24 }
 0x372   : > { %v2324_v19 = vpop.eup %2323  ;;  %v726_v17 = vmul.f32 %v718_v41, %v694_v23 }
 0x373   : > { %v2326_v47 = vpop.eup %2325  ;;  %v721_v61 = vadd.f32 1.0, %v2324_v19 }
 0x374   : > { %v720_v11 = vadd.f32 1.0, %v2326_v47  ;;  %v732_v20 = vpack.c.bf16 %v727_v16, %v726_v17 }
 0x375   : > { %v729_v46 = vmul.f32 %v721_v61, %v697_v34 }
 0x376   : > { %v728_v15 = vmul.f32 %v720_v11, %v696_v51 }
 0x378   : > { %v733_v58 = vpack.c.bf16 %v729_v46, %v728_v15 }
 0x384   : > { %v1429_v1 = vpop.permute.xlu0 %1428 }
 0x388   : > { %v1421_v43 = vpop.permute.xlu1 %1420  ;;  %v1433_v13 = vpop.permute.xlu0 %1432 }
 0x389   : > { %1473 = vrot.lane.b32.xlu0 %v1421_v43, %s2335_s20 }
 0x38c   : > { %v1423_v18 = vpop.permute.xlu1 %1422  ;;  %v1441_v48 = vpop.permute.xlu0 %1440 }
 0x38d   : > { %1477 = vrot.lane.b32.xlu0 %v1429_v1, %s2335_s20  ;;  %1475 = vrot.lane.b32.xlu1 %v1423_v18, %s2335_s20 }
 0x390   : > { %v1431_v54 = vpop.permute.xlu1 %1430  ;;  %v1417_v22 = vpop.permute.xlu0 %1416 }
 0x391   : > { %1461 = vrot.lane.b32.xlu0 %v730_v10, %s2335_s20  ;;  %1479 = vrot.lane.b32.xlu1 %v1431_v54, %s2335_s20 }
 0x394   : > { %v1435_v30 = vpop.permute.xlu1 %1434 }
 0x395   : > { %1463 = vrot.lane.b32.xlu0 %v731_v50, %s2335_s20  ;;  %1481 = vrot.lane.b32.xlu1 %v1433_v13, %s2335_s20 }
 0x397   : > { %v1419_v44 = vpop.permute.xlu0 %1418 }
 0x399   : > { %1465 = vrot.lane.b32.xlu0 %v732_v20, %s2335_s20  ;;  %1483 = vrot.lane.b32.xlu1 %v1435_v30, %s2335_s20 }
 0x39d   : > { %1467 = vrot.lane.b32.xlu0 %v733_v58, %s2335_s20  ;;  %v1443_v57 = vpop.permute.xlu1 %1442  ;;  %1485 = vrot.lane.b32.xlu1 %v1441_v48, %s2335_s20 }
 0x3a1   : > { %1469 = vrot.lane.b32.xlu0 %v1417_v22, %s2335_s20  ;;  %1487 = vrot.lane.b32.xlu1 %v1443_v57, %s2335_s20 }
 0x3a3   : > { %v1445_v55 = vpop.permute.xlu1 %1444 }
 0x3a5   : > { %1471 = vrot.lane.b32.xlu0 %v1419_v44, %s2335_s20  ;;  %1489 = vrot.lane.b32.xlu1 %v1445_v55, %s2335_s20 }
 0x3a7   : > { %v1447_v35 = vpop.permute.xlu1 %1446 }
 0x3a9   : > { %1491 = vrot.lane.b32.xlu1 %v1447_v35, %s2335_s20 }
 0x3fb   : > { %v1474_v49 = vpop.permute.xlu0 %1473 }
 0x3fc   : > { %2160 = vmatprep.mubr.msk.bf16.mxu1 %vm353_vm0, %v1474_v49 }
 0x3ff   : > { %v1478_v38 = vpop.permute.xlu0 %1477  ;;  %v1476_v56 = vpop.permute.xlu1 %1475 }
 0x400   : > { %2161 = vmatmul.mubr.msk.bf16.vlgmr.msra.gmra.mrb[0].mxu1 %vm353_vm0, %v1476_v56 }
 0x401   : > { %2164 = vmatprep.mubr.msk.bf16.mxu1 %vm353_vm0, %v1478_v38 }
 0x403   : > { %v1462_v42 = vpop.permute.xlu0 %1461  ;;  %v1480_v29 = vpop.permute.xlu1 %1479 }
 0x404   : > { %2148 = vmatprep.mubr.msk.bf16.mxu0 %vm353_vm0, %v1462_v42 }
 0x407   : > { %v1464_v31 = vpop.permute.xlu0 %1463  ;;  %v1482_v26 = vpop.permute.xlu1 %1481 }
 0x408   : > { %2149 = vmatmul.mubr.msk.bf16.vlgmr.msra.gmra.mrb[8].mxu0 %vm353_vm0, %v1464_v31  ;;  %2165 = vmatmul.mubr.msk.bf16.gmra.mrb[4].mxu1 %vm353_vm0, %v1480_v29 }
 0x409   : > { %2168 = vmatprep.mubr.msk.bf16.mxu1 %vm353_vm0, %v1482_v26 }
 0x40b   : > { %v1466_v21 = vpop.permute.xlu0 %1465  ;;  %v1484_v36 = vpop.permute.xlu1 %1483 }
 0x40c   : > { %2152 = vmatprep.mubr.msk.bf16.mxu0 %vm353_vm0, %v1466_v21 }
 0x40f   : > { %v1468_v33 = vpop.permute.xlu0 %1467  ;;  %v1486_v32 = vpop.permute.xlu1 %1485 }
 0x410   : > { %2153 = vmatmul.mubr.msk.bf16.gmra.mrb[12].mxu0 %vm353_vm0, %v1468_v33  ;;  %2169 = vmatmul.mubr.msk.bf16.gmra.mrb[8].mxu1 %vm353_vm0, %v1484_v36 }
 0x411   : > { %2172 = vmatprep.mubr.msk.bf16.mxu1 %vm353_vm0, %v1486_v32 }
 0x413   : > { %v1470_v27 = vpop.permute.xlu0 %1469  ;;  %v1488_v9 = vpop.permute.xlu1 %1487 }
 0x414   : > { %2156 = vmatprep.mubr.msk.bf16.mxu0 %vm353_vm0, %v1470_v27 }
 0x417   : > { %v1472_v59 = vpop.permute.xlu0 %1471  ;;  %v1490_v39 = vpop.permute.xlu1 %1489 }
 0x418   : > { %2157 = vmatmul.mubr.msk.bf16.gmra.mrb[16].mxu0 %vm353_vm0, %v1472_v59  ;;  %2173 = vmatmul.mubr.msk.bf16.gmra.mrb[12].mxu1 %vm353_vm0, %v1488_v9 }
 0x419   : > { %2176 = vmatprep.mubr.msk.bf16.mxu1 %vm353_vm0, %v1490_v39 }
 0x41b   : > { %v1492_v40 = vpop.permute.xlu1 %1491 }
 0x420   : > { %2177 = vmatmul.mubr.msk.bf16.gmra.mrb[16].mxu1 %vm353_vm0, %v1492_v40 }
 0x4d3   : > { %v3237_v2 = vpop.f32.mrb[0].mxu1 }
 0x4d4   : > { %v3239_v53 = vpop.f32.mrb[1].mxu1 }
 0x4d5   : > { %v3241_v3 = vpop.f32.mrb[2].mxu1 }
 0x4d6   : > { %v3243_v0 = vpop.f32.mrb[3].mxu1 }
 0x4db   : > { %v2150_v8 = vpop.f32.mrb[8].mxu0  ;;  %v2166_v14 = vpop.f32.mrb[4].mxu1 }
 0x4dc   : > { %v1590_v43 = vadd.f32 %v2150_v8, %v3248_v12  ;;  %v1581_v37 = vpop.f32.mrb[9].mxu0  ;;  %v1654_v7 = vadd.f32 %v2166_v14, %v3248_v12  ;;  %v1645_v5 = vpop.f32.mrb[5].mxu1 }
 0x4dd   : > { %v1582_v52 = vadd.f32 %v3248_v12, %v1581_v37  ;;  %v2151_v25 = vpop.f32.mrb[10].mxu0  ;;  %v1646_v1 = vadd.f32 %v3248_v12, %v1645_v5  ;;  %v2167_v45 = vpop.f32.mrb[6].mxu1  ;;  %v1638_v37 = vadd.f32 %v3237_v2, %v3248_v12 }
 0x4de   : > { %v2084_v6 = vpack.c.bf16 %v1590_v43, %v1590_v43  ;;  %v1593_v18 = vadd.f32 %v2151_v25, %v3248_v12  ;;  %v1584_v62 = vpop.f32.mrb[11].mxu0  ;;  %v2100_v60 = vpack.c.bf16 %v1654_v7, %v1654_v7  ;;  %v1657_v4 = vadd.f32 %v2167_v45, %v3248_v12  ;;  %v1648_v28 = vpop.f32.mrb[7].mxu1 }
 0x4df   : > { %v2082_v10 = vpack.c.bf16 %v1582_v52, %v1582_v52  ;;  %v1585_v63 = vadd.f32 %v3248_v12, %v1584_v62  ;;  %v2098_v19 = vpack.c.bf16 %v1646_v1, %v1646_v1  ;;  %v1649_v24 = vadd.f32 %v3248_v12, %v1648_v28 }
 0x4e0   : > { %1742 = vst.msk [vmem:[%s3256_s18 + $0x10] sm:$0xf] %vm463_vm1, %v2084_v6  ;;  %v2085_v54 = vpack.c.bf16 %v1593_v18, %v1593_v18  ;;  %1839 = vst.msk [vmem:[%s3256_s18 + $0x14] sm:$0xf] %vm463_vm1, %v2100_v60  ;;  %v2101_v41 = vpack.c.bf16 %v1657_v4, %v1657_v4  ;;  %v1641_v52 = vadd.f32 %v3241_v3, %v3248_v12 }
 0x4e1   : > { %1740 = vst.msk [vmem:[%s3256_s18] sm:$0xf] %vm463_vm1, %v2082_v10  ;;  %v2083_v47 = vpack.c.bf16 %v1585_v63, %v1585_v63  ;;  %1837 = vst.msk [vmem:[%s3256_s18 + $0x4] sm:$0xf] %vm463_vm1, %v2098_v19  ;;  %v2099_v13 = vpack.c.bf16 %v1649_v24, %v1649_v24  ;;  %v2096_v1 = vpack.c.bf16 %v1638_v37, %v1638_v37 }
 0x4e2   : > { %1743 = vst.msk [vmem:[%s3256_s18 + $0x18] sm:$0xf] %vm463_vm1, %v2085_v54  ;;  %1840 = vst.msk [vmem:[%s3256_s18 + $0x1c] sm:$0xf] %vm463_vm1, %v2101_v41  ;;  %v1630_v18 = vadd.f32 %v3248_v12, %v3239_v53  ;;  %v2097_v2 = vpack.c.bf16 %v1641_v52, %v1641_v52  ;;  %v1633_v60 = vadd.f32 %v3248_v12, %v3243_v0 }
 0x4e3   : > { %1741 = vst.msk [vmem:[%s3256_s18 + $0x8] sm:$0xf] %vm463_vm1, %v2083_v47  ;;  %v2154_v50 = vpop.f32.mrb[12].mxu0  ;;  %1838 = vst.msk [vmem:[%s3256_s18 + $0xc] sm:$0xf] %vm463_vm1, %v2099_v13  ;;  %v2170_v16 = vpop.f32.mrb[8].mxu1 }
 0x4e4   : > { %v1606_v23 = vadd.f32 %v2154_v50, %v3248_v12  ;;  %v1597_v61 = vpop.f32.mrb[13].mxu0  ;;  %v1670_v17 = vadd.f32 %v2170_v16, %v3248_v12  ;;  %v1661_v11 = vpop.f32.mrb[9].mxu1  ;;  %v2094_v3 = vpack.c.bf16 %v1630_v18, %v1630_v18  ;;  %v2095_v4 = vpack.c.bf16 %v1633_v60, %v1633_v60 }
 0x4e5   : > { %v1598_v34 = vadd.f32 %v3248_v12, %v1597_v61  ;;  %v2155_v20 = vpop.f32.mrb[14].mxu0  ;;  %v1662_v46 = vadd.f32 %v3248_v12, %v1661_v11  ;;  %v2171_v30 = vpop.f32.mrb[10].mxu1 }
 0x4e6   : > { %v2088_v51 = vpack.c.bf16 %v1606_v23, %v1606_v23  ;;  %v1609_v48 = vadd.f32 %v2155_v20, %v3248_v12  ;;  %v1600_v15 = vpop.f32.mrb[15].mxu0  ;;  %v2104_v58 = vpack.c.bf16 %v1670_v17, %v1670_v17  ;;  %v1673_v57 = vadd.f32 %v2171_v30, %v3248_v12  ;;  %v1664_v55 = vpop.f32.mrb[11].mxu1 }
 0x4e7   : > { %v2086_v22 = vpack.c.bf16 %v1598_v34, %v1598_v34  ;;  %v1601_v44 = vadd.f32 %v3248_v12, %v1600_v15  ;;  %v2102_v35 = vpack.c.bf16 %v1662_v46, %v1662_v46  ;;  %v1665_v38 = vadd.f32 %v3248_v12, %v1664_v55 }
 0x4e8   : > { %1746 = vst.msk [vmem:[%s3256_s18 + $0x30] sm:$0xf] %vm463_vm1, %v2088_v51  ;;  %v2089_v49 = vpack.c.bf16 %v1609_v48, %v1609_v48  ;;  %1843 = vst.msk [vmem:[%s3256_s18 + $0x34] sm:$0xf] %vm463_vm1, %v2104_v58  ;;  %v2105_v56 = vpack.c.bf16 %v1673_v57, %v1673_v57 }
 0x4e9   : > { %1744 = vst.msk [vmem:[%s3256_s18 + $0x20] sm:$0xf] %vm463_vm1, %v2086_v22  ;;  %v2087_v42 = vpack.c.bf16 %v1601_v44, %v1601_v44  ;;  %1841 = vst.msk [vmem:[%s3256_s18 + $0x24] sm:$0xf] %vm463_vm1, %v2102_v35  ;;  %v2103_v29 = vpack.c.bf16 %v1665_v38, %v1665_v38 }
 0x4ea   : > { %1747 = vst.msk [vmem:[%s3256_s18 + $0x38] sm:$0xf] %vm463_vm1, %v2089_v49  ;;  %1844 = vst.msk [vmem:[%s3256_s18 + $0x3c] sm:$0xf] %vm463_vm1, %v2105_v56 }
 0x4eb   : > { %1745 = vst.msk [vmem:[%s3256_s18 + $0x28] sm:$0xf] %vm463_vm1, %v2087_v42  ;;  %v2158_v31 = vpop.f32.mrb[16].mxu0  ;;  %1842 = vst.msk [vmem:[%s3256_s18 + $0x2c] sm:$0xf] %vm463_vm1, %v2103_v29  ;;  %v2174_v21 = vpop.f32.mrb[12].mxu1 }
 0x4ec   : > { %v1622_v26 = vadd.f32 %v2158_v31, %v3248_v12  ;;  %v1613_v36 = vpop.f32.mrb[17].mxu0  ;;  %v1677_v33 = vpop.f32.mrb[13].mxu1  ;;  %v1686_v10 = vadd.f32 %v2174_v21, %v3248_v12 }
 0x4ed   : > { %v2159_v32 = vpop.f32.mrb[18].mxu0  ;;  %v1614_v9 = vadd.f32 %v3248_v12, %v1613_v36  ;;  %v2175_v39 = vpop.f32.mrb[14].mxu1  ;;  %v1678_v28 = vadd.f32 %v3248_v12, %v1677_v33 }
 0x4ee   : > { %v2092_v27 = vpack.c.bf16 %v1622_v26, %v1622_v26  ;;  %v1625_v59 = vadd.f32 %v2159_v32, %v3248_v12  ;;  %v1616_v40 = vpop.f32.mrb[19].mxu0  ;;  %v1680_v8 = vpop.f32.mrb[15].mxu1  ;;  %v1689_v63 = vadd.f32 %v2175_v39, %v3248_v12  ;;  %v2108_v53 = vpack.c.bf16 %v1686_v10, %v1686_v10 }
 0x4ef   : > { %v1617_v14 = vadd.f32 %v3248_v12, %v1616_v40  ;;  %v2090_v7 = vpack.c.bf16 %v1614_v9, %v1614_v9  ;;  %v1681_v0 = vadd.f32 %v3248_v12, %v1680_v8  ;;  %v2106_v54 = vpack.c.bf16 %v1678_v28, %v1678_v28 }
 0x4f0   : > { %v2093_v43 = vpack.c.bf16 %v1625_v59, %v1625_v59  ;;  %1776 = vrot.lane.b32.xlu0 %v2092_v27, %s2335_s20  ;;  %v2109_v19 = vpack.c.bf16 %v1689_v63, %v1689_v63 }
 0x4f1   : > { %v2091_v5 = vpack.c.bf16 %v1617_v14, %v1617_v14  ;;  %v2107_v41 = vpack.c.bf16 %v1681_v0, %v1681_v0 }
 0x4f2   : > { %1778 = vrot.lane.b32.xlu1 %v2093_v43, %s2335_s20 }
 0x4f3   : > { %v2178_v25 = vpop.f32.mrb[16].mxu1 }
 0x4f4   : > { %1772 = vrot.lane.b32.xlu0 %v2090_v7, %s2335_s20  ;;  %v1693_v6 = vpop.f32.mrb[17].mxu1  ;;  %v1702_v13 = vadd.f32 %v2178_v25, %v3248_v12 }
 0x4f5   : > { %v2179_v45 = vpop.f32.mrb[18].mxu1  ;;  %v1694_v24 = vadd.f32 %v3248_v12, %v1693_v6 }
 0x4f6   : > { %1774 = vrot.lane.b32.xlu1 %v2091_v5, %s2335_s20  ;;  %v1696_v62 = vpop.f32.mrb[19].mxu1  ;;  %v1705_v23 = vadd.f32 %v2179_v45, %v3248_v12  ;;  %v2112_v61 = vpack.c.bf16 %v1702_v13, %v1702_v13 }
 0x4f7   : > { %v1697_v47 = vadd.f32 %v3248_v12, %v1696_v62  ;;  %v2110_v50 = vpack.c.bf16 %v1694_v24, %v1694_v24 }
 0x4f8   : > { %1784 = vrot.lane.b32.xlu0 %v2096_v1, %s2335_s20  ;;  %v2113_v17 = vpack.c.bf16 %v1705_v23, %v1705_v23 }
 0x4f9   : > { %v2111_v16 = vpack.c.bf16 %v1697_v47, %v1697_v47 }
 0x4fa   : > { %1786 = vrot.lane.b32.xlu1 %v2097_v2, %s2335_s20 }
 0x4fc   : > { %1780 = vrot.lane.b32.xlu0 %v2094_v3, %s2335_s20 }
 0x4fe   : > { %1782 = vrot.lane.b32.xlu1 %v2095_v4, %s2335_s20 }
 0x500   : > { %1873 = vrot.lane.b32.xlu0 %v2108_v53, %s2335_s20 }
 0x502   : > { %1875 = vrot.lane.b32.xlu1 %v2109_v19, %s2335_s20 }
 0x504   : > { %1869 = vrot.lane.b32.xlu0 %v2106_v54, %s2335_s20 }
 0x506   : > { %1871 = vrot.lane.b32.xlu1 %v2107_v41, %s2335_s20 }
 0x508   : > { %1877 = vrot.lane.b32.xlu0 %v2110_v50, %s2335_s20 }
 0x50a   : > { %1879 = vrot.lane.b32.xlu1 %v2111_v16, %s2335_s20 }
 0x50c   : > { %1881 = vrot.lane.b32.xlu0 %v2112_v61, %s2335_s20 }
 0x50e   : > { %1883 = vrot.lane.b32.xlu1 %v2113_v17, %s2335_s20 }
 0x562   : > { %v1777_v34 = vpop.permute.xlu0 %1776 }
 0x563   : > { %1799 = vst.msk [vmem:[%s3256_s18 + $0x10] sm:$0xf] %vm1796_vm2, %v1777_v34 }
 0x564   : > { %v1779_v12 = vpop.permute.xlu1 %1778 }
 0x565   : > { %1800 = vst.msk [vmem:[%s3256_s18 + $0x18] sm:$0xf] %vm1796_vm2, %v1779_v12 }
 0x566   : > { %v1773_v11 = vpop.permute.xlu0 %1772 }
 0x567   : > { %1797 = vst.msk [vmem:[%s3256_s18] sm:$0xf] %vm1796_vm2, %v1773_v11 }
 0x568   : > { %v1775_v20 = vpop.permute.xlu1 %1774 }
 0x569   : > { %1798 = vst.msk [vmem:[%s3256_s18 + $0x8] sm:$0xf] %vm1796_vm2, %v1775_v20 }
 0x56a   : > { %v1785_v51 = vpop.permute.xlu0 %1784 }
 0x56b   : > { %1803 = vst.msk [vmem:[%s3256_s18 + $0x30] sm:$0xf] %vm1796_vm2, %v1785_v51 }
 0x56c   : > { %v1787_v46 = vpop.permute.xlu1 %1786 }
 0x56d   : > { %1804 = vst.msk [vmem:[%s3256_s18 + $0x38] sm:$0xf] %vm1796_vm2, %v1787_v46 }
 0x56e   : > { %v1781_v48 = vpop.permute.xlu0 %1780 }
 0x56f   : > { %1801 = vst.msk [vmem:[%s3256_s18 + $0x20] sm:$0xf] %vm1796_vm2, %v1781_v48 }
 0x570   : > { %v1783_v30 = vpop.permute.xlu1 %1782 }
 0x571   : > { %1802 = vst.msk [vmem:[%s3256_s18 + $0x28] sm:$0xf] %vm1796_vm2, %v1783_v30 }
 0x572   : > { %v1874_v15 = vpop.permute.xlu0 %1873 }
 0x573   : > { %1895 = vst.msk [vmem:[%s3256_s18 + $0x14] sm:$0xf] %vm1796_vm2, %v1874_v15 }
 0x574   : > { %v1876_v58 = vpop.permute.xlu1 %1875 }
 0x575   : > { %1896 = vst.msk [vmem:[%s3256_s18 + $0x1c] sm:$0xf] %vm1796_vm2, %v1876_v58 }
 0x576   : > { %v1870_v22 = vpop.permute.xlu0 %1869 }
 0x577   : > { %1893 = vst.msk [vmem:[%s3256_s18 + $0x4] sm:$0xf] %vm1796_vm2, %v1870_v22 }
 0x578   : > { %v1872_v57 = vpop.permute.xlu1 %1871 }
 0x579   : > { %1894 = vst.msk [vmem:[%s3256_s18 + $0xc] sm:$0xf] %vm1796_vm2, %v1872_v57 }
 0x57a   : > { %v1878_v44 = vpop.permute.xlu0 %1877 }
 0x57b   : > { %1897 = vst.msk [vmem:[%s3256_s18 + $0x24] sm:$0xf] %vm1796_vm2, %v1878_v44 }
 0x57c   : > { %v1880_v55 = vpop.permute.xlu1 %1879 }
 0x57d   : > { %1898 = vst.msk [vmem:[%s3256_s18 + $0x2c] sm:$0xf] %vm1796_vm2, %v1880_v55 }
 0x57e   : > { %v1882_v35 = vpop.permute.xlu0 %1881 }
 0x57f   : > { %1899 = vst.msk [vmem:[%s3256_s18 + $0x34] sm:$0xf] %vm1796_vm2, %v1882_v35 }
 0x580   : > { %v1884_v49 = vpop.permute.xlu1 %1883 }
 0x581   : > { %1900 = vst.msk [vmem:[%s3256_s18 + $0x3c] sm:$0xf] %vm1796_vm2, %v1884_v49 }
 0x582 PF: > { %s19_s27 = sadd.s32 1, %s2333_s27  }
 0x583   : > { %p16_p4 = scmp.ge.s32.totalorder %s19_s27, 4  }
 0x585   :  { %18 = sbr.rel (!%p16_p4) target bundleno = 1 (0x1), region = 90 }

</bundles_post_ra>
